<compile_context>
chip_gen: v7x
topology: tpu7x:2x2x1
jax: 0.10.0
libtpu: 0.0.40
codegen_flags: <defaults>
</compile_context>

<pallas_src>
import functools
import math

import jax
import jax.numpy as jnp
from jax import lax
from jax.experimental import pallas as pl
from jax.experimental.pallas import tpu as pltpu


VMEM_SPEC = pl.BlockSpec(memory_space=pltpu.MemorySpace.VMEM)
LN_EPS = 1e-12  # eps of every LayerNorm in the PyTorch module


def _row_tile(n, target=256):
    """Largest multiple-of-8 divisor of n that is <= target (or n itself)."""
    if n <= target:
        return n
    t = (target // 8) * 8
    while t >= 8:
        if n % t == 0:
            return t
        t -= 8
    return n


def _seq_tile(s, target=128):
    if s <= target:
        return s
    t = (target // 8) * 8
    while t >= 8:
        if s % t == 0:
            return t
        t -= 8
    return s


# -------------------- Pallas kernels --------------------

def _ln_linear_kernel(x_ref, g_ref, b_ref, wT_ref, bias_ref, o_ref):
    # o = LayerNorm(x) @ W^T + bias        (wT_ref: bf16 [Din, Dout], resident)
    x = x_ref[...]
    mu = jnp.mean(x, axis=-1, keepdims=True)
    xc = x - mu
    inv = lax.rsqrt(jnp.mean(xc * xc, axis=-1, keepdims=True) + LN_EPS)
    y = xc * inv * g_ref[...] + b_ref[...]
    o_ref[...] = (
        jnp.dot(y.astype(jnp.bfloat16), wT_ref[...],
                preferred_element_type=jnp.float32)
        + bias_ref[...]
    )


def ln_linear(x, g, b, wT, bias):
    n, e = x.shape
    dout = wT.shape[1]
    tr = _row_tile(n)
    row_in = pl.BlockSpec((tr, e), lambda i: (i, 0))
    vec_e = pl.BlockSpec((1, e), lambda i: (0, 0))
    return pl.pallas_call(
        _ln_linear_kernel,
        out_shape=jax.ShapeDtypeStruct((n, dout), jnp.float32),
        grid=(n // tr,),
        in_specs=[row_in, vec_e, vec_e,
                  pl.BlockSpec((e, dout), lambda i: (0, 0)),
                  pl.BlockSpec((1, dout), lambda i: (0, 0))],
        out_specs=pl.BlockSpec((tr, dout), lambda i: (i, 0)),
        compiler_params=pltpu.CompilerParams(dimension_semantics=("parallel",)),
    )(x, g.reshape(1, e), b.reshape(1, e), wT, bias.reshape(1, dout))


def _lstm_kernel(gx_ref, whhT_ref, o_ref):
    # gx_ref: [S, B, 4E] = LN(x) @ W_ih^T + b_ih + b_hh (precomputed)
    # whhT_ref: bf16 [E, 4E];  zero initial (h, c) (hidden=None in SHARNN)
    S, B, E4 = gx_ref.shape
    E = E4 // 4
    whhT = whhT_ref[...]
    u = 4 if S % 4 == 0 else (2 if S % 2 == 0 else 1)  # manual unroll factor

    def step(tt, carry):
        h, c = carry
        for j in range(u):
            t = tt * u + j
            g = gx_ref[t] + jnp.dot(h.astype(jnp.bfloat16), whhT,
                                    preferred_element_type=jnp.float32)
            i = jax.nn.sigmoid(g[:, 0:E])
            f = jax.nn.sigmoid(g[:, E:2 * E])
            gg = jnp.tanh(g[:, 2 * E:3 * E])
            o = jax.nn.sigmoid(g[:, 3 * E:4 * E])
            c = f * c + i * gg
            h = o * jnp.tanh(c)
            o_ref[t] = h
        return (h, c)

    h0 = jnp.zeros((B, E), jnp.float32)
    c0 = jnp.zeros((B, E), jnp.float32)
    lax.fori_loop(0, S // u, step, (h0, c0))


def lstm(gx, w_hh_T):
    S, B, E4 = gx.shape
    E = E4 // 4
    return pl.pallas_call(
        _lstm_kernel,
        out_shape=jax.ShapeDtypeStruct((S, B, E), jnp.float32),
        in_specs=[VMEM_SPEC, VMEM_SPEC],
        out_specs=VMEM_SPEC,
    )(gx, w_hh_T)


def _attn_prep_kernel(x_ref, mg_ref, mb_ref, dg_ref, db_ref,
                      wqT_ref, bq_ref, qg_ref, qb_ref, vs_ref,
                      mh_ref, hm_ref, q_ref, v_ref):
    # Fused: mh = lnmem(x), hm = lnmid(x), v = vs * mh,
    #        q = qln(hm @ Wq^T + bq)        (both LNs share mean/var of x)
    x = x_ref[...]
    mu = jnp.mean(x, axis=-1, keepdims=True)
    xc = x - mu
    inv = lax.rsqrt(jnp.mean(xc * xc, axis=-1, keepdims=True) + LN_EPS)
    xn = xc * inv
    mh = xn * mg_ref[...] + mb_ref[...]
    hm = xn * dg_ref[...] + db_ref[...]
    mh_ref[...] = mh
    hm_ref[...] = hm
    v_ref[...] = mh * vs_ref[...]

    qp = (jnp.dot(hm.astype(jnp.bfloat16), wqT_ref[...],
                  preferred_element_type=jnp.float32) + bq_ref[...])
    qmu = jnp.mean(qp, axis=-1, keepdims=True)
    qc = qp - qmu
    qinv = lax.rsqrt(jnp.mean(qc * qc, axis=-1, keepdims=True) + LN_EPS)
    q_ref[...] = qc * qinv * qg_ref[...] + qb_ref[...]


def attn_prep(x, p, vs):
    n, e = x.shape
    tr = _row_tile(n)
    row = pl.BlockSpec((tr, e), lambda i: (i, 0))
    vec = pl.BlockSpec((1, e), lambda i: (0, 0))
    wsp = pl.BlockSpec((e, e), lambda i: (0, 0))
    outs = tuple(jax.ShapeDtypeStruct((n, e), jnp.float32) for _ in range(4))
    return pl.pallas_call(
        _attn_prep_kernel,
        out_shape=outs,
        grid=(n // tr,),
        in_specs=[row, vec, vec, vec, vec, wsp, vec, vec, vec, vec],
        out_specs=(row, row, row, row),
        compiler_params=pltpu.CompilerParams(dimension_semantics=("parallel",)),
    )(x,
      p["lnmem_g"].reshape(1, e), p["lnmem_b"].reshape(1, e),
      p["lnmid_g"].reshape(1, e), p["lnmid_b"].reshape(1, e),
      p["q_wT"], p["q_b"].reshape(1, e),
      p["qln_g"].reshape(1, e), p["qln_b"].reshape(1, e),
      vs)


def _flash_attn_kernel(q_ref, k_ref, v_ref, o_ref, m_sc, l_sc, acc_sc, *, scale):
    # q_ref/k_ref/v_ref: [tile, B, E] (seq-first); o_ref: [B, tq, E] (batch-first).
    # Online softmax over kv tiles; causal mask built in-kernel (finite -1e30).
    qi = pl.program_id(0)
    ki = pl.program_id(1)
    tq = q_ref.shape[0]
    tk = k_ref.shape[0]
    q_start = qi * tq
    k_start = ki * tk

    @pl.when(ki == 0)
    def _():
        m_sc[...] = jnp.full_like(m_sc, -jnp.inf)
        l_sc[...] = jnp.zeros_like(l_sc)
        acc_sc[...] = jnp.zeros_like(acc_sc)

    @pl.when(k_start < q_start + tq)  # skip kv tiles fully in the causal future
    def _():
        q = q_ref[...].astype(jnp.bfloat16)                      # [tq, B, E]
        k = k_ref[...].astype(jnp.bfloat16)                      # [tk, B, E]
        s = lax.dot_general(q, k, (((2,), (2,)), ((1,), (1,))),
                            preferred_element_type=jnp.float32) * scale  # [B,tq,tk]
        rows = q_start + lax.broadcasted_iota(jnp.int32, s.shape, 1)
        cols = k_start + lax.broadcasted_iota(jnp.int32, s.shape, 2)
        s = jnp.where(cols > rows, -1e30, s)
        m_prev = m_sc[...]
        m_new = jnp.maximum(m_prev, jnp.max(s, axis=-1, keepdims=True))
        alpha = jnp.exp(m_prev - m_new)
        p = jnp.exp(s - m_new)
        l_sc[...] = alpha * l_sc[...] + jnp.sum(p, axis=-1, keepdims=True)
        pv = lax.dot_general(p.astype(jnp.bfloat16),
                             v_ref[...].astype(jnp.bfloat16),
                             (((2,), (0,)), ((0,), (1,))),
                             preferred_element_type=jnp.float32)  # [B, tq, E]
        acc_sc[...] = alpha * acc_sc[...] + pv
        m_sc[...] = m_new

    @pl.when(ki == pl.num_programs(1) - 1)
    def _():
        o_ref[...] = acc_sc[...] * pl.reciprocal(l_sc[...], approx=True)


def flash_attention(q, k, v, *, scale):
    # q, k, v: [S, B, E] (seq-first).  Returns mix in [B, S, E].
    S, B, E = q.shape
    t = _seq_tile(S)
    q_spec = pl.BlockSpec((t, B, E), lambda qi, ki: (qi, 0, 0))
    kv_spec = pl.BlockSpec((t, B, E), lambda qi, ki: (ki, 0, 0))
    return pl.pallas_call(
        functools.partial(_flash_attn_kernel, scale=scale),
        out_shape=jax.ShapeDtypeStruct((B, S, E), jnp.float32),
        grid=(S // t, S // t),
        in_specs=[q_spec, kv_spec, kv_spec],
        out_specs=pl.BlockSpec((B, t, E), lambda qi, ki: (0, qi, 0)),
        scratch_shapes=[pltpu.VMEM((B, t, 1), jnp.float32),
                        pltpu.VMEM((B, t, 1), jnp.float32),
                        pltpu.VMEM((B, t, E), jnp.float32)],
        compiler_params=pltpu.CompilerParams(
            dimension_semantics=("parallel", "arbitrary")),
    )(q, k, v)


def _ff_kernel(x_ref, fg_ref, fb_ref, xg_ref, xb_ref, w1T_ref, b1_ref, o_ref):
    # Fused: o = Boom(lnxff(x)) + lnff(x)   (Boom shortcut=True: GELU + chunk-sum)
    x = x_ref[...]
    mu = jnp.mean(x, axis=-1, keepdims=True)
    xc = x - mu
    inv = lax.rsqrt(jnp.mean(xc * xc, axis=-1, keepdims=True) + LN_EPS)
    xn = xc * inv
    hff = xn * fg_ref[...] + fb_ref[...]
    hx = xn * xg_ref[...] + xb_ref[...]
    t = (jnp.dot(hx.astype(jnp.bfloat16), w1T_ref[...],
                 preferred_element_type=jnp.float32) + b1_ref[...])
    t = t * jax.nn.sigmoid(1.702 * t)  # GELU from the module
    e = o_ref.shape[-1]
    nchunks = t.shape[-1] // e
    z = t[:, 0:e]
    for c in range(1, nchunks):        # lane-aligned slices (e multiple of 128)
        z = z + t[:, c * e:(c + 1) * e]
    o_ref[...] = z + hff


def ff_fused(x, p):
    n, e = x.shape
    nhid = p["boom_w1_T"].shape[1]
    tr = _row_tile(n)
    row = pl.BlockSpec((tr, e), lambda i: (i, 0))
    vec_e = pl.BlockSpec((1, e), lambda i: (0, 0))
    return pl.pallas_call(
        _ff_kernel,
        out_shape=jax.ShapeDtypeStruct((n, e), jnp.float32),
        grid=(n // tr,),
        in_specs=[row, vec_e, vec_e, vec_e, vec_e,
                  pl.BlockSpec((e, nhid), lambda i: (0, 0)),
                  pl.BlockSpec((1, nhid), lambda i: (0, 0))],
        out_specs=row,
        compiler_params=pltpu.CompilerParams(dimension_semantics=("parallel",)),
    )(x,
      p["lnff_g"].reshape(1, e), p["lnff_b"].reshape(1, e),
      p["lnxff_g"].reshape(1, e), p["lnxff_b"].reshape(1, e),
      p["boom_w1_T"], p["boom_b1"].reshape(1, nhid))


# -------------------- SHARNN forward (glue + kernel calls) --------------------

def _overparam_vs(p, E):
    # qs = ks = vs_in = sigmoid(0) = 0.5 ; vs = Overparam(0.5 * ones)  (tiny, host)
    vs_in = jnp.full((1, E), 0.5, jnp.float32)
    cf = vs_in @ p["vq_w"].T + p["vq_b"]                    # [1, 2E]
    return jax.nn.sigmoid(cf[:, E:]) * jnp.tanh(cf[:, :E])  # [1, E]


def block_forward(h, p, use_attn):
    S, B, E = h.shape
    N = S * B

    # lnstart fused into the LSTM gate projection (residual=False, so the
    # normalized activations feed only the LSTM; chunk-sum of the E-wide LSTM
    # output is the output itself).
    gx = ln_linear(h.reshape(N, E), p["lnstart_g"], p["lnstart_b"],
                   p["w_ih_T"], p["b_gates"])
    h = lstm(gx.reshape(S, B, 4 * E), p["w_hh_T"])
    # TODO(synk): final LSTM (h_n, c_n) state is not returned (unused for h).

    new_mem = None
    if use_attn:
        vs = _overparam_vs(p, E)
        mh, hm, q, v = attn_prep(h.reshape(N, E), p, vs)     # each [N, E]
        mh = mh.reshape(S, B, E)
        hm = hm.reshape(S, B, E)
        new_mem = mh                                          # mems=None -> bigh = mh
        # qs*ks = 0.25 folded into the score scale; k = mh, v = vs * mh.
        mix = flash_attention(q.reshape(S, B, E), mh, v.reshape(S, B, E),
                              scale=0.25 / math.sqrt(E))      # [B, S, E]
        # single fused XLA pass: back to seq-first + residual add.
        h = jnp.transpose(mix, (1, 0, 2)) + hm

    # lnff + lnxff + Boom(shortcut) + residual, fused.
    h = ff_fused(h.reshape(N, E), p).reshape(S, B, E)
    return h, new_mem


def sharnn_forward(params, x_tokens):
    """x_tokens: [seq, batch] int32 token ids.  Returns (h, new_mems)."""
    S, B = x_tokens.shape
    E = params["emb"].shape[1]

    # embedding lookup (gather; plain-JAX glue); idrop is identity in eval.
    h = jnp.take(params["emb"], x_tokens.reshape(-1), axis=0).reshape(S, B, E)

    nlayers = len(params["blocks"])
    new_mems = []
    for idx, bp in enumerate(params["blocks"]):
        h, m = block_forward(h, bp, use_attn=(idx == nlayers - 2))
        new_mems.append(m)
    # final self.drop(h) is identity in eval mode
    return h, new_mems


# -------------------- deterministic parameter init --------------------

def init_params(key, ntoken, ninp, nhid, nlayers):
    E = ninp
    std = 0.1 / math.sqrt(ninp)          # SHARNN.init_weights std
    lstm_scale = 1.0 / math.sqrt(E)      # PyTorch LSTM default init range
    keys = jax.random.split(key, 1 + nlayers)

    params = {"emb": std * jax.random.normal(keys[0], (ntoken, E), jnp.float32)}
    blocks = []
    for idx in range(nlayers):
        k = jax.random.split(keys[1 + idx], 13)
        w_ih = jax.random.uniform(k[5], (4 * E, E), jnp.float32, -lstm_scale, lstm_scale)
        w_hh = jax.random.uniform(k[6], (4 * E, E), jnp.float32, -lstm_scale, lstm_scale)
        b_ih = jax.random.uniform(k[7], (4 * E,), jnp.float32, -lstm_scale, lstm_scale)
        b_hh = jax.random.uniform(k[8], (4 * E,), jnp.float32, -lstm_scale, lstm_scale)
        boom_w1 = std * jax.random.normal(k[9], (nhid, E), jnp.float32)
        bp = dict(
            lnstart_g=std * jax.random.normal(k[0], (E,), jnp.float32),
            lnstart_b=jnp.zeros((E,), jnp.float32),
            lnmem_g=std * jax.random.normal(k[1], (E,), jnp.float32),
            lnmem_b=jnp.zeros((E,), jnp.float32),
            lnmid_g=std * jax.random.normal(k[2], (E,), jnp.float32),
            lnmid_b=jnp.zeros((E,), jnp.float32),
            lnff_g=std * jax.random.normal(k[3], (E,), jnp.float32),
            lnff_b=jnp.zeros((E,), jnp.float32),
            lnxff_g=std * jax.random.normal(k[4], (E,), jnp.float32),
            lnxff_b=jnp.zeros((E,), jnp.float32),
            # weights stored pre-transposed and in bf16 for the MXU
            w_ih_T=w_ih.T.astype(jnp.bfloat16),
            w_hh_T=w_hh.T.astype(jnp.bfloat16),
            b_gates=b_ih + b_hh,
            boom_w1_T=boom_w1.T.astype(jnp.bfloat16),
            boom_b1=jnp.zeros((nhid,), jnp.float32),
        )
        if idx == nlayers - 2:  # only this block has attention (use_attn)
            q_w = std * jax.random.normal(k[10], (E, E), jnp.float32)
            bp.update(
                q_wT=q_w.T.astype(jnp.bfloat16),
                q_b=jnp.zeros((E,), jnp.float32),
                qln_g=std * jax.random.normal(k[11], (E,), jnp.float32),
                qln_b=jnp.zeros((E,), jnp.float32),
                vq_w=std * jax.random.normal(k[12], (2 * E, E), jnp.float32),
                vq_b=jnp.zeros((2 * E,), jnp.float32),
            )
        blocks.append(bp)
    params["blocks"] = blocks
    return params
    # NOTE: SHARNN.forward never uses self.decoder / pos_emb values, so they are
    # not materialized.


if __name__ == "__main__":
    ntoken, ninp, nhid, nlayers = 64, 128, 256, 2
    S, B = 8, 2

    key = jax.random.PRNGKey(0)
    pkey, xkey = jax.random.split(key)
    params = init_params(pkey, ntoken, ninp, nhid, nlayers)
    x = jax.random.randint(xkey, (S, B), 0, ntoken, dtype=jnp.int32)

    fwd = jax.jit(sharnn_forward)
    h, new_mems = fwd(params, x)
    jax.block_until_ready(h)
    assert h.shape == (S, B, ninp) and h.dtype == jnp.float32
    print("KERNEL_OK")
</pallas_src>

<mosaic_0001>
module attributes {stable_mosaic.version = 11 : i64} {
  func.func @_ln_linear_kernel(%arg0: i32, %arg1: memref<16x128xf32, #tpu.memory_space<vmem>>, %arg2: memref<1x128xf32, #tpu.memory_space<vmem>>, %arg3: memref<1x128xf32, #tpu.memory_space<vmem>>, %arg4: memref<128x512xbf16, #tpu.memory_space<vmem>>, %arg5: memref<1x512xf32, #tpu.memory_space<vmem>>, %arg6: memref<16x512xf32, #tpu.memory_space<vmem>>) attributes {dimension_semantics = [#tpu.dimension_semantics<parallel>], iteration_bounds = array<i64: 1>, scalar_prefetch = 0 : i64, scratch_operands = 0 : i64, tpu.core_type = #tpu.core_type<tc>, window_params = [{transform_indices = @transform_0, window_bounds = array<i64: 16, 128>}, {pipeline_mode = #tpu.pipeline_mode<synchronous>, transform_indices = @transform_1, window_bounds = array<i64: 1, 128>}, {pipeline_mode = #tpu.pipeline_mode<synchronous>, transform_indices = @transform_2, window_bounds = array<i64: 1, 128>}, {pipeline_mode = #tpu.pipeline_mode<synchronous>, transform_indices = @transform_3, window_bounds = array<i64: 128, 512>}, {pipeline_mode = #tpu.pipeline_mode<synchronous>, transform_indices = @transform_4, window_bounds = array<i64: 1, 512>}, {transform_indices = @transform_5, window_bounds = array<i64: 16, 512>}]} {
    %c0 = arith.constant 0 : index
    %c0_0 = arith.constant 0 : index
    %0 = vector.load %arg1[%c0, %c0_0] : memref<16x128xf32, #tpu.memory_space<vmem>>, vector<16x128xf32>
    %cst = arith.constant dense<0.000000e+00> : vector<16xf32>
    %1 = vector.multi_reduction <add>, %0, %cst [1] : vector<16x128xf32> to vector<16xf32>
    %2 = vector.shape_cast %1 : vector<16xf32> to vector<16x1xf32>
    %cst_1 = arith.constant 1.280000e+02 : f32
    %3 = vector.broadcast %cst_1 : f32 to vector<16x1xf32>
    %4 = arith.divf %2, %3 : vector<16x1xf32>
    %5 = vector.broadcast %4 : vector<16x1xf32> to vector<16x128xf32>
    %6 = arith.subf %0, %5 : vector<16x128xf32>
    %7 = arith.mulf %6, %6 : vector<16x128xf32>
    %cst_2 = arith.constant dense<0.000000e+00> : vector<16xf32>
    %8 = vector.multi_reduction <add>, %7, %cst_2 [1] : vector<16x128xf32> to vector<16xf32>
    %9 = vector.shape_cast %8 : vector<16xf32> to vector<16x1xf32>
    %cst_3 = arith.constant 1.280000e+02 : f32
    %10 = vector.broadcast %cst_3 : f32 to vector<16x1xf32>
    %11 = arith.divf %9, %10 : vector<16x1xf32>
    %cst_4 = arith.constant 9.99999996E-13 : f32
    %12 = vector.broadcast %cst_4 : f32 to vector<16x1xf32>
    %13 = arith.addf %11, %12 : vector<16x1xf32>
    %14 = math.rsqrt %13 : vector<16x1xf32>
    %15 = vector.broadcast %14 : vector<16x1xf32> to vector<16x128xf32>
    %16 = arith.mulf %6, %15 : vector<16x128xf32>
    %c0_5 = arith.constant 0 : index
    %c0_6 = arith.constant 0 : index
    %17 = vector.load %arg2[%c0_5, %c0_6] : memref<1x128xf32, #tpu.memory_space<vmem>>, vector<1x128xf32>
    %18 = vector.broadcast %17 : vector<1x128xf32> to vector<16x128xf32>
    %19 = arith.mulf %16, %18 : vector<16x128xf32>
    %c0_7 = arith.constant 0 : index
    %c0_8 = arith.constant 0 : index
    %20 = vector.load %arg3[%c0_7, %c0_8] : memref<1x128xf32, #tpu.memory_space<vmem>>, vector<1x128xf32>
    %21 = vector.broadcast %20 : vector<1x128xf32> to vector<16x128xf32>
    %22 = arith.addf %19, %21 : vector<16x128xf32>
    %23 = arith.truncf %22 : vector<16x128xf32> to vector<16x128xbf16>
    %c0_9 = arith.constant 0 : index
    %c0_10 = arith.constant 0 : index
    %24 = vector.load %arg4[%c0_9, %c0_10] : memref<128x512xbf16, #tpu.memory_space<vmem>>, vector<128x512xbf16>
    %cst_11 = arith.constant dense<0.000000e+00> : vector<16x512xf32>
    %25 = tpu.matmul %23, %24, %cst_11 {dimension_numbers = #tpu.dot_dimension_numbers<[1], [0], [0], [1], [0, 0, 1, 1], [], []>} : vector<16x128xbf16>, vector<128x512xbf16>, vector<16x512xf32> -> vector<16x512xf32>
    %c0_12 = arith.constant 0 : index
    %c0_13 = arith.constant 0 : index
    %26 = vector.load %arg5[%c0_12, %c0_13] : memref<1x512xf32, #tpu.memory_space<vmem>>, vector<1x512xf32>
    %27 = vector.broadcast %26 : vector<1x512xf32> to vector<16x512xf32>
    %28 = arith.addf %25, %27 : vector<16x512xf32>
    %c0_14 = arith.constant 0 : index
    %c0_15 = arith.constant 0 : index
    %29 = vector.load %arg6[%c0_14, %c0_15] : memref<16x512xf32, #tpu.memory_space<vmem>>, vector<16x512xf32>
    tpu.vector_store %arg6[%c0_14, %c0_15], %28 {strides = array<i32>} : memref<16x512xf32, #tpu.memory_space<vmem>>, vector<16x512xf32>,
    return
  }
  func.func @transform_0(%arg0: i32) -> (i32, i32) {
    %c0_i32 = arith.constant 0 : i32
    %c0_i32_0 = arith.constant 0 : i32
    return %arg0, %c0_i32 : i32, i32
  }
  func.func @transform_1(%arg0: i32) -> (i32, i32) {
    %c0_i32 = arith.constant 0 : i32
    %c0_i32_0 = arith.constant 0 : i32
    %c0_i32_1 = arith.constant 0 : i32
    return %c0_i32, %c0_i32_0 : i32, i32
  }
  func.func @transform_2(%arg0: i32) -> (i32, i32) {
    %c0_i32 = arith.constant 0 : i32
    %c0_i32_0 = arith.constant 0 : i32
    %c0_i32_1 = arith.constant 0 : i32
    return %c0_i32, %c0_i32_0 : i32, i32
  }
  func.func @transform_3(%arg0: i32) -> (i32, i32) {
    %c0_i32 = arith.constant 0 : i32
    %c0_i32_0 = arith.constant 0 : i32
    %c0_i32_1 = arith.constant 0 : i32
    return %c0_i32, %c0_i32_0 : i32, i32
  }
  func.func @transform_4(%arg0: i32) -> (i32, i32) {
    %c0_i32 = arith.constant 0 : i32
    %c0_i32_0 = arith.constant 0 : i32
    %c0_i32_1 = arith.constant 0 : i32
    return %c0_i32, %c0_i32_0 : i32, i32
  }
  func.func @transform_5(%arg0: i32) -> (i32, i32) {
    %c0_i32 = arith.constant 0 : i32
    %c0_i32_0 = arith.constant 0 : i32
    return %arg0, %c0_i32 : i32, i32
  }
}

module attributes {stable_mosaic.version = 11 : i64} {
  func.func @_lstm_kernel(%arg0: memref<8x2x512xf32, #tpu.memory_space<vmem>>, %arg1: memref<128x512xbf16, #tpu.memory_space<vmem>>, %arg2: memref<8x2x128xf32, #tpu.memory_space<vmem>>) attributes {dimension_semantics = [], scalar_prefetch = 0 : i64, scratch_operands = 0 : i64, tpu.core_type = #tpu.core_type<tc>} {
    %c0 = arith.constant 0 : index
    %c0_0 = arith.constant 0 : index
    %0 = vector.load %arg1[%c0, %c0_0] : memref<128x512xbf16, #tpu.memory_space<vmem>>, vector<128x512xbf16>
    %cst = arith.constant 0.000000e+00 : f32
    %1 = vector.broadcast %cst : f32 to vector<2x128xf32>
    %cst_1 = arith.constant 0.000000e+00 : f32
    %2 = vector.broadcast %cst_1 : f32 to vector<2x128xf32>
    %c0_i32 = arith.constant 0 : i32
    %c2_i32 = arith.constant 2 : i32
    %3 = arith.addi %c0_i32, %c2_i32 : i32
    %c1_i32 = arith.constant 1 : i32
    %4:2 = scf.for %arg3 = %c0_i32 to %3 step %c1_i32 iter_args(%arg4 = %1, %arg5 = %2) -> (vector<2x128xf32>, vector<2x128xf32>)  : i32 {
      %c4_i32 = arith.constant 4 : i32
      %5 = arith.muli %arg3, %c4_i32 : i32
      %c0_i32_3 = arith.constant 0 : i32
      %6 = arith.addi %5, %c0_i32_3 : i32
      %7 = arith.index_cast %6 : i32 to index
      %c0_4 = arith.constant 0 : index
      %c0_5 = arith.constant 0 : index
      %8 = vector.load %arg0[%7, %c0_4, %c0_5] : memref<8x2x512xf32, #tpu.memory_space<vmem>>, vector<1x2x512xf32>
      %9 = vector.shape_cast %8 : vector<1x2x512xf32> to vector<2x512xf32>
      %10 = arith.truncf %arg4 : vector<2x128xf32> to vector<2x128xbf16>
      %cst_6 = arith.constant dense<0.000000e+00> : vector<2x512xf32>
      %11 = tpu.matmul %10, %0, %cst_6 {dimension_numbers = #tpu.dot_dimension_numbers<[1], [0], [0], [1], [0, 0, 1, 1], [], []>} : vector<2x128xbf16>, vector<128x512xbf16>, vector<2x512xf32> -> vector<2x512xf32>
      %12 = arith.addf %9, %11 : vector<2x512xf32>
      %13 = vector.extract_strided_slice %12 {offsets = [0, 0], sizes = [2, 128], strides = [1, 1]} : vector<2x512xf32> to vector<2x128xf32>
      %14 = arith.negf %13 : vector<2x128xf32>
      %15 = math.exp %14 : vector<2x128xf32>
      %cst_7 = arith.constant 1.000000e+00 : f32
      %16 = vector.broadcast %cst_7 : f32 to vector<2x128xf32>
      %17 = arith.addf %16, %15 : vector<2x128xf32>
      %18 = arith.divf %16, %17 : vector<2x128xf32>
      %19 = vector.extract_strided_slice %12 {offsets = [0, 128], sizes = [2, 128], strides = [1, 1]} : vector<2x512xf32> to vector<2x128xf32>
      %20 = arith.negf %19 : vector<2x128xf32>
      %21 = math.exp %20 : vector<2x128xf32>
      %cst_8 = arith.constant 1.000000e+00 : f32
      %22 = vector.broadcast %cst_8 : f32 to vector<2x128xf32>
      %23 = arith.addf %22, %21 : vector<2x128xf32>
      %24 = arith.divf %22, %23 : vector<2x128xf32>
      %25 = vector.extract_strided_slice %12 {offsets = [0, 256], sizes = [2, 128], strides = [1, 1]} : vector<2x512xf32> to vector<2x128xf32>
      %26 = math.tanh %25 : vector<2x128xf32>
      %27 = vector.extract_strided_slice %12 {offsets = [0, 384], sizes = [2, 128], strides = [1, 1]} : vector<2x512xf32> to vector<2x128xf32>
      %28 = arith.negf %27 : vector<2x128xf32>
      %29 = math.exp %28 : vector<2x128xf32>
      %cst_9 = arith.constant 1.000000e+00 : f32
      %30 = vector.broadcast %cst_9 : f32 to vector<2x128xf32>
      %31 = arith.addf %30, %29 : vector<2x128xf32>
      %32 = arith.divf %30, %31 : vector<2x128xf32>
      %33 = arith.mulf %24, %arg5 : vector<2x128xf32>
      %34 = arith.mulf %18, %26 : vector<2x128xf32>
      %35 = arith.addf %33, %34 : vector<2x128xf32>
      %36 = math.tanh %35 : vector<2x128xf32>
      %37 = arith.mulf %32, %36 : vector<2x128xf32>
      %38 = arith.index_cast %6 : i32 to index
      %c0_10 = arith.constant 0 : index
      %c0_11 = arith.constant 0 : index
      %39 = vector.load %arg2[%38, %c0_10, %c0_11] : memref<8x2x128xf32, #tpu.memory_space<vmem>>, vector<1x2x128xf32>
      %40 = vector.shape_cast %39 : vector<1x2x128xf32> to vector<2x128xf32>
      %41 = vector.shape_cast %37 : vector<2x128xf32> to vector<1x2x128xf32>
      tpu.vector_store %arg2[%38, %c0_10, %c0_11], %41 {strides = array<i32>} : memref<8x2x128xf32, #tpu.memory_space<vmem>>, vector<1x2x128xf32>,
      %c4_i32_12 = arith.constant 4 : i32
      %42 = arith.muli %arg3, %c4_i32_12 : i32
      %c1_i32_13 = arith.constant 1 : i32
      %43 = arith.addi %42, %c1_i32_13 : i32
      %44 = arith.index_cast %43 : i32 to index
      %c0_14 = arith.constant 0 : index
      %c0_15 = arith.constant 0 : index
      %45 = vector.load %arg0[%44, %c0_14, %c0_15] : memref<8x2x512xf32, #tpu.memory_space<vmem>>, vector<1x2x512xf32>
      %46 = vector.shape_cast %45 : vector<1x2x512xf32> to vector<2x512xf32>
      %47 = arith.truncf %37 : vector<2x128xf32> to vector<2x128xbf16>
      %cst_16 = arith.constant dense<0.000000e+00> : vector<2x512xf32>
      %48 = tpu.matmul %47, %0, %cst_16 {dimension_numbers = #tpu.dot_dimension_numbers<[1], [0], [0], [1], [0, 0, 1, 1], [], []>} : vector<2x128xbf16>, vector<128x512xbf16>, vector<2x512xf32> -> vector<2x512xf32>
      %49 = arith.addf %46, %48 : vector<2x512xf32>
      %50 = vector.extract_strided_slice %49 {offsets = [0, 0], sizes = [2, 128], strides = [1, 1]} : vector<2x512xf32> to vector<2x128xf32>
      %51 = arith.negf %50 : vector<2x128xf32>
      %52 = math.exp %51 : vector<2x128xf32>
      %cst_17 = arith.constant 1.000000e+00 : f32
      %53 = vector.broadcast %cst_17 : f32 to vector<2x128xf32>
      %54 = arith.addf %53, %52 : vector<2x128xf32>
      %55 = arith.divf %53, %54 : vector<2x128xf32>
      %56 = vector.extract_strided_slice %49 {offsets = [0, 128], sizes = [2, 128], strides = [1, 1]} : vector<2x512xf32> to vector<2x128xf32>
      %57 = arith.negf %56 : vector<2x128xf32>
      %58 = math.exp %57 : vector<2x128xf32>
      %cst_18 = arith.constant 1.000000e+00 : f32
      %59 = vector.broadcast %cst_18 : f32 to vector<2x128xf32>
      %60 = arith.addf %59, %58 : vector<2x128xf32>
      %61 = arith.divf %59, %60 : vector<2x128xf32>
      %62 = vector.extract_strided_slice %49 {offsets = [0, 256], sizes = [2, 128], strides = [1, 1]} : vector<2x512xf32> to vector<2x128xf32>
      %63 = math.tanh %62 : vector<2x128xf32>
      %64 = vector.extract_strided_slice %49 {offsets = [0, 384], sizes = [2, 128], strides = [1, 1]} : vector<2x512xf32> to vector<2x128xf32>
      %65 = arith.negf %64 : vector<2x128xf32>
      %66 = math.exp %65 : vector<2x128xf32>
      %cst_19 = arith.constant 1.000000e+00 : f32
      %67 = vector.broadcast %cst_19 : f32 to vector<2x128xf32>
      %68 = arith.addf %67, %66 : vector<2x128xf32>
      %69 = arith.divf %67, %68 : vector<2x128xf32>
      %70 = arith.mulf %61, %35 : vector<2x128xf32>
      %71 = arith.mulf %55, %63 : vector<2x128xf32>
      %72 = arith.addf %70, %71 : vector<2x128xf32>
      %73 = math.tanh %72 : vector<2x128xf32>
      %74 = arith.mulf %69, %73 : vector<2x128xf32>
      %75 = arith.index_cast %43 : i32 to index
      %c0_20 = arith.constant 0 : index
      %c0_21 = arith.constant 0 : index
      %76 = vector.load %arg2[%75, %c0_20, %c0_21] : memref<8x2x128xf32, #tpu.memory_space<vmem>>, vector<1x2x128xf32>
      %77 = vector.shape_cast %76 : vector<1x2x128xf32> to vector<2x128xf32>
      %78 = vector.shape_cast %74 : vector<2x128xf32> to vector<1x2x128xf32>
      tpu.vector_store %arg2[%75, %c0_20, %c0_21], %78 {strides = array<i32>} : memref<8x2x128xf32, #tpu.memory_space<vmem>>, vector<1x2x128xf32>,
      %c4_i32_22 = arith.constant 4 : i32
      %79 = arith.muli %arg3, %c4_i32_22 : i32
      %c2_i32_23 = arith.constant 2 : i32
      %80 = arith.addi %79, %c2_i32_23 : i32
      %81 = arith.index_cast %80 : i32 to index
      %c0_24 = arith.constant 0 : index
      %c0_25 = arith.constant 0 : index
      %82 = vector.load %arg0[%81, %c0_24, %c0_25] : memref<8x2x512xf32, #tpu.memory_space<vmem>>, vector<1x2x512xf32>
      %83 = vector.shape_cast %82 : vector<1x2x512xf32> to vector<2x512xf32>
      %84 = arith.truncf %74 : vector<2x128xf32> to vector<2x128xbf16>
      %cst_26 = arith.constant dense<0.000000e+00> : vector<2x512xf32>
      %85 = tpu.matmul %84, %0, %cst_26 {dimension_numbers = #tpu.dot_dimension_numbers<[1], [0], [0], [1], [0, 0, 1, 1], [], []>} : vector<2x128xbf16>, vector<128x512xbf16>, vector<2x512xf32> -> vector<2x512xf32>
      %86 = arith.addf %83, %85 : vector<2x512xf32>
      %87 = vector.extract_strided_slice %86 {offsets = [0, 0], sizes = [2, 128], strides = [1, 1]} : vector<2x512xf32> to vector<2x128xf32>
      %88 = arith.negf %87 : vector<2x128xf32>
      %89 = math.exp %88 : vector<2x128xf32>
      %cst_27 = arith.constant 1.000000e+00 : f32
      %90 = vector.broadcast %cst_27 : f32 to vector<2x128xf32>
      %91 = arith.addf %90, %89 : vector<2x128xf32>
      %92 = arith.divf %90, %91 : vector<2x128xf32>
      %93 = vector.extract_strided_slice %86 {offsets = [0, 128], sizes = [2, 128], strides = [1, 1]} : vector<2x512xf32> to vector<2x128xf32>
      %94 = arith.negf %93 : vector<2x128xf32>
      %95 = math.exp %94 : vector<2x128xf32>
      %cst_28 = arith.constant 1.000000e+00 : f32
      %96 = vector.broadcast %cst_28 : f32 to vector<2x128xf32>
      %97 = arith.addf %96, %95 : vector<2x128xf32>
      %98 = arith.divf %96, %97 : vector<2x128xf32>
      %99 = vector.extract_strided_slice %86 {offsets = [0, 256], sizes = [2, 128], strides = [1, 1]} : vector<2x512xf32> to vector<2x128xf32>
      %100 = math.tanh %99 : vector<2x128xf32>
      %101 = vector.extract_strided_slice %86 {offsets = [0, 384], sizes = [2, 128], strides = [1, 1]} : vector<2x512xf32> to vector<2x128xf32>
      %102 = arith.negf %101 : vector<2x128xf32>
      %103 = math.exp %102 : vector<2x128xf32>
      %cst_29 = arith.constant 1.000000e+00 : f32
      %104 = vector.broadcast %cst_29 : f32 to vector<2x128xf32>
      %105 = arith.addf %104, %103 : vector<2x128xf32>
      %106 = arith.divf %104, %105 : vector<2x128xf32>
      %107 = arith.mulf %98, %72 : vector<2x128xf32>
      %108 = arith.mulf %92, %100 : vector<2x128xf32>
      %109 = arith.addf %107, %108 : vector<2x128xf32>
      %110 = math.tanh %109 : vector<2x128xf32>
      %111 = arith.mulf %106, %110 : vector<2x128xf32>
      %112 = arith.index_cast %80 : i32 to index
      %c0_30 = arith.constant 0 : index
      %c0_31 = arith.constant 0 : index
      %113 = vector.load %arg2[%112, %c0_30, %c0_31] : memref<8x2x128xf32, #tpu.memory_space<vmem>>, vector<1x2x128xf32>
      %114 = vector.shape_cast %113 : vector<1x2x128xf32> to vector<2x128xf32>
      %115 = vector.shape_cast %111 : vector<2x128xf32> to vector<1x2x128xf32>
      tpu.vector_store %arg2[%112, %c0_30, %c0_31], %115 {strides = array<i32>} : memref<8x2x128xf32, #tpu.memory_space<vmem>>, vector<1x2x128xf32>,
      %c4_i32_32 = arith.constant 4 : i32
      %116 = arith.muli %arg3, %c4_i32_32 : i32
      %c3_i32 = arith.constant 3 : i32
      %117 = arith.addi %116, %c3_i32 : i32
      %118 = arith.index_cast %117 : i32 to index
      %c0_33 = arith.constant 0 : index
      %c0_34 = arith.constant 0 : index
      %119 = vector.load %arg0[%118, %c0_33, %c0_34] : memref<8x2x512xf32, #tpu.memory_space<vmem>>, vector<1x2x512xf32>
      %120 = vector.shape_cast %119 : vector<1x2x512xf32> to vector<2x512xf32>
      %121 = arith.truncf %111 : vector<2x128xf32> to vector<2x128xbf16>
      %cst_35 = arith.constant dense<0.000000e+00> : vector<2x512xf32>
      %122 = tpu.matmul %121, %0, %cst_35 {dimension_numbers = #tpu.dot_dimension_numbers<[1], [0], [0], [1], [0, 0, 1, 1], [], []>} : vector<2x128xbf16>, vector<128x512xbf16>, vector<2x512xf32> -> vector<2x512xf32>
      %123 = arith.addf %120, %122 : vector<2x512xf32>
      %124 = vector.extract_strided_slice %123 {offsets = [0, 0], sizes = [2, 128], strides = [1, 1]} : vector<2x512xf32> to vector<2x128xf32>
      %125 = arith.negf %124 : vector<2x128xf32>
      %126 = math.exp %125 : vector<2x128xf32>
      %cst_36 = arith.constant 1.000000e+00 : f32
      %127 = vector.broadcast %cst_36 : f32 to vector<2x128xf32>
      %128 = arith.addf %127, %126 : vector<2x128xf32>
      %129 = arith.divf %127, %128 : vector<2x128xf32>
      %130 = vector.extract_strided_slice %123 {offsets = [0, 128], sizes = [2, 128], strides = [1, 1]} : vector<2x512xf32> to vector<2x128xf32>
      %131 = arith.negf %130 : vector<2x128xf32>
      %132 = math.exp %131 : vector<2x128xf32>
      %cst_37 = arith.constant 1.000000e+00 : f32
      %133 = vector.broadcast %cst_37 : f32 to vector<2x128xf32>
      %134 = arith.addf %133, %132 : vector<2x128xf32>
      %135 = arith.divf %133, %134 : vector<2x128xf32>
      %136 = vector.extract_strided_slice %123 {offsets = [0, 256], sizes = [2, 128], strides = [1, 1]} : vector<2x512xf32> to vector<2x128xf32>
      %137 = math.tanh %136 : vector<2x128xf32>
      %138 = vector.extract_strided_slice %123 {offsets = [0, 384], sizes = [2, 128], strides = [1, 1]} : vector<2x512xf32> to vector<2x128xf32>
      %139 = arith.negf %138 : vector<2x128xf32>
      %140 = math.exp %139 : vector<2x128xf32>
      %cst_38 = arith.constant 1.000000e+00 : f32
      %141 = vector.broadcast %cst_38 : f32 to vector<2x128xf32>
      %142 = arith.addf %141, %140 : vector<2x128xf32>
      %143 = arith.divf %141, %142 : vector<2x128xf32>
      %144 = arith.mulf %135, %109 : vector<2x128xf32>
      %145 = arith.mulf %129, %137 : vector<2x128xf32>
      %146 = arith.addf %144, %145 : vector<2x128xf32>
      %147 = math.tanh %146 : vector<2x128xf32>
      %148 = arith.mulf %143, %147 : vector<2x128xf32>
      %149 = arith.index_cast %117 : i32 to index
      %c0_39 = arith.constant 0 : index
      %c0_40 = arith.constant 0 : index
      %150 = vector.load %arg2[%149, %c0_39, %c0_40] : memref<8x2x128xf32, #tpu.memory_space<vmem>>, vector<1x2x128xf32>
      %151 = vector.shape_cast %150 : vector<1x2x128xf32> to vector<2x128xf32>
      %152 = vector.shape_cast %148 : vector<2x128xf32> to vector<1x2x128xf32>
      tpu.vector_store %arg2[%149, %c0_39, %c0_40], %152 {strides = array<i32>} : memref<8x2x128xf32, #tpu.memory_space<vmem>>, vector<1x2x128xf32>,
      scf.yield %148, %146 : vector<2x128xf32>, vector<2x128xf32>
    }
    %c2_i32_2 = arith.constant 2 : i32
    return
  }
}

module attributes {stable_mosaic.version = 11 : i64} {
  func.func @_attn_prep_kernel(%arg0: i32, %arg1: memref<16x128xf32, #tpu.memory_space<vmem>>, %arg2: memref<1x128xf32, #tpu.memory_space<vmem>>, %arg3: memref<1x128xf32, #tpu.memory_space<vmem>>, %arg4: memref<1x128xf32, #tpu.memory_space<vmem>>, %arg5: memref<1x128xf32, #tpu.memory_space<vmem>>, %arg6: memref<128x128xbf16, #tpu.memory_space<vmem>>, %arg7: memref<1x128xf32, #tpu.memory_space<vmem>>, %arg8: memref<1x128xf32, #tpu.memory_space<vmem>>, %arg9: memref<1x128xf32, #tpu.memory_space<vmem>>, %arg10: memref<1x128xf32, #tpu.memory_space<vmem>>, %arg11: memref<16x128xf32, #tpu.memory_space<vmem>>, %arg12: memref<16x128xf32, #tpu.memory_space<vmem>>, %arg13: memref<16x128xf32, #tpu.memory_space<vmem>>, %arg14: memref<16x128xf32, #tpu.memory_space<vmem>>) attributes {dimension_semantics = [#tpu.dimension_semantics<parallel>], iteration_bounds = array<i64: 1>, scalar_prefetch = 0 : i64, scratch_operands = 0 : i64, tpu.core_type = #tpu.core_type<tc>, window_params = [{transform_indices = @transform_0, window_bounds = array<i64: 16, 128>}, {pipeline_mode = #tpu.pipeline_mode<synchronous>, transform_indices = @transform_1, window_bounds = array<i64: 1, 128>}, {pipeline_mode = #tpu.pipeline_mode<synchronous>, transform_indices = @transform_2, window_bounds = array<i64: 1, 128>}, {pipeline_mode = #tpu.pipeline_mode<synchronous>, transform_indices = @transform_3, window_bounds = array<i64: 1, 128>}, {pipeline_mode = #tpu.pipeline_mode<synchronous>, transform_indices = @transform_4, window_bounds = array<i64: 1, 128>}, {pipeline_mode = #tpu.pipeline_mode<synchronous>, transform_indices = @transform_5, window_bounds = array<i64: 128, 128>}, {pipeline_mode = #tpu.pipeline_mode<synchronous>, transform_indices = @transform_6, window_bounds = array<i64: 1, 128>}, {pipeline_mode = #tpu.pipeline_mode<synchronous>, transform_indices = @transform_7, window_bounds = array<i64: 1, 128>}, {pipeline_mode = #tpu.pipeline_mode<synchronous>, transform_indices = @transform_8, window_bounds = array<i64: 1, 128>}, {pipeline_mode = #tpu.pipeline_mode<synchronous>, transform_indices = @transform_9, window_bounds = array<i64: 1, 128>}, {transform_indices = @transform_10, window_bounds = array<i64: 16, 128>}, {transform_indices = @transform_11, window_bounds = array<i64: 16, 128>}, {transform_indices = @transform_12, window_bounds = array<i64: 16, 128>}, {transform_indices = @transform_13, window_bounds = array<i64: 16, 128>}]} {
    %c0 = arith.constant 0 : index
    %c0_0 = arith.constant 0 : index
    %0 = vector.load %arg1[%c0, %c0_0] : memref<16x128xf32, #tpu.memory_space<vmem>>, vector<16x128xf32>
    %cst = arith.constant dense<0.000000e+00> : vector<16xf32>
    %1 = vector.multi_reduction <add>, %0, %cst [1] : vector<16x128xf32> to vector<16xf32>
    %2 = vector.shape_cast %1 : vector<16xf32> to vector<16x1xf32>
    %cst_1 = arith.constant 1.280000e+02 : f32
    %3 = vector.broadcast %cst_1 : f32 to vector<16x1xf32>
    %4 = arith.divf %2, %3 : vector<16x1xf32>
    %5 = vector.broadcast %4 : vector<16x1xf32> to vector<16x128xf32>
    %6 = arith.subf %0, %5 : vector<16x128xf32>
    %7 = arith.mulf %6, %6 : vector<16x128xf32>
    %cst_2 = arith.constant dense<0.000000e+00> : vector<16xf32>
    %8 = vector.multi_reduction <add>, %7, %cst_2 [1] : vector<16x128xf32> to vector<16xf32>
    %9 = vector.shape_cast %8 : vector<16xf32> to vector<16x1xf32>
    %cst_3 = arith.constant 1.280000e+02 : f32
    %10 = vector.broadcast %cst_3 : f32 to vector<16x1xf32>
    %11 = arith.divf %9, %10 : vector<16x1xf32>
    %cst_4 = arith.constant 9.99999996E-13 : f32
    %12 = vector.broadcast %cst_4 : f32 to vector<16x1xf32>
    %13 = arith.addf %11, %12 : vector<16x1xf32>
    %14 = math.rsqrt %13 : vector<16x1xf32>
    %15 = vector.broadcast %14 : vector<16x1xf32> to vector<16x128xf32>
    %16 = arith.mulf %6, %15 : vector<16x128xf32>
    %c0_5 = arith.constant 0 : index
    %c0_6 = arith.constant 0 : index
    %17 = vector.load %arg2[%c0_5, %c0_6] : memref<1x128xf32, #tpu.memory_space<vmem>>, vector<1x128xf32>
    %18 = vector.broadcast %17 : vector<1x128xf32> to vector<16x128xf32>
    %19 = arith.mulf %16, %18 : vector<16x128xf32>
    %c0_7 = arith.constant 0 : index
    %c0_8 = arith.constant 0 : index
    %20 = vector.load %arg3[%c0_7, %c0_8] : memref<1x128xf32, #tpu.memory_space<vmem>>, vector<1x128xf32>
    %21 = vector.broadcast %20 : vector<1x128xf32> to vector<16x128xf32>
    %22 = arith.addf %19, %21 : vector<16x128xf32>
    %c0_9 = arith.constant 0 : index
    %c0_10 = arith.constant 0 : index
    %23 = vector.load %arg4[%c0_9, %c0_10] : memref<1x128xf32, #tpu.memory_space<vmem>>, vector<1x128xf32>
    %24 = vector.broadcast %23 : vector<1x128xf32> to vector<16x128xf32>
    %25 = arith.mulf %16, %24 : vector<16x128xf32>
    %c0_11 = arith.constant 0 : index
    %c0_12 = arith.constant 0 : index
    %26 = vector.load %arg5[%c0_11, %c0_12] : memref<1x128xf32, #tpu.memory_space<vmem>>, vector<1x128xf32>
    %27 = vector.broadcast %26 : vector<1x128xf32> to vector<16x128xf32>
    %28 = arith.addf %25, %27 : vector<16x128xf32>
    %c0_13 = arith.constant 0 : index
    %c0_14 = arith.constant 0 : index
    %29 = vector.load %arg11[%c0_13, %c0_14] : memref<16x128xf32, #tpu.memory_space<vmem>>, vector<16x128xf32>
    tpu.vector_store %arg11[%c0_13, %c0_14], %22 {strides = array<i32>} : memref<16x128xf32, #tpu.memory_space<vmem>>, vector<16x128xf32>,
    %c0_15 = arith.constant 0 : index
    %c0_16 = arith.constant 0 : index
    %30 = vector.load %arg12[%c0_15, %c0_16] : memref<16x128xf32, #tpu.memory_space<vmem>>, vector<16x128xf32>
    tpu.vector_store %arg12[%c0_15, %c0_16], %28 {strides = array<i32>} : memref<16x128xf32, #tpu.memory_space<vmem>>, vector<16x128xf32>,
    %c0_17 = arith.constant 0 : index
    %c0_18 = arith.constant 0 : index
    %31 = vector.load %arg10[%c0_17, %c0_18] : memref<1x128xf32, #tpu.memory_space<vmem>>, vector<1x128xf32>
    %32 = vector.broadcast %31 : vector<1x128xf32> to vector<16x128xf32>
    %33 = arith.mulf %22, %32 : vector<16x128xf32>
    %c0_19 = arith.constant 0 : index
    %c0_20 = arith.constant 0 : index
    %34 = vector.load %arg14[%c0_19, %c0_20] : memref<16x128xf32, #tpu.memory_space<vmem>>, vector<16x128xf32>
    tpu.vector_store %arg14[%c0_19, %c0_20], %33 {strides = array<i32>} : memref<16x128xf32, #tpu.memory_space<vmem>>, vector<16x128xf32>,
    %35 = arith.truncf %28 : vector<16x128xf32> to vector<16x128xbf16>
    %c0_21 = arith.constant 0 : index
    %c0_22 = arith.constant 0 : index
    %36 = vector.load %arg6[%c0_21, %c0_22] : memref<128x128xbf16, #tpu.memory_space<vmem>>, vector<128x128xbf16>
    %cst_23 = arith.constant dense<0.000000e+00> : vector<16x128xf32>
    %37 = tpu.matmul %35, %36, %cst_23 {dimension_numbers = #tpu.dot_dimension_numbers<[1], [0], [0], [1], [0, 0, 1, 1], [], []>} : vector<16x128xbf16>, vector<128x128xbf16>, vector<16x128xf32> -> vector<16x128xf32>
    %c0_24 = arith.constant 0 : index
    %c0_25 = arith.constant 0 : index
    %38 = vector.load %arg7[%c0_24, %c0_25] : memref<1x128xf32, #tpu.memory_space<vmem>>, vector<1x128xf32>
    %39 = vector.broadcast %38 : vector<1x128xf32> to vector<16x128xf32>
    %40 = arith.addf %37, %39 : vector<16x128xf32>
    %cst_26 = arith.constant dense<0.000000e+00> : vector<16xf32>
    %41 = vector.multi_reduction <add>, %40, %cst_26 [1] : vector<16x128xf32> to vector<16xf32>
    %42 = vector.shape_cast %41 : vector<16xf32> to vector<16x1xf32>
    %cst_27 = arith.constant 1.280000e+02 : f32
    %43 = vector.broadcast %cst_27 : f32 to vector<16x1xf32>
    %44 = arith.divf %42, %43 : vector<16x1xf32>
    %45 = vector.broadcast %44 : vector<16x1xf32> to vector<16x128xf32>
    %46 = arith.subf %40, %45 : vector<16x128xf32>
    %47 = arith.mulf %46, %46 : vector<16x128xf32>
    %cst_28 = arith.constant dense<0.000000e+00> : vector<16xf32>
    %48 = vector.multi_reduction <add>, %47, %cst_28 [1] : vector<16x128xf32> to vector<16xf32>
    %49 = vector.shape_cast %48 : vector<16xf32> to vector<16x1xf32>
    %cst_29 = arith.constant 1.280000e+02 : f32
    %50 = vector.broadcast %cst_29 : f32 to vector<16x1xf32>
    %51 = arith.divf %49, %50 : vector<16x1xf32>
    %cst_30 = arith.constant 9.99999996E-13 : f32
    %52 = vector.broadcast %cst_30 : f32 to vector<16x1xf32>
    %53 = arith.addf %51, %52 : vector<16x1xf32>
    %54 = math.rsqrt %53 : vector<16x1xf32>
    %55 = vector.broadcast %54 : vector<16x1xf32> to vector<16x128xf32>
    %56 = arith.mulf %46, %55 : vector<16x128xf32>
    %c0_31 = arith.constant 0 : index
    %c0_32 = arith.constant 0 : index
    %57 = vector.load %arg8[%c0_31, %c0_32] : memref<1x128xf32, #tpu.memory_space<vmem>>, vector<1x128xf32>
    %58 = vector.broadcast %57 : vector<1x128xf32> to vector<16x128xf32>
    %59 = arith.mulf %56, %58 : vector<16x128xf32>
    %c0_33 = arith.constant 0 : index
    %c0_34 = arith.constant 0 : index
    %60 = vector.load %arg9[%c0_33, %c0_34] : memref<1x128xf32, #tpu.memory_space<vmem>>, vector<1x128xf32>
    %61 = vector.broadcast %60 : vector<1x128xf32> to vector<16x128xf32>
    %62 = arith.addf %59, %61 : vector<16x128xf32>
    %c0_35 = arith.constant 0 : index
    %c0_36 = arith.constant 0 : index
    %63 = vector.load %arg13[%c0_35, %c0_36] : memref<16x128xf32, #tpu.memory_space<vmem>>, vector<16x128xf32>
    tpu.vector_store %arg13[%c0_35, %c0_36], %62 {strides = array<i32>} : memref<16x128xf32, #tpu.memory_space<vmem>>, vector<16x128xf32>,
    return
  }
  func.func @transform_0(%arg0: i32) -> (i32, i32) {
    %c0_i32 = arith.constant 0 : i32
    %c0_i32_0 = arith.constant 0 : i32
    return %arg0, %c0_i32 : i32, i32
  }
  func.func @transform_1(%arg0: i32) -> (i32, i32) {
    %c0_i32 = arith.constant 0 : i32
    %c0_i32_0 = arith.constant 0 : i32
    %c0_i32_1 = arith.constant 0 : i32
    return %c0_i32, %c0_i32_0 : i32, i32
  }
  func.func @transform_2(%arg0: i32) -> (i32, i32) {
    %c0_i32 = arith.constant 0 : i32
    %c0_i32_0 = arith.constant 0 : i32
    %c0_i32_1 = arith.constant 0 : i32
    return %c0_i32, %c0_i32_0 : i32, i32
  }
  func.func @transform_3(%arg0: i32) -> (i32, i32) {
    %c0_i32 = arith.constant 0 : i32
    %c0_i32_0 = arith.constant 0 : i32
    %c0_i32_1 = arith.constant 0 : i32
    return %c0_i32, %c0_i32_0 : i32, i32
  }
  func.func @transform_4(%arg0: i32) -> (i32, i32) {
    %c0_i32 = arith.constant 0 : i32
    %c0_i32_0 = arith.constant 0 : i32
    %c0_i32_1 = arith.constant 0 : i32
    return %c0_i32, %c0_i32_0 : i32, i32
  }
  func.func @transform_5(%arg0: i32) -> (i32, i32) {
    %c0_i32 = arith.constant 0 : i32
    %c0_i32_0 = arith.constant 0 : i32
    %c0_i32_1 = arith.constant 0 : i32
    return %c0_i32, %c0_i32_0 : i32, i32
  }
  func.func @transform_6(%arg0: i32) -> (i32, i32) {
    %c0_i32 = arith.constant 0 : i32
    %c0_i32_0 = arith.constant 0 : i32
    %c0_i32_1 = arith.constant 0 : i32
    return %c0_i32, %c0_i32_0 : i32, i32
  }
  func.func @transform_7(%arg0: i32) -> (i32, i32) {
    %c0_i32 = arith.constant 0 : i32
    %c0_i32_0 = arith.constant 0 : i32
    %c0_i32_1 = arith.constant 0 : i32
    return %c0_i32, %c0_i32_0 : i32, i32
  }
  func.func @transform_8(%arg0: i32) -> (i32, i32) {
    %c0_i32 = arith.constant 0 : i32
    %c0_i32_0 = arith.constant 0 : i32
    %c0_i32_1 = arith.constant 0 : i32
    return %c0_i32, %c0_i32_0 : i32, i32
  }
  func.func @transform_9(%arg0: i32) -> (i32, i32) {
    %c0_i32 = arith.constant 0 : i32
    %c0_i32_0 = arith.constant 0 : i32
    %c0_i32_1 = arith.constant 0 : i32
    return %c0_i32, %c0_i32_0 : i32, i32
  }
  func.func @transform_10(%arg0: i32) -> (i32, i32) {
    %c0_i32 = arith.constant 0 : i32
    %c0_i32_0 = arith.constant 0 : i32
    return %arg0, %c0_i32 : i32, i32
  }
  func.func @transform_11(%arg0: i32) -> (i32, i32) {
    %c0_i32 = arith.constant 0 : i32
    %c0_i32_0 = arith.constant 0 : i32
    return %arg0, %c0_i32 : i32, i32
  }
  func.func @transform_12(%arg0: i32) -> (i32, i32) {
    %c0_i32 = arith.constant 0 : i32
    %c0_i32_0 = arith.constant 0 : i32
    return %arg0, %c0_i32 : i32, i32
  }
  func.func @transform_13(%arg0: i32) -> (i32, i32) {
    %c0_i32 = arith.constant 0 : i32
    %c0_i32_0 = arith.constant 0 : i32
    return %arg0, %c0_i32 : i32, i32
  }
}

module attributes {stable_mosaic.version = 11 : i64} {
  func.func @_flash_attn_kernel(%arg0: i32, %arg1: i32, %arg2: memref<8x2x128xf32, #tpu.memory_space<vmem>>, %arg3: memref<8x2x128xf32, #tpu.memory_space<vmem>>, %arg4: memref<8x2x128xf32, #tpu.memory_space<vmem>>, %arg5: memref<2x8x128xf32, #tpu.memory_space<vmem>>, %arg6: memref<2x8x1xf32, #tpu.memory_space<vmem>>, %arg7: memref<2x8x1xf32, #tpu.memory_space<vmem>>, %arg8: memref<2x8x128xf32, #tpu.memory_space<vmem>>) attributes {dimension_semantics = [#tpu.dimension_semantics<parallel>, #tpu.dimension_semantics<arbitrary>], iteration_bounds = array<i64: 1, 1>, scalar_prefetch = 0 : i64, scratch_operands = 3 : i64, tpu.core_type = #tpu.core_type<tc>, window_params = [{transform_indices = @transform_0, window_bounds = array<i64: 8, 2, 128>}, {transform_indices = @transform_1, window_bounds = array<i64: 8, 2, 128>}, {transform_indices = @transform_2, window_bounds = array<i64: 8, 2, 128>}, {transform_indices = @transform_3, window_bounds = array<i64: 2, 8, 128>}]} {
    %c8_i32 = arith.constant 8 : i32
    %0 = arith.muli %arg0, %c8_i32 : i32
    %c8_i32_0 = arith.constant 8 : i32
    %1 = arith.muli %arg1, %c8_i32_0 : i32
    %c0_i32 = arith.constant 0 : i32
    %2 = arith.cmpi eq, %arg1, %c0_i32 : i32
    %3 = arith.extui %2 : i1 to i32
    %c0_i32_1 = arith.constant 0 : i32
    %4 = arith.cmpi ne, %3, %c0_i32_1 : i32
    scf.if %4 {
      %cst = arith.constant 0xFF800000 : f32
      %12 = vector.broadcast %cst : f32 to vector<2x8x1xf32>
      %c0 = arith.constant 0 : index
      %c0_6 = arith.constant 0 : index
      %c0_7 = arith.constant 0 : index
      %13 = vector.load %arg6[%c0, %c0_6, %c0_7] : memref<2x8x1xf32, #tpu.memory_space<vmem>>, vector<2x8x1xf32>
      tpu.vector_store %arg6[%c0, %c0_6, %c0_7], %12 {strides = array<i32>} : memref<2x8x1xf32, #tpu.memory_space<vmem>>, vector<2x8x1xf32>,
      %cst_8 = arith.constant 0.000000e+00 : f32
      %14 = vector.broadcast %cst_8 : f32 to vector<2x8x1xf32>
      %c0_9 = arith.constant 0 : index
      %c0_10 = arith.constant 0 : index
      %c0_11 = arith.constant 0 : index
      %15 = vector.load %arg7[%c0_9, %c0_10, %c0_11] : memref<2x8x1xf32, #tpu.memory_space<vmem>>, vector<2x8x1xf32>
      tpu.vector_store %arg7[%c0_9, %c0_10, %c0_11], %14 {strides = array<i32>} : memref<2x8x1xf32, #tpu.memory_space<vmem>>, vector<2x8x1xf32>,
      %cst_12 = arith.constant 0.000000e+00 : f32
      %16 = vector.broadcast %cst_12 : f32 to vector<2x8x128xf32>
      %c0_13 = arith.constant 0 : index
      %c0_14 = arith.constant 0 : index
      %c0_15 = arith.constant 0 : index
      %17 = vector.load %arg8[%c0_13, %c0_14, %c0_15] : memref<2x8x128xf32, #tpu.memory_space<vmem>>, vector<2x8x128xf32>
      tpu.vector_store %arg8[%c0_13, %c0_14, %c0_15], %16 {strides = array<i32>} : memref<2x8x128xf32, #tpu.memory_space<vmem>>, vector<2x8x128xf32>,
    } else {
    }
    %c8_i32_2 = arith.constant 8 : i32
    %5 = arith.addi %0, %c8_i32_2 : i32
    %6 = arith.cmpi slt, %1, %5 : i32
    %7 = arith.extui %6 : i1 to i32
    %c0_i32_3 = arith.constant 0 : i32
    %8 = arith.cmpi ne, %7, %c0_i32_3 : i32
    scf.if %8 {
      %c0 = arith.constant 0 : index
      %c0_6 = arith.constant 0 : index
      %c0_7 = arith.constant 0 : index
      %12 = vector.load %arg2[%c0, %c0_6, %c0_7] : memref<8x2x128xf32, #tpu.memory_space<vmem>>, vector<8x2x128xf32>
      %13 = arith.truncf %12 : vector<8x2x128xf32> to vector<8x2x128xbf16>
      %c0_8 = arith.constant 0 : index
      %c0_9 = arith.constant 0 : index
      %c0_10 = arith.constant 0 : index
      %14 = vector.load %arg3[%c0_8, %c0_9, %c0_10] : memref<8x2x128xf32, #tpu.memory_space<vmem>>, vector<8x2x128xf32>
      %15 = arith.truncf %14 : vector<8x2x128xf32> to vector<8x2x128xbf16>
      %cst = arith.constant dense<0.000000e+00> : vector<2x8x8xf32>
      %16 = tpu.matmul %13, %15, %cst {dimension_numbers = #tpu.dot_dimension_numbers<[2], [2], [0], [0], [0, 1, 0, 0, 1, 0], [1], [1]>} : vector<8x2x128xbf16>, vector<8x2x128xbf16>, vector<2x8x8xf32> -> vector<2x8x8xf32>
      %cst_11 = arith.constant 0.0220970865 : f32
      %17 = vector.broadcast %cst_11 : f32 to vector<2x8x8xf32>
      %18 = arith.mulf %16, %17 : vector<2x8x8xf32>
      %19 = tpu.iota {dimensions = array<i32: 1>} : vector<2x8x8xi32>
      %20 = vector.broadcast %0 : i32 to vector<2x8x8xi32>
      %21 = arith.addi %20, %19 : vector<2x8x8xi32>
      %22 = tpu.iota {dimensions = array<i32: 2>} : vector<2x8x8xi32>
      %23 = vector.broadcast %1 : i32 to vector<2x8x8xi32>
      %24 = arith.addi %23, %22 : vector<2x8x8xi32>
      %25 = arith.cmpi sgt, %24, %21 : vector<2x8x8xi32>
      %cst_12 = arith.constant -1.000000e+30 : f32
      %26 = vector.broadcast %cst_12 : f32 to vector<2x8x8xf32>
      %27 = arith.select %25, %26, %18 : vector<2x8x8xi1>, vector<2x8x8xf32>
      %c0_13 = arith.constant 0 : index
      %c0_14 = arith.constant 0 : index
      %c0_15 = arith.constant 0 : index
      %28 = vector.load %arg6[%c0_13, %c0_14, %c0_15] : memref<2x8x1xf32, #tpu.memory_space<vmem>>, vector<2x8x1xf32>
      %cst_16 = arith.constant dense<0xFF800000> : vector<2x8xf32>
      %29 = vector.multi_reduction <maximumf>, %27, %cst_16 [2] : vector<2x8x8xf32> to vector<2x8xf32>
      %30 = vector.shape_cast %29 : vector<2x8xf32> to vector<2x8x1xf32>
      %31 = arith.maximumf %28, %30 : vector<2x8x1xf32>
      %32 = arith.subf %28, %31 : vector<2x8x1xf32>
      %33 = math.exp %32 : vector<2x8x1xf32>
      %34 = vector.broadcast %31 : vector<2x8x1xf32> to vector<2x8x8xf32>
      %35 = arith.subf %27, %34 : vector<2x8x8xf32>
      %36 = math.exp %35 : vector<2x8x8xf32>
      %c0_17 = arith.constant 0 : index
      %c0_18 = arith.constant 0 : index
      %c0_19 = arith.constant 0 : index
      %37 = vector.load %arg7[%c0_17, %c0_18, %c0_19] : memref<2x8x1xf32, #tpu.memory_space<vmem>>, vector<2x8x1xf32>
      %38 = arith.mulf %33, %37 : vector<2x8x1xf32>
      %cst_20 = arith.constant dense<0.000000e+00> : vector<2x8xf32>
      %39 = vector.multi_reduction <add>, %36, %cst_20 [2] : vector<2x8x8xf32> to vector<2x8xf32>
      %40 = vector.shape_cast %39 : vector<2x8xf32> to vector<2x8x1xf32>
      %41 = arith.addf %38, %40 : vector<2x8x1xf32>
      %c0_21 = arith.constant 0 : index
      %c0_22 = arith.constant 0 : index
      %c0_23 = arith.constant 0 : index
      %42 = vector.load %arg7[%c0_21, %c0_22, %c0_23] : memref<2x8x1xf32, #tpu.memory_space<vmem>>, vector<2x8x1xf32>
      tpu.vector_store %arg7[%c0_21, %c0_22, %c0_23], %41 {strides = array<i32>} : memref<2x8x1xf32, #tpu.memory_space<vmem>>, vector<2x8x1xf32>,
      %43 = arith.truncf %36 : vector<2x8x8xf32> to vector<2x8x8xbf16>
      %c0_24 = arith.constant 0 : index
      %c0_25 = arith.constant 0 : index
      %c0_26 = arith.constant 0 : index
      %44 = vector.load %arg4[%c0_24, %c0_25, %c0_26] : memref<8x2x128xf32, #tpu.memory_space<vmem>>, vector<8x2x128xf32>
      %45 = arith.truncf %44 : vector<8x2x128xf32> to vector<8x2x128xbf16>
      %cst_27 = arith.constant dense<0.000000e+00> : vector<2x8x128xf32>
      %46 = tpu.matmul %43, %45, %cst_27 {dimension_numbers = #tpu.dot_dimension_numbers<[2], [0], [1], [2], [0, 0, 0, 1, 1, 2], [0], [1]>} : vector<2x8x8xbf16>, vector<8x2x128xbf16>, vector<2x8x128xf32> -> vector<2x8x128xf32>
      %c0_28 = arith.constant 0 : index
      %c0_29 = arith.constant 0 : index
      %c0_30 = arith.constant 0 : index
      %47 = vector.load %arg8[%c0_28, %c0_29, %c0_30] : memref<2x8x128xf32, #tpu.memory_space<vmem>>, vector<2x8x128xf32>
      %48 = vector.broadcast %33 : vector<2x8x1xf32> to vector<2x8x128xf32>
      %49 = arith.mulf %48, %47 : vector<2x8x128xf32>
      %50 = arith.addf %49, %46 : vector<2x8x128xf32>
      %c0_31 = arith.constant 0 : index
      %c0_32 = arith.constant 0 : index
      %c0_33 = arith.constant 0 : index
      %51 = vector.load %arg8[%c0_31, %c0_32, %c0_33] : memref<2x8x128xf32, #tpu.memory_space<vmem>>, vector<2x8x128xf32>
      tpu.vector_store %arg8[%c0_31, %c0_32, %c0_33], %50 {strides = array<i32>} : memref<2x8x128xf32, #tpu.memory_space<vmem>>, vector<2x8x128xf32>,
      %c0_34 = arith.constant 0 : index
      %c0_35 = arith.constant 0 : index
      %c0_36 = arith.constant 0 : index
      %52 = vector.load %arg6[%c0_34, %c0_35, %c0_36] : memref<2x8x1xf32, #tpu.memory_space<vmem>>, vector<2x8x1xf32>
      tpu.vector_store %arg6[%c0_34, %c0_35, %c0_36], %31 {strides = array<i32>} : memref<2x8x1xf32, #tpu.memory_space<vmem>>, vector<2x8x1xf32>,
    } else {
    }
    %c0_i32_4 = arith.constant 0 : i32
    %9 = arith.cmpi eq, %arg1, %c0_i32_4 : i32
    %10 = arith.extui %9 : i1 to i32
    %c0_i32_5 = arith.constant 0 : i32
    %11 = arith.cmpi ne, %10, %c0_i32_5 : i32
    scf.if %11 {
      %c0 = arith.constant 0 : index
      %c0_6 = arith.constant 0 : index
      %c0_7 = arith.constant 0 : index
      %12 = vector.load %arg8[%c0, %c0_6, %c0_7] : memref<2x8x128xf32, #tpu.memory_space<vmem>>, vector<2x8x128xf32>
      %c0_8 = arith.constant 0 : index
      %c0_9 = arith.constant 0 : index
      %c0_10 = arith.constant 0 : index
      %13 = vector.load %arg7[%c0_8, %c0_9, %c0_10] : memref<2x8x1xf32, #tpu.memory_space<vmem>>, vector<2x8x1xf32>
      %14 = tpu.reciprocal %13 {approx = true} : vector<2x8x1xf32> -> vector<2x8x1xf32>
      %15 = vector.broadcast %14 : vector<2x8x1xf32> to vector<2x8x128xf32>
      %16 = arith.mulf %12, %15 : vector<2x8x128xf32>
      %c0_11 = arith.constant 0 : index
      %c0_12 = arith.constant 0 : index
      %c0_13 = arith.constant 0 : index
      %17 = vector.load %arg5[%c0_11, %c0_12, %c0_13] : memref<2x8x128xf32, #tpu.memory_space<vmem>>, vector<2x8x128xf32>
      tpu.vector_store %arg5[%c0_11, %c0_12, %c0_13], %16 {strides = array<i32>} : memref<2x8x128xf32, #tpu.memory_space<vmem>>, vector<2x8x128xf32>,
    } else {
    }
    return
  }
  func.func @transform_0(%arg0: i32, %arg1: i32) -> (i32, i32, i32) {
    %c0_i32 = arith.constant 0 : i32
    %c0_i32_0 = arith.constant 0 : i32
    %c0_i32_1 = arith.constant 0 : i32
    return %arg0, %c0_i32, %c0_i32_0 : i32, i32, i32
  }
  func.func @transform_1(%arg0: i32, %arg1: i32) -> (i32, i32, i32) {
    %c0_i32 = arith.constant 0 : i32
    %c0_i32_0 = arith.constant 0 : i32
    %c0_i32_1 = arith.constant 0 : i32
    return %arg1, %c0_i32, %c0_i32_0 : i32, i32, i32
  }
  func.func @transform_2(%arg0: i32, %arg1: i32) -> (i32, i32, i32) {
    %c0_i32 = arith.constant 0 : i32
    %c0_i32_0 = arith.constant 0 : i32
    %c0_i32_1 = arith.constant 0 : i32
    return %arg1, %c0_i32, %c0_i32_0 : i32, i32, i32
  }
  func.func @transform_3(%arg0: i32, %arg1: i32) -> (i32, i32, i32) {
    %c0_i32 = arith.constant 0 : i32
    %c0_i32_0 = arith.constant 0 : i32
    %c0_i32_1 = arith.constant 0 : i32
    return %c0_i32, %arg0, %c0_i32_0 : i32, i32, i32
  }
}

module attributes {stable_mosaic.version = 11 : i64} {
  func.func @_ff_kernel(%arg0: i32, %arg1: memref<16x128xf32, #tpu.memory_space<vmem>>, %arg2: memref<1x128xf32, #tpu.memory_space<vmem>>, %arg3: memref<1x128xf32, #tpu.memory_space<vmem>>, %arg4: memref<1x128xf32, #tpu.memory_space<vmem>>, %arg5: memref<1x128xf32, #tpu.memory_space<vmem>>, %arg6: memref<128x256xbf16, #tpu.memory_space<vmem>>, %arg7: memref<1x256xf32, #tpu.memory_space<vmem>>, %arg8: memref<16x128xf32, #tpu.memory_space<vmem>>) attributes {dimension_semantics = [#tpu.dimension_semantics<parallel>], iteration_bounds = array<i64: 1>, scalar_prefetch = 0 : i64, scratch_operands = 0 : i64, tpu.core_type = #tpu.core_type<tc>, window_params = [{transform_indices = @transform_0, window_bounds = array<i64: 16, 128>}, {pipeline_mode = #tpu.pipeline_mode<synchronous>, transform_indices = @transform_1, window_bounds = array<i64: 1, 128>}, {pipeline_mode = #tpu.pipeline_mode<synchronous>, transform_indices = @transform_2, window_bounds = array<i64: 1, 128>}, {pipeline_mode = #tpu.pipeline_mode<synchronous>, transform_indices = @transform_3, window_bounds = array<i64: 1, 128>}, {pipeline_mode = #tpu.pipeline_mode<synchronous>, transform_indices = @transform_4, window_bounds = array<i64: 1, 128>}, {pipeline_mode = #tpu.pipeline_mode<synchronous>, transform_indices = @transform_5, window_bounds = array<i64: 128, 256>}, {pipeline_mode = #tpu.pipeline_mode<synchronous>, transform_indices = @transform_6, window_bounds = array<i64: 1, 256>}, {transform_indices = @transform_7, window_bounds = array<i64: 16, 128>}]} {
    %c0 = arith.constant 0 : index
    %c0_0 = arith.constant 0 : index
    %0 = vector.load %arg1[%c0, %c0_0] : memref<16x128xf32, #tpu.memory_space<vmem>>, vector<16x128xf32>
    %cst = arith.constant dense<0.000000e+00> : vector<16xf32>
    %1 = vector.multi_reduction <add>, %0, %cst [1] : vector<16x128xf32> to vector<16xf32>
    %2 = vector.shape_cast %1 : vector<16xf32> to vector<16x1xf32>
    %cst_1 = arith.constant 1.280000e+02 : f32
    %3 = vector.broadcast %cst_1 : f32 to vector<16x1xf32>
    %4 = arith.divf %2, %3 : vector<16x1xf32>
    %5 = vector.broadcast %4 : vector<16x1xf32> to vector<16x128xf32>
    %6 = arith.subf %0, %5 : vector<16x128xf32>
    %7 = arith.mulf %6, %6 : vector<16x128xf32>
    %cst_2 = arith.constant dense<0.000000e+00> : vector<16xf32>
    %8 = vector.multi_reduction <add>, %7, %cst_2 [1] : vector<16x128xf32> to vector<16xf32>
    %9 = vector.shape_cast %8 : vector<16xf32> to vector<16x1xf32>
    %cst_3 = arith.constant 1.280000e+02 : f32
    %10 = vector.broadcast %cst_3 : f32 to vector<16x1xf32>
    %11 = arith.divf %9, %10 : vector<16x1xf32>
    %cst_4 = arith.constant 9.99999996E-13 : f32
    %12 = vector.broadcast %cst_4 : f32 to vector<16x1xf32>
    %13 = arith.addf %11, %12 : vector<16x1xf32>
    %14 = math.rsqrt %13 : vector<16x1xf32>
    %15 = vector.broadcast %14 : vector<16x1xf32> to vector<16x128xf32>
    %16 = arith.mulf %6, %15 : vector<16x128xf32>
    %c0_5 = arith.constant 0 : index
    %c0_6 = arith.constant 0 : index
    %17 = vector.load %arg2[%c0_5, %c0_6] : memref<1x128xf32, #tpu.memory_space<vmem>>, vector<1x128xf32>
    %18 = vector.broadcast %17 : vector<1x128xf32> to vector<16x128xf32>
    %19 = arith.mulf %16, %18 : vector<16x128xf32>
    %c0_7 = arith.constant 0 : index
    %c0_8 = arith.constant 0 : index
    %20 = vector.load %arg3[%c0_7, %c0_8] : memref<1x128xf32, #tpu.memory_space<vmem>>, vector<1x128xf32>
    %21 = vector.broadcast %20 : vector<1x128xf32> to vector<16x128xf32>
    %22 = arith.addf %19, %21 : vector<16x128xf32>
    %c0_9 = arith.constant 0 : index
    %c0_10 = arith.constant 0 : index
    %23 = vector.load %arg4[%c0_9, %c0_10] : memref<1x128xf32, #tpu.memory_space<vmem>>, vector<1x128xf32>
    %24 = vector.broadcast %23 : vector<1x128xf32> to vector<16x128xf32>
    %25 = arith.mulf %16, %24 : vector<16x128xf32>
    %c0_11 = arith.constant 0 : index
    %c0_12 = arith.constant 0 : index
    %26 = vector.load %arg5[%c0_11, %c0_12] : memref<1x128xf32, #tpu.memory_space<vmem>>, vector<1x128xf32>
    %27 = vector.broadcast %26 : vector<1x128xf32> to vector<16x128xf32>
    %28 = arith.addf %25, %27 : vector<16x128xf32>
    %29 = arith.truncf %28 : vector<16x128xf32> to vector<16x128xbf16>
    %c0_13 = arith.constant 0 : index
    %c0_14 = arith.constant 0 : index
    %30 = vector.load %arg6[%c0_13, %c0_14] : memref<128x256xbf16, #tpu.memory_space<vmem>>, vector<128x256xbf16>
    %cst_15 = arith.constant dense<0.000000e+00> : vector<16x256xf32>
    %31 = tpu.matmul %29, %30, %cst_15 {dimension_numbers = #tpu.dot_dimension_numbers<[1], [0], [0], [1], [0, 0, 1, 1], [], []>} : vector<16x128xbf16>, vector<128x256xbf16>, vector<16x256xf32> -> vector<16x256xf32>
    %c0_16 = arith.constant 0 : index
    %c0_17 = arith.constant 0 : index
    %32 = vector.load %arg7[%c0_16, %c0_17] : memref<1x256xf32, #tpu.memory_space<vmem>>, vector<1x256xf32>
    %33 = vector.broadcast %32 : vector<1x256xf32> to vector<16x256xf32>
    %34 = arith.addf %31, %33 : vector<16x256xf32>
    %cst_18 = arith.constant 1.702000e+00 : f32
    %35 = vector.broadcast %cst_18 : f32 to vector<16x256xf32>
    %36 = arith.mulf %35, %34 : vector<16x256xf32>
    %37 = arith.negf %36 : vector<16x256xf32>
    %38 = math.exp %37 : vector<16x256xf32>
    %cst_19 = arith.constant 1.000000e+00 : f32
    %39 = vector.broadcast %cst_19 : f32 to vector<16x256xf32>
    %40 = arith.addf %39, %38 : vector<16x256xf32>
    %41 = arith.divf %39, %40 : vector<16x256xf32>
    %42 = arith.mulf %34, %41 : vector<16x256xf32>
    %43 = vector.extract_strided_slice %42 {offsets = [0, 0], sizes = [16, 128], strides = [1, 1]} : vector<16x256xf32> to vector<16x128xf32>
    %44 = vector.extract_strided_slice %42 {offsets = [0, 128], sizes = [16, 128], strides = [1, 1]} : vector<16x256xf32> to vector<16x128xf32>
    %45 = arith.addf %43, %44 : vector<16x128xf32>
    %46 = arith.addf %45, %22 : vector<16x128xf32>
    %c0_20 = arith.constant 0 : index
    %c0_21 = arith.constant 0 : index
    %47 = vector.load %arg8[%c0_20, %c0_21] : memref<16x128xf32, #tpu.memory_space<vmem>>, vector<16x128xf32>
    tpu.vector_store %arg8[%c0_20, %c0_21], %46 {strides = array<i32>} : memref<16x128xf32, #tpu.memory_space<vmem>>, vector<16x128xf32>,
    return
  }
  func.func @transform_0(%arg0: i32) -> (i32, i32) {
    %c0_i32 = arith.constant 0 : i32
    %c0_i32_0 = arith.constant 0 : i32
    return %arg0, %c0_i32 : i32, i32
  }
  func.func @transform_1(%arg0: i32) -> (i32, i32) {
    %c0_i32 = arith.constant 0 : i32
    %c0_i32_0 = arith.constant 0 : i32
    %c0_i32_1 = arith.constant 0 : i32
    return %c0_i32, %c0_i32_0 : i32, i32
  }
  func.func @transform_2(%arg0: i32) -> (i32, i32) {
    %c0_i32 = arith.constant 0 : i32
    %c0_i32_0 = arith.constant 0 : i32
    %c0_i32_1 = arith.constant 0 : i32
    return %c0_i32, %c0_i32_0 : i32, i32
  }
  func.func @transform_3(%arg0: i32) -> (i32, i32) {
    %c0_i32 = arith.constant 0 : i32
    %c0_i32_0 = arith.constant 0 : i32
    %c0_i32_1 = arith.constant 0 : i32
    return %c0_i32, %c0_i32_0 : i32, i32
  }
  func.func @transform_4(%arg0: i32) -> (i32, i32) {
    %c0_i32 = arith.constant 0 : i32
    %c0_i32_0 = arith.constant 0 : i32
    %c0_i32_1 = arith.constant 0 : i32
    return %c0_i32, %c0_i32_0 : i32, i32
  }
  func.func @transform_5(%arg0: i32) -> (i32, i32) {
    %c0_i32 = arith.constant 0 : i32
    %c0_i32_0 = arith.constant 0 : i32
    %c0_i32_1 = arith.constant 0 : i32
    return %c0_i32, %c0_i32_0 : i32, i32
  }
  func.func @transform_6(%arg0: i32) -> (i32, i32) {
    %c0_i32 = arith.constant 0 : i32
    %c0_i32_0 = arith.constant 0 : i32
    %c0_i32_1 = arith.constant 0 : i32
    return %c0_i32, %c0_i32_0 : i32, i32
  }
  func.func @transform_7(%arg0: i32) -> (i32, i32) {
    %c0_i32 = arith.constant 0 : i32
    %c0_i32_0 = arith.constant 0 : i32
    return %arg0, %c0_i32 : i32, i32
  }
}

module attributes {stable_mosaic.version = 11 : i64} {
  func.func @_ff_kernel(%arg0: i32, %arg1: memref<16x128xf32, #tpu.memory_space<vmem>>, %arg2: memref<1x128xf32, #tpu.memory_space<vmem>>, %arg3: memref<1x128xf32, #tpu.memory_space<vmem>>, %arg4: memref<1x128xf32, #tpu.memory_space<vmem>>, %arg5: memref<1x128xf32, #tpu.memory_space<vmem>>, %arg6: memref<128x256xbf16, #tpu.memory_space<vmem>>, %arg7: memref<1x256xf32, #tpu.memory_space<vmem>>, %arg8: memref<16x128xf32, #tpu.memory_space<vmem>>) attributes {dimension_semantics = [#tpu.dimension_semantics<parallel>], iteration_bounds = array<i64: 1>, scalar_prefetch = 0 : i64, scratch_operands = 0 : i64, tpu.core_type = #tpu.core_type<tc>, window_params = [{transform_indices = @transform_0, window_bounds = array<i64: 16, 128>}, {pipeline_mode = #tpu.pipeline_mode<synchronous>, transform_indices = @transform_1, window_bounds = array<i64: 1, 128>}, {pipeline_mode = #tpu.pipeline_mode<synchronous>, transform_indices = @transform_2, window_bounds = array<i64: 1, 128>}, {pipeline_mode = #tpu.pipeline_mode<synchronous>, transform_indices = @transform_3, window_bounds = array<i64: 1, 128>}, {pipeline_mode = #tpu.pipeline_mode<synchronous>, transform_indices = @transform_4, window_bounds = array<i64: 1, 128>}, {pipeline_mode = #tpu.pipeline_mode<synchronous>, transform_indices = @transform_5, window_bounds = array<i64: 128, 256>}, {pipeline_mode = #tpu.pipeline_mode<synchronous>, transform_indices = @transform_6, window_bounds = array<i64: 1, 256>}, {transform_indices = @transform_7, window_bounds = array<i64: 16, 128>}]} {
    %c0 = arith.constant 0 : index
    %c0_0 = arith.constant 0 : index
    %0 = vector.load %arg1[%c0, %c0_0] : memref<16x128xf32, #tpu.memory_space<vmem>>, vector<16x128xf32>
    %cst = arith.constant dense<0.000000e+00> : vector<16xf32>
    %1 = vector.multi_reduction <add>, %0, %cst [1] : vector<16x128xf32> to vector<16xf32>
    %2 = vector.shape_cast %1 : vector<16xf32> to vector<16x1xf32>
    %cst_1 = arith.constant 1.280000e+02 : f32
    %3 = vector.broadcast %cst_1 : f32 to vector<16x1xf32>
    %4 = arith.divf %2, %3 : vector<16x1xf32>
    %5 = vector.broadcast %4 : vector<16x1xf32> to vector<16x128xf32>
    %6 = arith.subf %0, %5 : vector<16x128xf32>
    %7 = arith.mulf %6, %6 : vector<16x128xf32>
    %cst_2 = arith.constant dense<0.000000e+00> : vector<16xf32>
    %8 = vector.multi_reduction <add>, %7, %cst_2 [1] : vector<16x128xf32> to vector<16xf32>
    %9 = vector.shape_cast %8 : vector<16xf32> to vector<16x1xf32>
    %cst_3 = arith.constant 1.280000e+02 : f32
    %10 = vector.broadcast %cst_3 : f32 to vector<16x1xf32>
    %11 = arith.divf %9, %10 : vector<16x1xf32>
    %cst_4 = arith.constant 9.99999996E-13 : f32
    %12 = vector.broadcast %cst_4 : f32 to vector<16x1xf32>
    %13 = arith.addf %11, %12 : vector<16x1xf32>
    %14 = math.rsqrt %13 : vector<16x1xf32>
    %15 = vector.broadcast %14 : vector<16x1xf32> to vector<16x128xf32>
    %16 = arith.mulf %6, %15 : vector<16x128xf32>
    %c0_5 = arith.constant 0 : index
    %c0_6 = arith.constant 0 : index
    %17 = vector.load %arg2[%c0_5, %c0_6] : memref<1x128xf32, #tpu.memory_space<vmem>>, vector<1x128xf32>
    %18 = vector.broadcast %17 : vector<1x128xf32> to vector<16x128xf32>
    %19 = arith.mulf %16, %18 : vector<16x128xf32>
    %c0_7 = arith.constant 0 : index
    %c0_8 = arith.constant 0 : index
    %20 = vector.load %arg3[%c0_7, %c0_8] : memref<1x128xf32, #tpu.memory_space<vmem>>, vector<1x128xf32>
    %21 = vector.broadcast %20 : vector<1x128xf32> to vector<16x128xf32>
    %22 = arith.addf %19, %21 : vector<16x128xf32>
    %c0_9 = arith.constant 0 : index
    %c0_10 = arith.constant 0 : index
    %23 = vector.load %arg4[%c0_9, %c0_10] : memref<1x128xf32, #tpu.memory_space<vmem>>, vector<1x128xf32>
    %24 = vector.broadcast %23 : vector<1x128xf32> to vector<16x128xf32>
    %25 = arith.mulf %16, %24 : vector<16x128xf32>
    %c0_11 = arith.constant 0 : index
    %c0_12 = arith.constant 0 : index
    %26 = vector.load %arg5[%c0_11, %c0_12] : memref<1x128xf32, #tpu.memory_space<vmem>>, vector<1x128xf32>
    %27 = vector.broadcast %26 : vector<1x128xf32> to vector<16x128xf32>
    %28 = arith.addf %25, %27 : vector<16x128xf32>
    %29 = arith.truncf %28 : vector<16x128xf32> to vector<16x128xbf16>
    %c0_13 = arith.constant 0 : index
    %c0_14 = arith.constant 0 : index
    %30 = vector.load %arg6[%c0_13, %c0_14] : memref<128x256xbf16, #tpu.memory_space<vmem>>, vector<128x256xbf16>
    %cst_15 = arith.constant dense<0.000000e+00> : vector<16x256xf32>
    %31 = tpu.matmul %29, %30, %cst_15 {dimension_numbers = #tpu.dot_dimension_numbers<[1], [0], [0], [1], [0, 0, 1, 1], [], []>} : vector<16x128xbf16>, vector<128x256xbf16>, vector<16x256xf32> -> vector<16x256xf32>
    %c0_16 = arith.constant 0 : index
    %c0_17 = arith.constant 0 : index
    %32 = vector.load %arg7[%c0_16, %c0_17] : memref<1x256xf32, #tpu.memory_space<vmem>>, vector<1x256xf32>
    %33 = vector.broadcast %32 : vector<1x256xf32> to vector<16x256xf32>
    %34 = arith.addf %31, %33 : vector<16x256xf32>
    %cst_18 = arith.constant 1.702000e+00 : f32
    %35 = vector.broadcast %cst_18 : f32 to vector<16x256xf32>
    %36 = arith.mulf %35, %34 : vector<16x256xf32>
    %37 = arith.negf %36 : vector<16x256xf32>
    %38 = math.exp %37 : vector<16x256xf32>
    %cst_19 = arith.constant 1.000000e+00 : f32
    %39 = vector.broadcast %cst_19 : f32 to vector<16x256xf32>
    %40 = arith.addf %39, %38 : vector<16x256xf32>
    %41 = arith.divf %39, %40 : vector<16x256xf32>
    %42 = arith.mulf %34, %41 : vector<16x256xf32>
    %43 = vector.extract_strided_slice %42 {offsets = [0, 0], sizes = [16, 128], strides = [1, 1]} : vector<16x256xf32> to vector<16x128xf32>
    %44 = vector.extract_strided_slice %42 {offsets = [0, 128], sizes = [16, 128], strides = [1, 1]} : vector<16x256xf32> to vector<16x128xf32>
    %45 = arith.addf %43, %44 : vector<16x128xf32>
    %46 = arith.addf %45, %22 : vector<16x128xf32>
    %c0_20 = arith.constant 0 : index
    %c0_21 = arith.constant 0 : index
    %47 = vector.load %arg8[%c0_20, %c0_21] : memref<16x128xf32, #tpu.memory_space<vmem>>, vector<16x128xf32>
    tpu.vector_store %arg8[%c0_20, %c0_21], %46 {strides = array<i32>} : memref<16x128xf32, #tpu.memory_space<vmem>>, vector<16x128xf32>,
    return
  }
  func.func @transform_0(%arg0: i32) -> (i32, i32) {
    %c0_i32 = arith.constant 0 : i32
    %c0_i32_0 = arith.constant 0 : i32
    return %arg0, %c0_i32 : i32, i32
  }
  func.func @transform_1(%arg0: i32) -> (i32, i32) {
    %c0_i32 = arith.constant 0 : i32
    %c0_i32_0 = arith.constant 0 : i32
    %c0_i32_1 = arith.constant 0 : i32
    return %c0_i32, %c0_i32_0 : i32, i32
  }
  func.func @transform_2(%arg0: i32) -> (i32, i32) {
    %c0_i32 = arith.constant 0 : i32
    %c0_i32_0 = arith.constant 0 : i32
    %c0_i32_1 = arith.constant 0 : i32
    return %c0_i32, %c0_i32_0 : i32, i32
  }
  func.func @transform_3(%arg0: i32) -> (i32, i32) {
    %c0_i32 = arith.constant 0 : i32
    %c0_i32_0 = arith.constant 0 : i32
    %c0_i32_1 = arith.constant 0 : i32
    return %c0_i32, %c0_i32_0 : i32, i32
  }
  func.func @transform_4(%arg0: i32) -> (i32, i32) {
    %c0_i32 = arith.constant 0 : i32
    %c0_i32_0 = arith.constant 0 : i32
    %c0_i32_1 = arith.constant 0 : i32
    return %c0_i32, %c0_i32_0 : i32, i32
  }
  func.func @transform_5(%arg0: i32) -> (i32, i32) {
    %c0_i32 = arith.constant 0 : i32
    %c0_i32_0 = arith.constant 0 : i32
    %c0_i32_1 = arith.constant 0 : i32
    return %c0_i32, %c0_i32_0 : i32, i32
  }
  func.func @transform_6(%arg0: i32) -> (i32, i32) {
    %c0_i32 = arith.constant 0 : i32
    %c0_i32_0 = arith.constant 0 : i32
    %c0_i32_1 = arith.constant 0 : i32
    return %c0_i32, %c0_i32_0 : i32, i32
  }
  func.func @transform_7(%arg0: i32) -> (i32, i32) {
    %c0_i32 = arith.constant 0 : i32
    %c0_i32_0 = arith.constant 0 : i32
    return %arg0, %c0_i32 : i32, i32
  }
}

</mosaic_0001>

<bundles_post_ra>
// kernel: sharnn_forward.10
= control target key start
LH: loop header
LB: loop body
LE: loop exit
PB: predicated region body
PF: predicated region fallthrough
CT: control target
= control target key end

     0   :  { %v350_v2 = vmov 0.0   ;;  %vm351_vm0 = vmmov 0   ;;  %s500_s0 = inlined_call_operand.vmem [shape: f32[16,128], index: 0, kind: input, shape index: {}]   ;;  %s501_s5 = inlined_call_operand.vmem [shape: bf16[128,128], index: 5, kind: input, shape index: {}]   ;;  %s502_s1 = inlined_call_operand.vmem [shape: f32[1,128], index: 1, kind: input, shape index: {}]   ;;  %s503_s3 = inlined_call_operand.vmem [shape: f32[1,128], index: 3, kind: input, shape index: {}]   ;;  %s504_s2 = inlined_call_operand.vmem [shape: f32[1,128], index: 2, kind: input, shape index: {}]   ;;  %s505_s4 = inlined_call_operand.vmem [shape: f32[1,128], index: 4, kind: input, shape index: {}]   ;;  %s506_s9 = inlined_call_operand.vmem [shape: f32[1,128], index: 9, kind: input, shape index: {}]   ;;  %s507_s10 = inlined_call_operand.vmem [shape: f32[16,128], index: 10, kind: output, shape index: {0}]   ;;  %s508_s11 = inlined_call_operand.vmem [shape: f32[16,128], index: 11, kind: output, shape index: {1}]   ;;  %s509_s13 = inlined_call_operand.vmem [shape: f32[16,128], index: 13, kind: output, shape index: {3}]   ;;  %s510_s6 = inlined_call_operand.vmem [shape: f32[1,128], index: 6, kind: input, shape index: {}]   ;;  %s511_s7 = inlined_call_operand.vmem [shape: f32[1,128], index: 7, kind: input, shape index: {}]   ;;  %s512_s8 = inlined_call_operand.vmem [shape: f32[1,128], index: 8, kind: input, shape index: {}]   ;;  %s513_s12 = inlined_call_operand.vmem [shape: f32[16,128], index: 12, kind: output, shape index: {2}]  }
   0x1   :  { %v40_v0 = vld [vmem:[%s500_s0] sm:$0xff]  ;;  %v41_v1 = vld [vmem:[%s500_s0 + $0x8] sm:$0xff]  ;;  %312 = vmatprep.subr.bf16.mxu0 %v350_v2  ;;  %v336_v13 = vld [vmem:[%s501_s5 + $0x10] sm:$0xff]   ;;  %328 = vmatprep.mubr.msk.bf16.mxu0 %vm351_vm0, %v350_v2 }
   0x2   :  { %42 = vadd.xlane.f32.xlu0 %v40_v0  ;;  %v334_v3 = vld [vmem:[%s501_s5] sm:$0xff]   ;;  %v335_v12 = vld [vmem:[%s501_s5 + $0x8] sm:$0xff]   ;;  %v337_v14 = vld [vmem:[%s501_s5 + $0x18] sm:$0xff]  }
   0x3   :  { %313 = vmatpush3.bf16.msra.mxu0 %v334_v3  ;;  %v338_v15 = vld [vmem:[%s501_s5 + $0x20] sm:$0xff]   ;;  %v339_v16 = vld [vmem:[%s501_s5 + $0x28] sm:$0xff]   ;;  %v340_v17 = vld [vmem:[%s501_s5 + $0x30] sm:$0xff]  }
   0x4   :  { %314 = vmatprep.subr.bf16.mxu0 %v350_v2  ;;  %v341_v18 = vld [vmem:[%s501_s5 + $0x38] sm:$0xff]   ;;  %v287_v26 = vld [vmem:[%s502_s1] ss:$0 sm:$0xff] }
   0x5   :  { %v289_v27 = vld [vmem:[%s503_s3] ss:$0 sm:$0xff] }
   0x6   :  { %44 = vadd.xlane.f32.xlu0 %v41_v1  ;;  %v288_v29 = vld [vmem:[%s504_s2] ss:$0 sm:$0xff] }
   0x7   :  { %315 = vmatpush3.bf16.msra.mxu0 %v335_v12  ;;  %v290_v30 = vld [vmem:[%s505_s4] ss:$0 sm:$0xff] }
   0x8   :  { %316 = vmatprep.subr.bf16.mxu0 %v350_v2  ;;  %v291_v34 = vld [vmem:[%s506_s9] ss:$0 sm:$0xff] }
   0x9   :  { %v292_v45 = vld [vmem:[%s510_s6] ss:$0 sm:$0xff] }
   0xa   :  { %v301_v3 = vld [vmem:[%s511_s7] ss:$0 sm:$0xff] }
   0xb   :  { %317 = vmatpush3.bf16.msra.mxu0 %v336_v13 }
   0xc   :  { %318 = vmatprep.subr.bf16.mxu0 %v350_v2 }
   0xf   :  { %319 = vmatpush3.bf16.msra.mxu0 %v337_v14 }
  0x10   :  { %320 = vmatprep.subr.bf16.mxu0 %v350_v2 }
  0x13   :  { %321 = vmatpush3.bf16.msra.mxu0 %v338_v15 }
  0x14   :  { %322 = vmatprep.subr.bf16.mxu0 %v350_v2 }
  0x17   :  { %323 = vmatpush3.bf16.msra.mxu0 %v339_v16 }
  0x18   :  { %324 = vmatprep.subr.bf16.mxu0 %v350_v2 }
  0x1b   :  { %325 = vmatpush3.bf16.msra.mxu0 %v340_v17 }
  0x1c   :  { %326 = vmatprep.subr.bf16.mxu0 %v350_v2 }
  0x1f   :  { %327 = vmatpush3.bf16.msra.mxu0 %v341_v18 }
  0x8f   :  { %v43_v4 = vpop.xlane.xlu0 %42 }
  0x90   :  { %v47_v5 = vmul.f32 0.0078125, %v43_v4 }
  0x92   :  { %v49_v6 = vsub.f32 %v40_v0, %v47_v5 }
  0x93   :  { %v45_v7 = vpop.xlane.xlu0 %44 }
  0x94   :  { %v48_v8 = vmul.f32 0.0078125, %v45_v7  ;;  %v51_v9 = vmul.f32 %v49_v6, %v49_v6 }
  0x96   :  { %v50_v10 = vsub.f32 %v41_v1, %v48_v8  ;;  %53 = vadd.xlane.f32.xlu1 %v51_v9 }
  0x98   :  { %v52_v11 = vmul.f32 %v50_v10, %v50_v10 }
  0x9a   :  { %55 = vadd.xlane.f32.xlu1 %v52_v11 }
 0x123   :  { %v54_v19 = vpop.xlane.xlu1 %53 }
 0x124   :  { %v57_v20 = vmul.f32 0.0078125, %v54_v19 }
 0x126   :  { %v59_v21 = vadd.f32 1e-12, %v57_v20 }
 0x127   :  { %v56_v22 = vpop.xlane.xlu1 %55 }
 0x128   :  { %342 = vrsqrt.f32 %v59_v21  ;;  %v58_v23 = vmul.f32 0.0078125, %v56_v22 }
 0x12a   :  { %v60_v24 = vadd.f32 1e-12, %v58_v23 }
 0x12c   :  { %344 = vrsqrt.f32 %v60_v24 }
 0x132   :  { %v343_v25 = vpop.eup %342 }
 0x133   :  { %v63_v28 = vmul.f32 %v343_v25, %v49_v6  ;;  %v302_v6 = vld [vmem:[%s512_s8] ss:$0 sm:$0xff] }
 0x135   :  { %v72_v31 = vmul.f32 %v287_v26, %v63_v28  ;;  %v90_v32 = vmul.f32 %v289_v27, %v63_v28 }
 0x136   :  { %v345_v33 = vpop.eup %344 }
 0x137   :  { %v64_v35 = vmul.f32 %v345_v33, %v50_v10  ;;  %v81_v36 = vadd.f32 %v288_v29, %v72_v31  ;;  %v99_v37 = vadd.f32 %v290_v30, %v90_v32 }
 0x139   :  { %v73_v38 = vmul.f32 %v287_v26, %v64_v35  ;;  %v91_v39 = vmul.f32 %v289_v27, %v64_v35  ;;  %101 = vst [vmem:[%s507_s10] sm:$0xff] %v81_v36  ;;  %103 = vst [vmem:[%s508_s11] sm:$0xff] %v99_v37  ;;  %v112_v40 = vmul.f32 %v291_v34, %v81_v36 }
 0x13b   :  { %v82_v41 = vadd.f32 %v288_v29, %v73_v38  ;;  %v100_v42 = vadd.f32 %v290_v30, %v91_v39  ;;  %114 = vst [vmem:[%s509_s13] sm:$0xff] %v112_v40 }
 0x13d   :  { %102 = vst [vmem:[%s507_s10 + $0x8] sm:$0xff] %v82_v41  ;;  %104 = vst [vmem:[%s508_s11 + $0x8] sm:$0xff] %v100_v42  ;;  %v113_v43 = vmul.f32 %v291_v34, %v82_v41  ;;  %v116_v44 = vpack.c.bf16 %v100_v42, %v99_v37 }
 0x13f   :  { %115 = vst [vmem:[%s509_s13 + $0x8] sm:$0xff] %v113_v43  ;;  %329 = vmatmul.mubr.bf16.vlgmr.msra.gmra.mrb[0].mxu0 %v116_v44 }
 0x212   :  { %v222_v46 = vpop.f32.mrb[0].mxu0 }
 0x213   :  { %v223_v47 = vadd.f32 %v292_v45, %v222_v46  ;;  %v330_v48 = vpop.f32.mrb[1].mxu0 }
 0x214   :  { %v225_v49 = vpop.f32.mrb[2].mxu0 }
 0x215   :  { %v226_v50 = vadd.f32 %v292_v45, %v225_v49  ;;  %229 = vadd.xlane.f32.xlu0 %v223_v47  ;;  %v331_v51 = vpop.f32.mrb[3].mxu0 }
 0x217   :  { %231 = vadd.xlane.f32.xlu1 %v226_v50 }
 0x2a2   :  { %v230_v52 = vpop.xlane.xlu0 %229 }
 0x2a3   :  { %v233_v53 = vmul.f32 0.0078125, %v230_v52 }
 0x2a4   :  { %v232_v54 = vpop.xlane.xlu1 %231 }
 0x2a5   :  { %v235_v55 = vsub.f32 %v223_v47, %v233_v53  ;;  %v234_v56 = vmul.f32 0.0078125, %v232_v54 }
 0x2a7   :  { %v236_v57 = vsub.f32 %v226_v50, %v234_v56  ;;  %v237_v58 = vmul.f32 %v235_v55, %v235_v55 }
 0x2a9   :  { %239 = vadd.xlane.f32.xlu0 %v237_v58  ;;  %v238_v59 = vmul.f32 %v236_v57, %v236_v57 }
 0x2ab   :  { %241 = vadd.xlane.f32.xlu1 %v238_v59 }
 0x336   :  { %v240_v60 = vpop.xlane.xlu0 %239 }
 0x337   :  { %v243_v61 = vmul.f32 0.0078125, %v240_v60 }
 0x338   :  { %v242_v62 = vpop.xlane.xlu1 %241 }
 0x339   :  { %v245_v63 = vadd.f32 1e-12, %v243_v61  ;;  %v244_v0 = vmul.f32 0.0078125, %v242_v62 }
 0x33b   :  { %346 = vrsqrt.f32 %v245_v63  ;;  %v246_v1 = vadd.f32 1e-12, %v244_v0 }
 0x33d   :  { %348 = vrsqrt.f32 %v246_v1 }
 0x345   :  { %v347_v2 = vpop.eup %346 }
 0x346   :  { %v249_v4 = vmul.f32 %v347_v2, %v235_v55 }
 0x347   :  { %v349_v5 = vpop.eup %348 }
 0x348   :  { %v258_v7 = vmul.f32 %v301_v3, %v249_v4  ;;  %v250_v8 = vmul.f32 %v349_v5, %v236_v57 }
 0x34a   :  { %v267_v9 = vadd.f32 %v302_v6, %v258_v7  ;;  %v259_v10 = vmul.f32 %v301_v3, %v250_v8 }
 0x34c   :  { %269 = vst [vmem:[%s513_s12] sm:$0xff] %v267_v9  ;;  %v268_v11 = vadd.f32 %v302_v6, %v259_v10 }
 0x34e   :  { %270 = vst [vmem:[%s513_s12 + $0x8] sm:$0xff] %v268_v11 }

// kernel: sharnn_forward.8
= control target key start
LH: loop header
LB: loop body
LE: loop exit
PB: predicated region body
PF: predicated region fallthrough
CT: control target
= control target key end

     0   :  { %v464_v36 = vmov 0   ;;  %v99_v60 = vlaneseq  ;;  %s640_s0 = inlined_call_operand.vmem [shape: f32[16,128], index: 0, kind: input, shape index: {}]   ;;  %s641_s3 = inlined_call_operand.vmem [shape: bf16[128,512], index: 3, kind: input, shape index: {}]   ;;  %s642_s1 = inlined_call_operand.vmem [shape: f32[1,128], index: 1, kind: input, shape index: {}]   ;;  %s643_s2 = inlined_call_operand.vmem [shape: f32[1,128], index: 2, kind: input, shape index: {}]   ;;  %s644_s4 = inlined_call_operand.vmem [shape: f32[1,512], index: 4, kind: input, shape index: {}]   ;;  %s645_s5 = inlined_call_operand.vmem [shape: f32[16,512], index: 5, kind: output, shape index: {}]  }
   0x1   :  { %v21_v0 = vld [vmem:[%s640_s0] sm:$0xff]  ;;  %v22_v1 = vld [vmem:[%s640_s0 + $0x8] sm:$0xff]  ;;  %311 = vmatprep.mubr.bf16.mxu0 %v464_v36  ;;  %354 = vmatprep.mubr.bf16.mxu1 %v464_v36 }
   0x2   :  { %23 = vadd.xlane.f32.xlu0 %v21_v0  ;;  %v412_v2 = vld [vmem:[%s641_s3 + $0x4] ss:$16 sps:$4 sm:$0xff]   ;;  %v414_v3 = vld [vmem:[%s641_s3 + $0xc] ss:$16 sps:$4 sm:$0xff]   ;;  %v416_v4 = vld [vmem:[%s641_s3] ss:$16 sps:$4 sm:$0xff]  }
   0x3   :  { %279 = vmatprep.subr.bf16.mxu0 %v412_v2  ;;  %v417_v5 = vld [vmem:[%s641_s3 + $0x8] ss:$16 sps:$4 sm:$0xff]   ;;  %322 = vmatprep.subr.bf16.mxu1 %v414_v3  ;;  %v418_v6 = vld [vmem:[%s641_s3 + $0x24] ss:$16 sps:$4 sm:$0xff]   ;;  %v420_v7 = vld [vmem:[%s641_s3 + $0x2c] ss:$16 sps:$4 sm:$0xff]  }
   0x4   :  { %280 = vmatpush1.bf16.msra.mxu0 %v416_v4  ;;  %323 = vmatpush1.bf16.msra.mxu1 %v417_v5  ;;  %v422_v16 = vld [vmem:[%s641_s3 + $0x20] ss:$16 sps:$4 sm:$0xff]   ;;  %v423_v17 = vld [vmem:[%s641_s3 + $0x28] ss:$16 sps:$4 sm:$0xff]   ;;  %v424_v18 = vld [vmem:[%s641_s3 + $0x44] ss:$16 sps:$4 sm:$0xff]  }
   0x5   :  { %281 = vmatprep.subr.bf16.mxu0 %v418_v6  ;;  %324 = vmatprep.subr.bf16.mxu1 %v420_v7  ;;  %v426_v19 = vld [vmem:[%s641_s3 + $0x4c] ss:$16 sps:$4 sm:$0xff]   ;;  %v428_v20 = vld [vmem:[%s641_s3 + $0x40] ss:$16 sps:$4 sm:$0xff]   ;;  %v429_v21 = vld [vmem:[%s641_s3 + $0x48] ss:$16 sps:$4 sm:$0xff]  }
   0x6   :  { %25 = vadd.xlane.f32.xlu0 %v22_v1  ;;  %v430_v22 = vld [vmem:[%s641_s3 + $0x64] ss:$16 sps:$4 sm:$0xff]   ;;  %v432_v23 = vld [vmem:[%s641_s3 + $0x6c] ss:$16 sps:$4 sm:$0xff]   ;;  %v434_v24 = vld [vmem:[%s641_s3 + $0x60] ss:$16 sps:$4 sm:$0xff]  }
   0x7   :  { %v435_v25 = vld [vmem:[%s641_s3 + $0x68] ss:$16 sps:$4 sm:$0xff]   ;;  %v436_v26 = vld [vmem:[%s641_s3 + $0x84] ss:$16 sps:$4 sm:$0xff]   ;;  %v438_v27 = vld [vmem:[%s641_s3 + $0x8c] ss:$16 sps:$4 sm:$0xff]  }
   0x8   :  { %282 = vmatpush1.bf16.msra.mxu0 %v422_v16  ;;  %325 = vmatpush1.bf16.msra.mxu1 %v423_v17  ;;  %v440_v28 = vld [vmem:[%s641_s3 + $0x80] ss:$16 sps:$4 sm:$0xff]   ;;  %v441_v29 = vld [vmem:[%s641_s3 + $0x88] ss:$16 sps:$4 sm:$0xff]   ;;  %v442_v30 = vld [vmem:[%s641_s3 + $0xa4] ss:$16 sps:$4 sm:$0xff]  }
   0x9   :  { %283 = vmatprep.subr.bf16.mxu0 %v424_v18  ;;  %326 = vmatprep.subr.bf16.mxu1 %v426_v19  ;;  %v444_v31 = vld [vmem:[%s641_s3 + $0xac] ss:$16 sps:$4 sm:$0xff]   ;;  %v446_v32 = vld [vmem:[%s641_s3 + $0xa0] ss:$16 sps:$4 sm:$0xff]   ;;  %v447_v33 = vld [vmem:[%s641_s3 + $0xa8] ss:$16 sps:$4 sm:$0xff]  }
   0xa   :  { %v448_v34 = vld [vmem:[%s641_s3 + $0xc4] ss:$16 sps:$4 sm:$0xff]   ;;  %v450_v35 = vld [vmem:[%s641_s3 + $0xcc] ss:$16 sps:$4 sm:$0xff]   ;;  %v452_v37 = vld [vmem:[%s641_s3 + $0xc0] ss:$16 sps:$4 sm:$0xff]  }
   0xb   :  { %v453_v38 = vld [vmem:[%s641_s3 + $0xc8] ss:$16 sps:$4 sm:$0xff]   ;;  %v454_v39 = vld [vmem:[%s641_s3 + $0xe4] ss:$16 sps:$4 sm:$0xff]   ;;  %v456_v40 = vld [vmem:[%s641_s3 + $0xec] ss:$16 sps:$4 sm:$0xff]  }
   0xc   :  { %284 = vmatpush1.bf16.msra.mxu0 %v428_v20  ;;  %327 = vmatpush1.bf16.msra.mxu1 %v429_v21  ;;  %v458_v41 = vld [vmem:[%s641_s3 + $0xe0] ss:$16 sps:$4 sm:$0xff]   ;;  %v459_v42 = vld [vmem:[%s641_s3 + $0xe8] ss:$16 sps:$4 sm:$0xff]   ;;  %v100_v61 = vshrl.u32 %v99_v60, 7 }
   0xd   :  { %285 = vmatprep.subr.bf16.mxu0 %v430_v22  ;;  %328 = vmatprep.subr.bf16.mxu1 %v432_v23  ;;  %v377_v51 = vld [vmem:[%s642_s1] ss:$0 sm:$0xff] }
   0xe   :  { %v378_v55 = vld [vmem:[%s643_s2] ss:$0 sm:$0xff]  ;;  %v101_v62 = vsub.s32 0, %v100_v61  ;;  %v109_v63 = vsub.s32 2, %v100_v61  ;;  %v113_v2 = vsub.s32 3, %v100_v61 }
  0x10   :  { %286 = vmatpush1.bf16.msra.mxu0 %v434_v24  ;;  %329 = vmatpush1.bf16.msra.mxu1 %v435_v25 }
  0x11   :  { %287 = vmatprep.subr.bf16.mxu0 %v436_v26  ;;  %330 = vmatprep.subr.bf16.mxu1 %v438_v27 }
  0x14   :  { %288 = vmatpush1.bf16.msra.mxu0 %v440_v28  ;;  %331 = vmatpush1.bf16.msra.mxu1 %v441_v29 }
  0x15   :  { %289 = vmatprep.subr.bf16.mxu0 %v442_v30  ;;  %332 = vmatprep.subr.bf16.mxu1 %v444_v31 }
  0x18   :  { %290 = vmatpush1.bf16.msra.mxu0 %v446_v32  ;;  %333 = vmatpush1.bf16.msra.mxu1 %v447_v33 }
  0x19   :  { %291 = vmatprep.subr.bf16.mxu0 %v448_v34  ;;  %334 = vmatprep.subr.bf16.mxu1 %v450_v35 }
  0x1c   :  { %292 = vmatpush1.bf16.msra.mxu0 %v452_v37  ;;  %335 = vmatpush1.bf16.msra.mxu1 %v453_v38 }
  0x1d   :  { %293 = vmatprep.subr.bf16.mxu0 %v454_v39  ;;  %336 = vmatprep.subr.bf16.mxu1 %v456_v40 }
  0x20   :  { %294 = vmatpush1.bf16.msra.mxu0 %v458_v41  ;;  %337 = vmatpush1.bf16.msra.mxu1 %v459_v42 }
  0x8f   :  { %v24_v8 = vpop.xlane.xlu0 %23 }
  0x90   :  { %v28_v9 = vmul.f32 0.0078125, %v24_v8 }
  0x92   :  { %v519_v10 = vsub.f32 %v21_v0, %v28_v9  ;;  %v97_v0 = vld [vmem:[%s644_s4] sm:$0xf] }
  0x93   :  { %v26_v11 = vpop.xlane.xlu0 %25  ;;  %v102_v3 = vrot.slane %v97_v0, %v101_v62  ;;  %v110_v4 = vrot.slane %v97_v0, %v109_v63  ;;  %v114_v6 = vrot.slane %v97_v0, %v113_v2 }
  0x94   :  { %v29_v12 = vmul.f32 0.0078125, %v26_v11  ;;  %v32_v13 = vmul.f32 %v519_v10, %v519_v10 }
  0x96   :  { %v523_v14 = vsub.f32 %v22_v1, %v29_v12  ;;  %34 = vadd.xlane.f32.xlu1 %v32_v13  ;;  %v105_v1 = vsub.s32 1, %v100_v61 }
  0x98   :  { %v33_v15 = vmul.f32 %v523_v14, %v523_v14  ;;  %v106_v5 = vrot.slane %v97_v0, %v105_v1 }
  0x9a   :  { %36 = vadd.xlane.f32.xlu1 %v33_v15 }
 0x123   :  { %v35_v43 = vpop.xlane.xlu1 %34 }
 0x124   :  { %v38_v44 = vmul.f32 0.0078125, %v35_v43 }
 0x126   :  { %v40_v45 = vadd.f32 1e-12, %v38_v44 }
 0x127   :  { %v37_v46 = vpop.xlane.xlu1 %36 }
 0x128   :  { %460 = vrsqrt.f32 %v40_v45  ;;  %v39_v47 = vmul.f32 0.0078125, %v37_v46 }
 0x12a   :  { %v41_v48 = vadd.f32 1e-12, %v39_v47 }
 0x12c   :  { %462 = vrsqrt.f32 %v41_v48 }
 0x132   :  { %v461_v49 = vpop.eup %460 }
 0x133   :  { %v44_v50 = vmul.f32 %v461_v49, %v519_v10 }
 0x135   :  { %v53_v54 = vmul.f32 %v377_v51, %v44_v50 }
 0x136   :  { %v463_v52 = vpop.eup %462 }
 0x137   :  { %v45_v53 = vmul.f32 %v463_v52, %v523_v14  ;;  %v62_v57 = vadd.f32 %v378_v55, %v53_v54 }
 0x139   :  { %v54_v56 = vmul.f32 %v377_v51, %v45_v53 }
 0x13b   :  { %v63_v58 = vadd.f32 %v378_v55, %v54_v56 }
 0x13d   :  { %v64_v59 = vpack.c.bf16 %v63_v58, %v62_v57 }
 0x13f   :  { %312 = vmatmul.mubr.bf16.vlgmr.msra.gmra.mrb[0].mxu0 %v64_v59  ;;  %355 = vmatmul.mubr.bf16.vlgmr.msra.gmra.mrb[0].mxu1 %v64_v59 }
 0x212   :  { %v313_v7 = vpop.f32.mrb[0].mxu0  ;;  %v356_v8 = vpop.f32.mrb[0].mxu1 }
 0x213   :  { %v314_v9 = vadd.f32 %v313_v7, %v102_v3  ;;  %v357_v10 = vadd.f32 %v356_v8, %v110_v4  ;;  %v315_v11 = vpop.f32.mrb[1].mxu0  ;;  %v358_v12 = vpop.f32.mrb[1].mxu1 }
 0x214   :  { %v316_v13 = vadd.f32 %v315_v11, %v106_v5  ;;  %v359_v14 = vadd.f32 %v358_v12, %v114_v6  ;;  %v317_v15 = vpop.f32.mrb[2].mxu0  ;;  %v360_v16 = vpop.f32.mrb[2].mxu1 }
 0x215   :  { %365 = vst [vmem:[%s645_s5] sm:$0xff] %v314_v9  ;;  %367 = vst [vmem:[%s645_s5 + $0x10] sm:$0xff] %v357_v10  ;;  %v318_v17 = vadd.f32 %v317_v15, %v102_v3  ;;  %v361_v18 = vadd.f32 %v360_v16, %v110_v4  ;;  %v319_v19 = vpop.f32.mrb[3].mxu0  ;;  %v362_v20 = vpop.f32.mrb[3].mxu1 }
 0x216   :  { %366 = vst [vmem:[%s645_s5 + $0x8] sm:$0xff] %v316_v13  ;;  %368 = vst [vmem:[%s645_s5 + $0x18] sm:$0xff] %v359_v14  ;;  %v320_v21 = vadd.f32 %v319_v19, %v106_v5  ;;  %v363_v22 = vadd.f32 %v362_v20, %v114_v6 }
 0x217   :  { %369 = vst [vmem:[%s645_s5 + $0x20] sm:$0xff] %v318_v17  ;;  %371 = vst [vmem:[%s645_s5 + $0x30] sm:$0xff] %v361_v18 }
 0x218   :  { %370 = vst [vmem:[%s645_s5 + $0x28] sm:$0xff] %v320_v21  ;;  %372 = vst [vmem:[%s645_s5 + $0x38] sm:$0xff] %v363_v22 }

// kernel: sharnn_forward.9
= control target key start
LH: loop header
LB: loop body
LE: loop exit
PB: predicated region body
PF: predicated region fallthrough
CT: control target
= control target key end

     0   :  { %v1201_v32 = vmov 0.0   ;;  %v1203_v33 = vmov 0.0   ;;  %s1205_s17 = smov 0   ;;  %s1528_s0 = inlined_call_operand.vmem [shape: f32[8,2,512], index: 0, kind: input, shape index: {}]   ;;  %s1529_s1 = inlined_call_operand.vmem [shape: bf16[128,512], index: 1, kind: input, shape index: {}]   ;;  %s1530_s2 = inlined_call_operand.vmem [shape: f32[8,2,128], index: 2, kind: output, shape index: {}]  }
   0x1   :  { %v1044_v0 = vld [vmem:[%s1529_s1] sm:$0xff]  ;;  %v1049_v1 = vld [vmem:[%s1529_s1 + $0x8] sm:$0xff]  ;;  %v1054_v2 = vld [vmem:[%s1529_s1 + $0x10] sm:$0xff] }
   0x2   :  { %1555 = vst [vmem:[#allocation2_spill] sm:$0xff] %v1044_v0  ;;  %1556 = vst [vmem:[#allocation3_spill] sm:$0xff] %v1049_v1  ;;  %v1059_v3 = vld [vmem:[%s1529_s1 + $0x18] sm:$0xff]  ;;  %v1064_v4 = vld [vmem:[%s1529_s1 + $0x20] sm:$0xff] }
   0x3   :  { %1557 = vst [vmem:[#allocation4_spill] sm:$0xff] %v1054_v2  ;;  %1558 = vst [vmem:[#allocation5_spill] sm:$0xff] %v1059_v3  ;;  %v1069_v5 = vld [vmem:[%s1529_s1 + $0x28] sm:$0xff]  ;;  %v1074_v6 = vld [vmem:[%s1529_s1 + $0x30] sm:$0xff] }
   0x4   :  { %1559 = vst [vmem:[#allocation6_spill] sm:$0xff] %v1064_v4  ;;  %1560 = vst [vmem:[#allocation7_spill] sm:$0xff] %v1069_v5  ;;  %v1079_v7 = vld [vmem:[%s1529_s1 + $0x38] sm:$0xff]  ;;  %v1084_v8 = vld [vmem:[%s1529_s1 + $0x40] sm:$0xff] }
   0x5   :  { %1561 = vst [vmem:[#allocation8_spill] sm:$0xff] %v1074_v6  ;;  %1562 = vst [vmem:[#allocation9_spill] sm:$0xff] %v1079_v7  ;;  %v1089_v9 = vld [vmem:[%s1529_s1 + $0x48] sm:$0xff]  ;;  %v1094_v10 = vld [vmem:[%s1529_s1 + $0x50] sm:$0xff] }
   0x6   :  { %1563 = vst [vmem:[#allocation10_spill] sm:$0xff] %v1084_v8  ;;  %1564 = vst [vmem:[#allocation11_spill] sm:$0xff] %v1089_v9  ;;  %v1099_v11 = vld [vmem:[%s1529_s1 + $0x58] sm:$0xff]  ;;  %v1104_v12 = vld [vmem:[%s1529_s1 + $0x60] sm:$0xff] }
   0x7   :  { %1565 = vst [vmem:[#allocation12_spill] sm:$0xff] %v1094_v10  ;;  %1566 = vst [vmem:[#allocation13_spill] sm:$0xff] %v1099_v11  ;;  %v1109_v13 = vld [vmem:[%s1529_s1 + $0x68] sm:$0xff]  ;;  %v1114_v14 = vld [vmem:[%s1529_s1 + $0x70] sm:$0xff] }
   0x8   :  { %1567 = vst [vmem:[#allocation14_spill] sm:$0xff] %v1104_v12  ;;  %1568 = vst [vmem:[#allocation15_spill] sm:$0xff] %v1109_v13  ;;  %v1119_v15 = vld [vmem:[%s1529_s1 + $0x78] sm:$0xff]  ;;  %v1124_v16 = vld [vmem:[%s1529_s1 + $0x80] sm:$0xff] }
   0x9   :  { %1569 = vst [vmem:[#allocation16_spill] sm:$0xff] %v1114_v14  ;;  %1570 = vst [vmem:[#allocation17_spill] sm:$0xff] %v1119_v15  ;;  %v1129_v17 = vld [vmem:[%s1529_s1 + $0x88] sm:$0xff]  ;;  %v1134_v18 = vld [vmem:[%s1529_s1 + $0x90] sm:$0xff] }
   0xa   :  { %1571 = vst [vmem:[#allocation18_spill] sm:$0xff] %v1124_v16  ;;  %1572 = vst [vmem:[#allocation19_spill] sm:$0xff] %v1129_v17  ;;  %v1139_v19 = vld [vmem:[%s1529_s1 + $0x98] sm:$0xff]  ;;  %v1144_v20 = vld [vmem:[%s1529_s1 + $0xa0] sm:$0xff] }
   0xb   :  { %1573 = vst [vmem:[#allocation20_spill] sm:$0xff] %v1134_v18  ;;  %1574 = vst [vmem:[#allocation21_spill] sm:$0xff] %v1139_v19  ;;  %v1149_v21 = vld [vmem:[%s1529_s1 + $0xa8] sm:$0xff]  ;;  %v1154_v22 = vld [vmem:[%s1529_s1 + $0xb0] sm:$0xff] }
   0xc   :  { %1575 = vst [vmem:[#allocation22_spill] sm:$0xff] %v1144_v20  ;;  %1576 = vst [vmem:[#allocation23_spill] sm:$0xff] %v1149_v21  ;;  %v1159_v23 = vld [vmem:[%s1529_s1 + $0xb8] sm:$0xff]  ;;  %v1164_v24 = vld [vmem:[%s1529_s1 + $0xc0] sm:$0xff] }
   0xd   :  { %v1169_v25 = vld [vmem:[%s1529_s1 + $0xc8] sm:$0xff]  ;;  %v1174_v26 = vld [vmem:[%s1529_s1 + $0xd0] sm:$0xff]  ;;  %v1179_v27 = vld [vmem:[%s1529_s1 + $0xd8] sm:$0xff] }
   0xe   :  { %v1184_v28 = vld [vmem:[%s1529_s1 + $0xe0] sm:$0xff]  ;;  %v1189_v29 = vld [vmem:[%s1529_s1 + $0xe8] sm:$0xff]  ;;  %v1194_v30 = vld [vmem:[%s1529_s1 + $0xf0] sm:$0xff] }
   0xf   :  { %v1199_v31 = vld [vmem:[%s1529_s1 + $0xf8] sm:$0xff] }
  0x10 LB: > { %v1583_v15 = vld [vmem:[#allocation17_spill] sm:$0xff]  ;;  %v1584_v14 = vld [vmem:[#allocation16_spill] sm:$0xff]  ;;  %v1585_v13 = vld [vmem:[#allocation15_spill] sm:$0xff]  ;;  %v1531_v44 = vmov 0   ;;  %v1338_v59 = vcombine.high %v1164_v24, %v1174_v26  ;;  %v1342_v60 = vcombine.high %v1169_v25, %v1179_v27  ;;  %v1348_v61 = vcombine.low %v1164_v24, %v1174_v26  ;;  %s902_s1 = sshll.u32 %s1022_s17, 5  ;;  %s903_s21 = sshll.u32 %s1022_s17, 3  ;;  %v1014_v32 = vphi %v1201_v32, %v786_v32   ;;  %s1022_s17 = sphi %s1205_s17, %s49_s17   ;;  %v1018_v33 = vphi %v1203_v33, %v788_v33  }
  0x11   : > { %v1581_v17 = vld [vmem:[#allocation19_spill] sm:$0xff]  ;;  %v1582_v16 = vld [vmem:[#allocation18_spill] sm:$0xff]  ;;  %v1587_v11 = vld [vmem:[#allocation13_spill] sm:$0xff]  ;;  %250 = vmatprep.mubr.bf16.mxu0 %v1531_v44  ;;  %291 = vmatprep.mubr.bf16.mxu1 %v1531_v44  ;;  %v1282_v48 = vcombine.high %v1585_v13, %v1583_v15  ;;  %v1292_v50 = vcombine.low %v1585_v13, %v1583_v15  ;;  %v1352_v62 = vcombine.low %v1169_v25, %v1179_v27  ;;  %s1422_s20 = scalar_lea.vmem %s1528_s0, %s902_s1  ;;  %s1435_s24 = scalar_lea.vmem %s1530_s2, %s903_s21 }
  0x12   : > { %v1579_v19 = vld [vmem:[#allocation21_spill] sm:$0xff]  ;;  %v1580_v18 = vld [vmem:[#allocation20_spill] sm:$0xff]  ;;  %v1586_v12 = vld [vmem:[#allocation14_spill] sm:$0xff]  ;;  %v1358_v63 = vcombine.high %v1184_v28, %v1194_v30  ;;  %v1362_v44 = vcombine.high %v1189_v29, %v1199_v31  ;;  %s49_s17 = sadd.s32 1, %s1022_s17  }
  0x13   : > { %v1577_v21 = vld [vmem:[#allocation23_spill] sm:$0xff]  ;;  %v1578_v20 = vld [vmem:[#allocation22_spill] sm:$0xff]  ;;  %v1588_v10 = vld [vmem:[#allocation12_spill] sm:$0xff]  ;;  %v1278_v47 = vcombine.high %v1586_v12, %v1584_v14  ;;  %v1288_v49 = vcombine.low %v1586_v12, %v1584_v14  ;;  %v1298_v51 = vcombine.high %v1582_v16, %v1580_v18  ;;  %v1302_v52 = vcombine.high %v1581_v17, %v1579_v19  ;;  %p46_p0 = scmp.ge.s32.totalorder %s49_s17, 2  }
  0x14   : > { %v1589_v9 = vld [vmem:[#allocation11_spill] sm:$0xff]  ;;  %v1590_v8 = vld [vmem:[#allocation10_spill] sm:$0xff]  ;;  %v1591_v7 = vld [vmem:[#allocation9_spill] sm:$0xff]  ;;  %v1308_v53 = vcombine.low %v1582_v16, %v1580_v18  ;;  %v1312_v54 = vcombine.low %v1581_v17, %v1579_v19  ;;  %v1318_v55 = vcombine.high %v1578_v20, %v1154_v22  ;;  %v1322_v56 = vcombine.high %v1577_v21, %v1159_v23 }
  0x15   : > { %v1592_v6 = vld [vmem:[#allocation8_spill] sm:$0xff]  ;;  %v1593_v5 = vld [vmem:[#allocation7_spill] sm:$0xff]  ;;  %v1594_v4 = vld [vmem:[#allocation6_spill] sm:$0xff]  ;;  %v1256_v42 = vcombine.high %v1590_v8, %v1588_v10  ;;  %v1260_v43 = vcombine.high %v1589_v9, %v1587_v11  ;;  %v1268_v45 = vcombine.low %v1590_v8, %v1588_v10  ;;  %v1272_v46 = vcombine.low %v1589_v9, %v1587_v11 }
  0x16   : > { %v1595_v3 = vld [vmem:[#allocation5_spill] sm:$0xff]  ;;  %v1596_v2 = vld [vmem:[#allocation4_spill] sm:$0xff]  ;;  %v1597_v1 = vld [vmem:[#allocation3_spill] sm:$0xff]  ;;  %v1234_v38 = vcombine.high %v1594_v4, %v1592_v6  ;;  %v1238_v39 = vcombine.high %v1593_v5, %v1591_v7  ;;  %v1246_v40 = vcombine.low %v1594_v4, %v1592_v6  ;;  %v1250_v41 = vcombine.low %v1593_v5, %v1591_v7 }
  0x17   : > { %v1598_v0 = vld [vmem:[#allocation2_spill] sm:$0xff]  ;;  %v1222_v35 = vcombine.high %v1597_v1, %v1595_v3  ;;  %v1230_v37 = vcombine.low %v1597_v1, %v1595_v3  ;;  %v1328_v57 = vcombine.low %v1578_v20, %v1154_v22  ;;  %v1332_v58 = vcombine.low %v1577_v21, %v1159_v23 }
  0x18   : > { %v1218_v34 = vcombine.high %v1598_v0, %v1596_v2  ;;  %v1226_v36 = vcombine.low %v1598_v0, %v1596_v2  ;;  %v1368_v0 = vcombine.low %v1184_v28, %v1194_v30  ;;  %v1372_v1 = vcombine.low %v1189_v29, %v1199_v31 }
  0x19   : > { %259 = vmatprep.subr.bf16.mxu1 %v1222_v35  ;;  %v57_v2 = vpack.c.bf16 %v1018_v33, %v1018_v33  ;;  %v1599_v3 = vmov 0   ;;  %v309_v4 = vlaneseq }
  0x1a   : > { %218 = vmatprep.subr.bf16.mxu0 %v1218_v34  ;;  %260 = vmatpush1.bf16.msra.mxu1 %v1230_v37 }
  0x1b   : > { %219 = vmatpush1.bf16.msra.mxu0 %v1226_v36  ;;  %261 = vmatprep.subr.bf16.mxu1 %v1238_v39  ;;  %v310_v6 = vshrl.u32 %v309_v4, 7 }
  0x1c   : > { %220 = vmatprep.subr.bf16.mxu0 %v1234_v38 }
  0x1e   : > { %262 = vmatpush1.bf16.msra.mxu1 %v1250_v41 }
  0x1f   : > { %221 = vmatpush1.bf16.msra.mxu0 %v1246_v40  ;;  %263 = vmatprep.subr.bf16.mxu1 %v1260_v43 }
  0x20   : > { %222 = vmatprep.subr.bf16.mxu0 %v1256_v42 }
  0x22   : > { %264 = vmatpush1.bf16.msra.mxu1 %v1272_v46 }
  0x23   : > { %223 = vmatpush1.bf16.msra.mxu0 %v1268_v45  ;;  %265 = vmatprep.subr.bf16.mxu1 %v1282_v48 }
  0x24   : > { %224 = vmatprep.subr.bf16.mxu0 %v1278_v47 }
  0x26   : > { %266 = vmatpush1.bf16.msra.mxu1 %v1292_v50 }
  0x27   : > { %225 = vmatpush1.bf16.msra.mxu0 %v1288_v49  ;;  %267 = vmatprep.subr.bf16.mxu1 %v1302_v52 }
  0x28   : > { %226 = vmatprep.subr.bf16.mxu0 %v1298_v51 }
  0x2a   : > { %268 = vmatpush1.bf16.msra.mxu1 %v1312_v54 }
  0x2b   : > { %227 = vmatpush1.bf16.msra.mxu0 %v1308_v53  ;;  %269 = vmatprep.subr.bf16.mxu1 %v1322_v56 }
  0x2c   : > { %228 = vmatprep.subr.bf16.mxu0 %v1318_v55 }
  0x2e   : > { %270 = vmatpush1.bf16.msra.mxu1 %v1332_v58 }
  0x2f   : > { %229 = vmatpush1.bf16.msra.mxu0 %v1328_v57  ;;  %271 = vmatprep.subr.bf16.mxu1 %v1342_v60 }
  0x30   : > { %230 = vmatprep.subr.bf16.mxu0 %v1338_v59 }
  0x32   : > { %272 = vmatpush1.bf16.msra.mxu1 %v1352_v62 }
  0x33   : > { %231 = vmatpush1.bf16.msra.mxu0 %v1348_v61  ;;  %273 = vmatprep.subr.bf16.mxu1 %v1362_v44 }
  0x34   : > { %232 = vmatprep.subr.bf16.mxu0 %v1358_v63 }
  0x36   : > { %274 = vmatpush1.bf16.msra.mxu1 %v1372_v1 }
  0x37   : > { %233 = vmatpush1.bf16.msra.mxu0 %v1368_v0  ;;  %404 = vmatprep.subr.bf16.mxu1 %v1222_v35 }
  0x38   : > { %363 = vmatprep.subr.bf16.mxu0 %v1218_v34 }
  0x39   : > { %292 = vmatmul.mubr.bf16.vlgmr.msra.gmra.mrb[0].mxu1 %v57_v2 }
  0x3a   : > { %251 = vmatmul.mubr.bf16.vlgmr.msra.gmra.mrb[0].mxu0 %v57_v2  ;;  %405 = vmatpush1.bf16.msra.mxu1 %v1230_v37  ;;  %v1025_v2 = vmov 1983009808  }
  0x3b   : > { %364 = vmatpush1.bf16.msra.mxu0 %v1226_v36  ;;  %406 = vmatprep.subr.bf16.mxu1 %v1238_v39  ;;  %v307_v33 = vunpack.c.l.s4 %v1025_v2 }
  0x3c   : > { %365 = vmatprep.subr.bf16.mxu0 %v1234_v38  ;;  %395 = vmatprep.mubr.bf16.mxu0 %v1599_v3 }
  0x3d   : > { %436 = vmatprep.mubr.bf16.mxu1 %v1599_v3  ;;  %v308_v5 = vunpack.c.0.s8 %v307_v33 }
  0x3e   : > { %407 = vmatpush1.bf16.msra.mxu1 %v1250_v41 }
  0x3f   : > { %366 = vmatpush1.bf16.msra.mxu0 %v1246_v40  ;;  %408 = vmatprep.subr.bf16.mxu1 %v1260_v43  ;;  %v1417_v9 = vsub.s32 %v308_v5, %v310_v6  ;;  %v56_v5 = vld [vmem:[%s1422_s20] sm:$0xff] }
  0x40   : > { %367 = vmatprep.subr.bf16.mxu0 %v1256_v42 }
  0x42   : > { %409 = vmatpush1.bf16.msra.mxu1 %v1272_v46 }
  0x43   : > { %368 = vmatpush1.bf16.msra.mxu0 %v1268_v45  ;;  %410 = vmatprep.subr.bf16.mxu1 %v1282_v48 }
  0x44   : > { %369 = vmatprep.subr.bf16.mxu0 %v1278_v47 }
  0x46   : > { %411 = vmatpush1.bf16.msra.mxu1 %v1292_v50 }
  0x47   : > { %370 = vmatpush1.bf16.msra.mxu0 %v1288_v49  ;;  %412 = vmatprep.subr.bf16.mxu1 %v1302_v52 }
  0x48   : > { %371 = vmatprep.subr.bf16.mxu0 %v1298_v51 }
  0x4a   : > { %413 = vmatpush1.bf16.msra.mxu1 %v1312_v54 }
  0x4b   : > { %372 = vmatpush1.bf16.msra.mxu0 %v1308_v53  ;;  %414 = vmatprep.subr.bf16.mxu1 %v1322_v56 }
  0x4c   : > { %373 = vmatprep.subr.bf16.mxu0 %v1318_v55 }
  0x4e   : > { %415 = vmatpush1.bf16.msra.mxu1 %v1332_v58 }
  0x4f   : > { %374 = vmatpush1.bf16.msra.mxu0 %v1328_v57  ;;  %416 = vmatprep.subr.bf16.mxu1 %v1342_v60 }
  0x50   : > { %375 = vmatprep.subr.bf16.mxu0 %v1338_v59 }
  0x52   : > { %417 = vmatpush1.bf16.msra.mxu1 %v1352_v62 }
  0x53   : > { %376 = vmatpush1.bf16.msra.mxu0 %v1348_v61  ;;  %418 = vmatprep.subr.bf16.mxu1 %v1362_v44 }
  0x54   : > { %377 = vmatprep.subr.bf16.mxu0 %v1358_v63 }
  0x56   : > { %419 = vmatpush1.bf16.msra.mxu1 %v1372_v1 }
  0x57   : > { %378 = vmatpush1.bf16.msra.mxu0 %v1368_v0  ;;  %549 = vmatprep.subr.bf16.mxu1 %v1222_v35 }
  0x58   : > { %508 = vmatprep.subr.bf16.mxu0 %v1218_v34 }
 0x10c   : > { %v293_v8 = vpop.f32.mrb[0].mxu1 }
 0x10d   : > { %v252_v7 = vpop.f32.mrb[0].mxu0  ;;  %v295_v11 = vpop.f32.mrb[1].mxu1 }
 0x10e   : > { %v254_v10 = vpop.f32.mrb[1].mxu0  ;;  %v305_v13 = vcombine.low %v293_v8, %v295_v11  ;;  %v297_v2 = vpop.f32.mrb[2].mxu1 }
 0x10f   : > { %v304_v12 = vcombine.low %v252_v7, %v254_v10  ;;  %v256_v14 = vpop.f32.mrb[2].mxu0  ;;  %v298_v33 = vpop.f32.mrb[3].mxu1 }
 0x110   : > { %v257_v15 = vpop.f32.mrb[3].mxu0  ;;  %v319_v16 = vrot.slane %v305_v13, %v1417_v9 }
 0x111   : > { %v312_v4 = vrot.slane %v304_v12, %v1417_v9 }
 0x113   : > { %v320_v6 = vcombine.low %v312_v4, %v319_v16 }
 0x115   : > { %v322_v17 = vadd.f32 %v320_v6, %v56_v5 }
 0x117   : > { %v870_v18 = vmul.f32 -1.442695, %v322_v17  ;;  %v330_v7 = vrot.slane %v322_v17, 2  ;;  %v341_v19 = vrot.slane %v322_v17, 6  ;;  %v338_v8 = vrot.slane %v322_v17, 4 }
 0x119   : > { %936 = vpow2.f32 %v870_v18  ;;  %v871_v10 = vmul.f32 -1.442695, %v330_v7  ;;  %v872_v20 = vmul.f32 -1.442695, %v341_v19 }
 0x11b   : > { %938 = vpow2.f32 %v871_v10 }
 0x11c   : > { %940 = vpow2.f32 %v872_v20 }
 0x123   : > { %v937_v21 = vpop.eup %936 }
 0x124   : > { %v326_v11 = vadd.f32 1.0, %v937_v21 }
 0x125   : > { %v939_v14 = vpop.eup %938 }
 0x126   : > { %942 = vrcp.f32 %v326_v11  ;;  %v335_v12 = vadd.f32 1.0, %v939_v14  ;;  %v941_v13 = vpop.eup %940 }
 0x127   : > { %944 = vtanh.f32 %v338_v8  ;;  %v346_v33 = vadd.f32 1.0, %v941_v13 }
 0x128   : > { %946 = vrcp.f32 %v335_v12 }
 0x129   : > { %948 = vrcp.f32 %v346_v33  ;;  %v876_v33 = vld [vmem:[%s1422_s20 + $0x8] sm:$0xff] }
 0x130   : > { %v943_v15 = vpop.eup %942 }
 0x131   : > { %v945_v16 = vpop.eup %944 }
 0x132   : > { %v947_v2 = vpop.eup %946  ;;  %v350_v4 = vmul.f32 %v945_v16, %v943_v15 }
 0x133   : > { %v349_v18 = vmul.f32 %v1014_v32, %v947_v2  ;;  %v949_v17 = vpop.eup %948 }
 0x135   : > { %v1428_v5 = vadd.f32 %v350_v4, %v349_v18 }
 0x137   : > { %950 = vtanh.f32 %v1428_v5 }
 0x141   : > { %v951_v19 = vpop.eup %950 }
 0x142   : > { %v353_v20 = vmul.f32 %v951_v19, %v949_v17 }
 0x144   : > { %356 = vst [vmem:[%s1435_s24] sm:$0x3] %v353_v20  ;;  %v362_v21 = vpack.c.bf16 %v353_v20, %v353_v20 }
 0x146   : > { %396 = vmatmul.mubr.bf16.vlgmr.msra.gmra.mrb[4].mxu0 %v362_v21  ;;  %437 = vmatmul.mubr.bf16.vlgmr.msra.gmra.mrb[4].mxu1 %v362_v21 }
 0x147   : > { %509 = vmatpush1.bf16.msra.mxu0 %v1226_v36  ;;  %550 = vmatpush1.bf16.msra.mxu1 %v1230_v37 }
 0x148   : > { %510 = vmatprep.subr.bf16.mxu0 %v1234_v38  ;;  %551 = vmatprep.subr.bf16.mxu1 %v1238_v39 }
 0x149   : > { %540 = vmatprep.mubr.bf16.mxu0 %v1599_v3  ;;  %581 = vmatprep.mubr.bf16.mxu1 %v1599_v3 }
 0x14b   : > { %511 = vmatpush1.bf16.msra.mxu0 %v1246_v40  ;;  %552 = vmatpush1.bf16.msra.mxu1 %v1250_v41 }
 0x14c   : > { %512 = vmatprep.subr.bf16.mxu0 %v1256_v42  ;;  %553 = vmatprep.subr.bf16.mxu1 %v1260_v43 }
 0x14f   : > { %513 = vmatpush1.bf16.msra.mxu0 %v1268_v45  ;;  %554 = vmatpush1.bf16.msra.mxu1 %v1272_v46 }
 0x150   : > { %514 = vmatprep.subr.bf16.mxu0 %v1278_v47  ;;  %555 = vmatprep.subr.bf16.mxu1 %v1282_v48 }
 0x153   : > { %515 = vmatpush1.bf16.msra.mxu0 %v1288_v49  ;;  %556 = vmatpush1.bf16.msra.mxu1 %v1292_v50 }
 0x154   : > { %516 = vmatprep.subr.bf16.mxu0 %v1298_v51  ;;  %557 = vmatprep.subr.bf16.mxu1 %v1302_v52 }
 0x157   : > { %517 = vmatpush1.bf16.msra.mxu0 %v1308_v53  ;;  %558 = vmatpush1.bf16.msra.mxu1 %v1312_v54 }
 0x158   : > { %518 = vmatprep.subr.bf16.mxu0 %v1318_v55  ;;  %559 = vmatprep.subr.bf16.mxu1 %v1322_v56 }
 0x15b   : > { %519 = vmatpush1.bf16.msra.mxu0 %v1328_v57  ;;  %560 = vmatpush1.bf16.msra.mxu1 %v1332_v58 }
 0x15c   : > { %520 = vmatprep.subr.bf16.mxu0 %v1338_v59  ;;  %561 = vmatprep.subr.bf16.mxu1 %v1342_v60 }
 0x15f   : > { %521 = vmatpush1.bf16.msra.mxu0 %v1348_v61  ;;  %562 = vmatpush1.bf16.msra.mxu1 %v1352_v62 }
 0x160   : > { %522 = vmatprep.subr.bf16.mxu0 %v1358_v63  ;;  %563 = vmatprep.subr.bf16.mxu1 %v1362_v44 }
 0x163   : > { %523 = vmatpush1.bf16.msra.mxu0 %v1368_v0  ;;  %564 = vmatpush1.bf16.msra.mxu1 %v1372_v1 }
 0x164   : > { %653 = vmatprep.subr.bf16.mxu0 %v1218_v34  ;;  %694 = vmatprep.subr.bf16.mxu1 %v1222_v35 }
 0x219   : > { %v397_v32 = vpop.f32.mrb[4].mxu0  ;;  %v438_v6 = vpop.f32.mrb[4].mxu1 }
 0x21a   : > { %v399_v7 = vpop.f32.mrb[5].mxu0  ;;  %v440_v10 = vpop.f32.mrb[5].mxu1 }
 0x21b   : > { %v449_v8 = vcombine.low %v397_v32, %v399_v7  ;;  %v450_v11 = vcombine.low %v438_v6, %v440_v10  ;;  %v401_v14 = vpop.f32.mrb[6].mxu0  ;;  %v442_v12 = vpop.f32.mrb[6].mxu1 }
 0x21c   : > { %v402_v13 = vpop.f32.mrb[7].mxu0  ;;  %v443_v15 = vpop.f32.mrb[7].mxu1 }
 0x21d   : > { %v457_v16 = vrot.slane %v449_v8, %v1417_v9  ;;  %v464_v2 = vrot.slane %v450_v11, %v1417_v9 }
 0x21f   : > { %v465_v18 = vcombine.low %v457_v16, %v464_v2 }
 0x221   : > { %v467_v4 = vadd.f32 %v876_v33, %v465_v18 }
 0x223   : > { %v877_v34 = vmul.f32 -1.442695, %v467_v4  ;;  %v475_v17 = vrot.slane %v467_v4, 2  ;;  %v486_v19 = vrot.slane %v467_v4, 6  ;;  %v483_v32 = vrot.slane %v467_v4, 4 }
 0x225   : > { %952 = vpow2.f32 %v877_v34  ;;  %v878_v35 = vmul.f32 -1.442695, %v475_v17  ;;  %v879_v20 = vmul.f32 -1.442695, %v486_v19 }
 0x227   : > { %954 = vpow2.f32 %v878_v35 }
 0x228   : > { %956 = vpow2.f32 %v879_v20 }
 0x22f   : > { %v953_v21 = vpop.eup %952 }
 0x230   : > { %v471_v6 = vadd.f32 1.0, %v953_v21 }
 0x231   : > { %v955_v7 = vpop.eup %954 }
 0x232   : > { %958 = vrcp.f32 %v471_v6  ;;  %v480_v10 = vadd.f32 1.0, %v955_v7  ;;  %v957_v8 = vpop.eup %956 }
 0x233   : > { %960 = vtanh.f32 %v483_v32  ;;  %v491_v13 = vadd.f32 1.0, %v957_v8 }
 0x234   : > { %962 = vrcp.f32 %v480_v10 }
 0x235   : > { %964 = vrcp.f32 %v491_v13 }
 0x23c   : > { %v959_v11 = vpop.eup %958 }
 0x23d   : > { %v961_v14 = vpop.eup %960 }
 0x23e   : > { %v963_v12 = vpop.eup %962  ;;  %v495_v16 = vmul.f32 %v961_v14, %v959_v11 }
 0x23f   : > { %v494_v15 = vmul.f32 %v963_v12, %v1428_v5  ;;  %v965_v33 = vpop.eup %964 }
 0x241   : > { %v1476_v2 = vadd.f32 %v495_v16, %v494_v15 }
 0x243   : > { %966 = vtanh.f32 %v1476_v2 }
 0x24d   : > { %v967_v18 = vpop.eup %966 }
 0x24e   : > { %v498_v4 = vmul.f32 %v967_v18, %v965_v33  ;;  %v894_v33 = vld [vmem:[%s1422_s20 + $0x18] sm:$0xff] }
 0x250   : > { %882 = vst [vmem:[%s1435_s24 + $0x2] sm:$0x3] %v498_v4  ;;  %v507_v34 = vpack.c.bf16 %v498_v4, %v498_v4 }
 0x252   : > { %541 = vmatmul.mubr.bf16.vlgmr.msra.gmra.mrb[8].mxu0 %v507_v34  ;;  %582 = vmatmul.mubr.bf16.vlgmr.msra.gmra.mrb[8].mxu1 %v507_v34 }
 0x253   : > { %654 = vmatpush1.bf16.msra.mxu0 %v1226_v36  ;;  %695 = vmatpush1.bf16.msra.mxu1 %v1230_v37 }
 0x254   : > { %655 = vmatprep.subr.bf16.mxu0 %v1234_v38  ;;  %696 = vmatprep.subr.bf16.mxu1 %v1238_v39 }
 0x255   : > { %685 = vmatprep.mubr.bf16.mxu0 %v1599_v3  ;;  %726 = vmatprep.mubr.bf16.mxu1 %v1599_v3 }
 0x257   : > { %656 = vmatpush1.bf16.msra.mxu0 %v1246_v40  ;;  %697 = vmatpush1.bf16.msra.mxu1 %v1250_v41 }
 0x258   : > { %657 = vmatprep.subr.bf16.mxu0 %v1256_v42  ;;  %698 = vmatprep.subr.bf16.mxu1 %v1260_v43 }
 0x25b   : > { %658 = vmatpush1.bf16.msra.mxu0 %v1268_v45  ;;  %699 = vmatpush1.bf16.msra.mxu1 %v1272_v46 }
 0x25c   : > { %659 = vmatprep.subr.bf16.mxu0 %v1278_v47  ;;  %700 = vmatprep.subr.bf16.mxu1 %v1282_v48  ;;  %v885_v48 = vld [vmem:[%s1422_s20 + $0x10] sm:$0xff] }
 0x25f   : > { %660 = vmatpush1.bf16.msra.mxu0 %v1288_v49  ;;  %701 = vmatpush1.bf16.msra.mxu1 %v1292_v50 }
 0x260   : > { %661 = vmatprep.subr.bf16.mxu0 %v1298_v51  ;;  %702 = vmatprep.subr.bf16.mxu1 %v1302_v52 }
 0x263   : > { %662 = vmatpush1.bf16.msra.mxu0 %v1308_v53  ;;  %703 = vmatpush1.bf16.msra.mxu1 %v1312_v54 }
 0x264   : > { %663 = vmatprep.subr.bf16.mxu0 %v1318_v55  ;;  %704 = vmatprep.subr.bf16.mxu1 %v1322_v56 }
 0x267   : > { %664 = vmatpush1.bf16.msra.mxu0 %v1328_v57  ;;  %705 = vmatpush1.bf16.msra.mxu1 %v1332_v58 }
 0x268   : > { %665 = vmatprep.subr.bf16.mxu0 %v1338_v59  ;;  %706 = vmatprep.subr.bf16.mxu1 %v1342_v60 }
 0x26b   : > { %666 = vmatpush1.bf16.msra.mxu0 %v1348_v61  ;;  %707 = vmatpush1.bf16.msra.mxu1 %v1352_v62 }
 0x26c   : > { %667 = vmatprep.subr.bf16.mxu0 %v1358_v63  ;;  %708 = vmatprep.subr.bf16.mxu1 %v1362_v44 }
 0x26f   : > { %668 = vmatpush1.bf16.msra.mxu0 %v1368_v0  ;;  %709 = vmatpush1.bf16.msra.mxu1 %v1372_v1 }
 0x325   : > { %v542_v3 = vpop.f32.mrb[8].mxu0  ;;  %v583_v36 = vpop.f32.mrb[8].mxu1 }
 0x326   : > { %v544_v37 = vpop.f32.mrb[9].mxu0  ;;  %v585_v38 = vpop.f32.mrb[9].mxu1 }
 0x327   : > { %v594_v39 = vcombine.low %v542_v3, %v544_v37  ;;  %v595_v40 = vcombine.low %v583_v36, %v585_v38  ;;  %v546_v41 = vpop.f32.mrb[10].mxu0  ;;  %v587_v42 = vpop.f32.mrb[10].mxu1 }
 0x328   : > { %v547_v43 = vpop.f32.mrb[11].mxu0  ;;  %v588_v45 = vpop.f32.mrb[11].mxu1 }
 0x329   : > { %v602_v46 = vrot.slane %v594_v39, %v1417_v9  ;;  %v609_v47 = vrot.slane %v595_v40, %v1417_v9 }
 0x32b   : > { %v610_v44 = vcombine.low %v602_v46, %v609_v47 }
 0x32d   : > { %v612_v49 = vadd.f32 %v885_v48, %v610_v44 }
 0x32f   : > { %v886_v0 = vmul.f32 -1.442695, %v612_v49  ;;  %v620_v50 = vrot.slane %v612_v49, 2  ;;  %v631_v51 = vrot.slane %v612_v49, 6  ;;  %v628_v54 = vrot.slane %v612_v49, 4 }
 0x331   : > { %968 = vpow2.f32 %v886_v0  ;;  %v887_v1 = vmul.f32 -1.442695, %v620_v50  ;;  %v888_v52 = vmul.f32 -1.442695, %v631_v51 }
 0x333   : > { %970 = vpow2.f32 %v887_v1 }
 0x334   : > { %972 = vpow2.f32 %v888_v52 }
 0x33b   : > { %v969_v53 = vpop.eup %968 }
 0x33c   : > { %v616_v55 = vadd.f32 1.0, %v969_v53 }
 0x33d   : > { %v971_v56 = vpop.eup %970 }
 0x33e   : > { %974 = vrcp.f32 %v616_v55  ;;  %v625_v57 = vadd.f32 1.0, %v971_v56  ;;  %v973_v58 = vpop.eup %972 }
 0x33f   : > { %976 = vtanh.f32 %v628_v54  ;;  %v636_v62 = vadd.f32 1.0, %v973_v58 }
 0x340   : > { %978 = vrcp.f32 %v625_v57 }
 0x341   : > { %980 = vrcp.f32 %v636_v62 }
 0x348   : > { %v975_v59 = vpop.eup %974 }
 0x349   : > { %v977_v60 = vpop.eup %976 }
 0x34a   : > { %v979_v61 = vpop.eup %978  ;;  %v640_v5 = vmul.f32 %v977_v60, %v975_v59 }
 0x34b   : > { %v639_v63 = vmul.f32 %v979_v61, %v1476_v2  ;;  %v981_v35 = vpop.eup %980 }
 0x34d   : > { %v641_v17 = vadd.f32 %v640_v5, %v639_v63 }
 0x34f   : > { %982 = vtanh.f32 %v641_v17 }
 0x359   : > { %v983_v19 = vpop.eup %982 }
 0x35a   : > { %v643_v20 = vmul.f32 %v983_v19, %v981_v35 }
 0x35c   : > { %891 = vst [vmem:[%s1435_s24 + $0x4] sm:$0x3] %v643_v20  ;;  %v652_v21 = vpack.c.bf16 %v643_v20, %v643_v20 }
 0x35e   : > { %686 = vmatmul.mubr.bf16.vlgmr.msra.gmra.mrb[12].mxu0 %v652_v21  ;;  %727 = vmatmul.mubr.bf16.vlgmr.msra.gmra.mrb[12].mxu1 %v652_v21 }
 0x431   : > { %v687_v32 = vpop.f32.mrb[12].mxu0  ;;  %v728_v6 = vpop.f32.mrb[12].mxu1 }
 0x432   : > { %v689_v7 = vpop.f32.mrb[13].mxu0  ;;  %v730_v10 = vpop.f32.mrb[13].mxu1 }
 0x433   : > { %v739_v8 = vcombine.low %v687_v32, %v689_v7  ;;  %v740_v11 = vcombine.low %v728_v6, %v730_v10  ;;  %v691_v14 = vpop.f32.mrb[14].mxu0  ;;  %v732_v12 = vpop.f32.mrb[14].mxu1 }
 0x434   : > { %v692_v13 = vpop.f32.mrb[15].mxu0  ;;  %v733_v15 = vpop.f32.mrb[15].mxu1 }
 0x435   : > { %v747_v16 = vrot.slane %v739_v8, %v1417_v9  ;;  %v754_v2 = vrot.slane %v740_v11, %v1417_v9 }
 0x437   : > { %v755_v18 = vcombine.low %v747_v16, %v754_v2 }
 0x439   : > { %v757_v4 = vadd.f32 %v894_v33, %v755_v18 }
 0x43b   : > { %v895_v34 = vmul.f32 -1.442695, %v757_v4  ;;  %v765_v3 = vrot.slane %v757_v4, 2  ;;  %v776_v37 = vrot.slane %v757_v4, 6  ;;  %v773_v40 = vrot.slane %v757_v4, 4 }
 0x43d   : > { %984 = vpow2.f32 %v895_v34  ;;  %v896_v36 = vmul.f32 -1.442695, %v765_v3  ;;  %v897_v38 = vmul.f32 -1.442695, %v776_v37 }
 0x43f   : > { %986 = vpow2.f32 %v896_v36 }
 0x440   : > { %988 = vpow2.f32 %v897_v38 }
 0x447   : > { %v985_v39 = vpop.eup %984 }
 0x448   : > { %v761_v41 = vadd.f32 1.0, %v985_v39 }
 0x449   : > { %v987_v42 = vpop.eup %986 }
 0x44a   : > { %990 = vrcp.f32 %v761_v41  ;;  %v770_v43 = vadd.f32 1.0, %v987_v42  ;;  %v989_v9 = vpop.eup %988 }
 0x44b   : > { %992 = vtanh.f32 %v773_v40  ;;  %v781_v48 = vadd.f32 1.0, %v989_v9 }
 0x44c   : > { %994 = vrcp.f32 %v770_v43 }
 0x44d   : > { %996 = vrcp.f32 %v781_v48 }
 0x454   : > { %v991_v45 = vpop.eup %990 }
 0x455   : > { %v993_v46 = vpop.eup %992 }
 0x456   : > { %v995_v47 = vpop.eup %994  ;;  %v785_v49 = vmul.f32 %v993_v46, %v991_v45 }
 0x457   : > { %v784_v44 = vmul.f32 %v995_v47, %v641_v17  ;;  %v997_v0 = vpop.eup %996 }
 0x459   : > { %v786_v32 = vadd.f32 %v785_v49, %v784_v44  }
 0x45b   : > { %998 = vtanh.f32 %v786_v32 }
 0x462   :  { %48 = sbr.rel (!%p46_p0) target bundleno = 16 (0x10), region = 43 }
 0x465   : > { %v999_v50 = vpop.eup %998 }
 0x466   : > { %v788_v33 = vmul.f32 %v999_v50, %v997_v0  }
 0x468   : > { %900 = vst [vmem:[%s1435_s24 + $0x6] sm:$0x3] %v788_v33 }

// kernel: sharnn_forward.15
= control target key start
LH: loop header
LB: loop body
LE: loop exit
PB: predicated region body
PF: predicated region fallthrough
CT: control target
= control target key end

     0   :  { %s516_s0 = inlined_call_operand.vmem [shape: f32[16,128], index: 0, kind: input, shape index: {}]   ;;  %s517_s1 = inlined_call_operand.vmem [shape: f32[1,128], index: 1, kind: input, shape index: {}]   ;;  %s518_s2 = inlined_call_operand.vmem [shape: f32[1,128], index: 2, kind: input, shape index: {}]   ;;  %s519_s3 = inlined_call_operand.vmem [shape: f32[1,128], index: 3, kind: input, shape index: {}]   ;;  %s520_s4 = inlined_call_operand.vmem [shape: f32[1,128], index: 4, kind: input, shape index: {}]   ;;  %s521_s5 = inlined_call_operand.vmem [shape: bf16[128,256], index: 5, kind: input, shape index: {}]   ;;  %s522_s6 = inlined_call_operand.vmem [shape: f32[1,256], index: 6, kind: input, shape index: {}]   ;;  %s523_s7 = inlined_call_operand.hbm [shape: f32[16,128], index: 7, kind: output, shape index: {}]  }
   0x1   :  { %v28_v0 = vld [vmem:[%s516_s0] sm:$0xff]  ;;  %v29_v1 = vld [vmem:[%s516_s0 + $0x8] sm:$0xff] }
   0x2   :  { %30 = vadd.xlane.f32.xlu0 %v28_v0 }
   0x6   :  { %32 = vadd.xlane.f32.xlu0 %v29_v1 }
   0x7   :  { %12 = vsyncpa [#allocation3], 0  ;;  %v323_v2 = vld [vmem:[%s521_s5 + $0x4] ss:$8 sps:$4 sm:$0xff]   ;;  %v325_v3 = vld [vmem:[%s521_s5] ss:$8 sps:$4 sm:$0xff]   ;;  %v108_v44 = vlaneseq }
   0x8   :  { %v326_v4 = vld [vmem:[%s521_s5 + $0x14] ss:$8 sps:$4 sm:$0xff]   ;;  %198 = vmatprep.subr.bf16.mxu0 %v323_v2  ;;  %v328_v13 = vld [vmem:[%s521_s5 + $0x10] ss:$8 sps:$4 sm:$0xff]   ;;  %v329_v14 = vld [vmem:[%s521_s5 + $0x24] ss:$8 sps:$4 sm:$0xff]  }
   0x9   :  { %199 = vmatpush1.bf16.msra.mxu0 %v325_v3  ;;  %v331_v15 = vld [vmem:[%s521_s5 + $0x20] ss:$8 sps:$4 sm:$0xff]   ;;  %v332_v16 = vld [vmem:[%s521_s5 + $0x34] ss:$8 sps:$4 sm:$0xff]   ;;  %v334_v17 = vld [vmem:[%s521_s5 + $0x30] ss:$8 sps:$4 sm:$0xff]  }
   0xa   :  { %200 = vmatprep.subr.bf16.mxu0 %v326_v4  ;;  %v335_v18 = vld [vmem:[%s521_s5 + $0x44] ss:$8 sps:$4 sm:$0xff]   ;;  %v337_v19 = vld [vmem:[%s521_s5 + $0x40] ss:$8 sps:$4 sm:$0xff]   ;;  %v338_v20 = vld [vmem:[%s521_s5 + $0x54] ss:$8 sps:$4 sm:$0xff]  }
   0xb   :  { %v391_v21 = vmov 0   ;;  %v340_v22 = vld [vmem:[%s521_s5 + $0x50] ss:$8 sps:$4 sm:$0xff]   ;;  %v341_v23 = vld [vmem:[%s521_s5 + $0x64] ss:$8 sps:$4 sm:$0xff]   ;;  %v109_v45 = vshrl.u32 %v108_v44, 7 }
   0xc   :  { %230 = vmatprep.mubr.bf16.mxu0 %v391_v21  ;;  %v343_v24 = vld [vmem:[%s521_s5 + $0x60] ss:$8 sps:$4 sm:$0xff]   ;;  %v344_v25 = vld [vmem:[%s521_s5 + $0x74] ss:$8 sps:$4 sm:$0xff]   ;;  %v346_v26 = vld [vmem:[%s521_s5 + $0x70] ss:$8 sps:$4 sm:$0xff]  }
   0xd   :  { %201 = vmatpush1.bf16.msra.mxu0 %v328_v13  ;;  %v297_v35 = vld [vmem:[%s519_s3] ss:$0 sm:$0xff]  ;;  %v110_v46 = vsub.s32 0, %v109_v45  ;;  %v114_v48 = vsub.s32 1, %v109_v45  ;;  %s392_s18 = smov [#allocation2]  }
   0xe   :  { %202 = vmatprep.subr.bf16.mxu0 %v329_v14  ;;  %v298_v39 = vld [vmem:[%s520_s4] ss:$0 sm:$0xff]  ;;  %s284_s19 = sshll.u32 %s392_s18, 4  ;;  %s285_s19 = int_to_ptr.vmem [resolvable:$true] %s284_s19 }
   0xf   :  { %v106_v47 = vld [vmem:[%s522_s6] sm:$0x3]  ;;  %p372_p1 = scmp.lt.s32.totalorder %s285_s19, %s285_s19 }
  0x10   :  { %v111_v49 = vrot.slane %v106_v47, %v110_v46  ;;  %v115_v50 = vrot.slane %v106_v47, %v114_v48 }
  0x11   :  { %203 = vmatpush1.bf16.msra.mxu0 %v331_v15 }
  0x12   :  { %204 = vmatprep.subr.bf16.mxu0 %v332_v16  ;;  %v296_v16 = vld [vmem:[%s518_s2] ss:$0 sm:$0xff] }
  0x15   :  { %205 = vmatpush1.bf16.msra.mxu0 %v334_v17 }
  0x16   :  { %206 = vmatprep.subr.bf16.mxu0 %v335_v18 }
  0x19   :  { %207 = vmatpush1.bf16.msra.mxu0 %v337_v19 }
  0x1a   :  { %208 = vmatprep.subr.bf16.mxu0 %v338_v20 }
  0x1d   :  { %209 = vmatpush1.bf16.msra.mxu0 %v340_v22 }
  0x1e   :  { %210 = vmatprep.subr.bf16.mxu0 %v341_v23 }
  0x21   :  { %211 = vmatpush1.bf16.msra.mxu0 %v343_v24 }
  0x22   :  { %212 = vmatprep.subr.bf16.mxu0 %v344_v25 }
  0x25   :  { %213 = vmatpush1.bf16.msra.mxu0 %v346_v26 }
  0x8f   :  { %v31_v5 = vpop.xlane.xlu0 %30 }
  0x90   :  { %v35_v6 = vmul.f32 0.0078125, %v31_v5 }
  0x92   :  { %v37_v7 = vsub.f32 %v28_v0, %v35_v6 }
  0x93   :  { %v33_v8 = vpop.xlane.xlu0 %32 }
  0x94   :  { %v36_v9 = vmul.f32 0.0078125, %v33_v8  ;;  %v39_v10 = vmul.f32 %v37_v7, %v37_v7 }
  0x96   :  { %v38_v11 = vsub.f32 %v29_v1, %v36_v9  ;;  %41 = vadd.xlane.f32.xlu1 %v39_v10 }
  0x98   :  { %v40_v12 = vmul.f32 %v38_v11, %v38_v11 }
  0x9a   :  { %43 = vadd.xlane.f32.xlu1 %v40_v12 }
 0x123   :  { %v42_v27 = vpop.xlane.xlu1 %41 }
 0x124   :  { %v45_v28 = vmul.f32 0.0078125, %v42_v27 }
 0x126   :  { %v47_v29 = vadd.f32 1e-12, %v45_v28 }
 0x127   :  { %v44_v30 = vpop.xlane.xlu1 %43 }
 0x128   :  { %347 = vrsqrt.f32 %v47_v29  ;;  %v46_v31 = vmul.f32 0.0078125, %v44_v30 }
 0x12a   :  { %v48_v32 = vadd.f32 1e-12, %v46_v31 }
 0x12c   :  { %349 = vrsqrt.f32 %v48_v32 }
 0x132   :  { %v348_v33 = vpop.eup %347 }
 0x133   :  { %v51_v34 = vmul.f32 %v348_v33, %v37_v7 }
 0x135   :  { %v78_v38 = vmul.f32 %v297_v35, %v51_v34 }
 0x136   :  { %v350_v36 = vpop.eup %349 }
 0x137   :  { %v52_v37 = vmul.f32 %v350_v36, %v38_v11  ;;  %v87_v41 = vadd.f32 %v298_v39, %v78_v38  ;;  %v295_v11 = vld [vmem:[%s517_s1] ss:$0 sm:$0xff]  ;;  %s367_s1 = scalar_lea.vmem %s285_s19, 256 }
 0x138   :  { %v60_v13 = vmul.f32 %v295_v11, %v51_v34  ;;  %p368_p0 = scmp.ne.s32.totalorder %s285_s19, %s367_s1  ;;  %p373_p2 = scmp.lt.s32.totalorder %s367_s1, %s367_s1 }
 0x139   :  { %v79_v40 = vmul.f32 %v297_v35, %v52_v37  ;;  %v61_v19 = vmul.f32 %v295_v11, %v52_v37 }
 0x13a   :  { %v69_v22 = vadd.f32 %v296_v16, %v60_v13  ;;  %p374_p3 = por %p373_p2, %p372_p1 }
 0x13b   :  { %v88_v42 = vadd.f32 %v298_v39, %v79_v40  ;;  %v70_v26 = vadd.f32 %v296_v16, %v61_v19 }
 0x13c   :  { %p375_p4 = pnand %p374_p3, %p368_p0 }
 0x13d   :  { %v89_v43 = vpack.c.bf16 %v88_v42, %v87_v41 }
 0x13f   :  { %231 = vmatmul.mubr.bf16.vlgmr.msra.gmra.mrb[0].mxu0 %v89_v43 }
 0x212   :  { %v232_v51 = vpop.f32.mrb[0].mxu0 }
 0x213   :  { %v233_v52 = vadd.f32 %v232_v51, %v111_v49  ;;  %v234_v53 = vpop.f32.mrb[1].mxu0 }
 0x214   :  { %v235_v54 = vadd.f32 %v234_v53, %v115_v50  ;;  %v236_v55 = vpop.f32.mrb[2].mxu0 }
 0x215   :  { %v315_v56 = vmul.f32 -1.702, %v233_v52  ;;  %v237_v57 = vadd.f32 %v236_v55, %v111_v49  ;;  %v238_v58 = vpop.f32.mrb[3].mxu0 }
 0x216   :  { %v316_v59 = vmul.f32 -1.702, %v235_v54  ;;  %v239_v60 = vadd.f32 %v238_v58, %v115_v50 }
 0x217   :  { %v249_v61 = vmul.f32 1.442695, %v315_v56  ;;  %v317_v62 = vmul.f32 -1.702, %v237_v57 }
 0x218   :  { %v251_v63 = vmul.f32 1.442695, %v316_v59  ;;  %v318_v0 = vmul.f32 -1.702, %v239_v60 }
 0x219   :  { %351 = vpow2.f32 %v249_v61  ;;  %v253_v1 = vmul.f32 1.442695, %v317_v62 }
 0x21a   :  { %353 = vpow2.f32 %v251_v63  ;;  %v255_v2 = vmul.f32 1.442695, %v318_v0 }
 0x21b   :  { %355 = vpow2.f32 %v253_v1 }
 0x21c   :  { %357 = vpow2.f32 %v255_v2 }
 0x223   :  { %v352_v3 = vpop.eup %351 }
 0x224   :  { %v354_v4 = vpop.eup %353  ;;  %v257_v5 = vadd.f32 1.0, %v352_v3 }
 0x225   :  { %v356_v6 = vpop.eup %355  ;;  %v258_v7 = vadd.f32 1.0, %v354_v4 }
 0x226   :  { %v358_v8 = vpop.eup %357  ;;  %359 = vrcp.f32 %v257_v5  ;;  %v259_v9 = vadd.f32 1.0, %v356_v6 }
 0x227   :  { %361 = vrcp.f32 %v258_v7  ;;  %v260_v10 = vadd.f32 1.0, %v358_v8 }
 0x228   :  { %363 = vrcp.f32 %v259_v9 }
 0x229   :  { %365 = vrcp.f32 %v260_v10 }
 0x230   :  { %v360_v12 = vpop.eup %359 }
 0x231   :  { %v362_v14 = vpop.eup %361  ;;  %v269_v15 = vmul.f32 %v360_v12, %v233_v52 }
 0x232   :  { %v364_v17 = vpop.eup %363  ;;  %v270_v18 = vmul.f32 %v362_v14, %v235_v54 }
 0x233   :  { %v366_v20 = vpop.eup %365  ;;  %v271_v21 = vmul.f32 %v364_v17, %v237_v57 }
 0x234   :  { %v273_v23 = vadd.f32 %v270_v18, %v269_v15  ;;  %v272_v24 = vmul.f32 %v366_v20, %v239_v60 }
 0x236   :  { %v275_v25 = vadd.f32 %v273_v23, %v69_v22  ;;  %v274_v27 = vadd.f32 %v272_v24, %v271_v21 }
 0x238   :  { %277 = vst [vmem:[#allocation2] sm:$0xff] %v275_v25  ;;  %v276_v28 = vadd.f32 %v274_v27, %v70_v26 }
 0x23a   :  { %278 = vst [vmem:[#allocation2 + $0x8] sm:$0xff] %v276_v28 }
 0x23b   :  { %378 = shalt.err (!%p375_p4)
}
 0x23c   :  { %s379_s21 = scalar_lea.hbm %s523_s7, 256 }
 0x23d   :  { %p380_p5 = scmp.ne.s32.totalorder %s523_s7, %s379_s21  ;;  %p383_p6 = scmp.lt.u32.totalorder %s379_s21, %s523_s7 }
 0x23f   :  { %p385_p7 = pnand %p383_p6, %p380_p5 }
 0x241   :  { %388 = shalt.err (!%p385_p7)
}
 0x242   :  { %s393_s26 = smov 128   ;;  %s394_s27 = smov 8  }
 0x243   :  { %290 = dma.vmem_to_hbm [thread:$0]  %s285_s19, 256, %s523_s7, [#allocation3], %s393_s26, %s393_s26, %s394_s27  }
 0x244   :  { %389 = dma.done.wait [#allocation3], 256  }
 0x245   :  { %390 = vsyncadd [#allocation3], 4294967040 }
 0x246   :  { %294 = vsyncpa [#allocation3], 1 }

// kernel: sharnn_forward.11
= control target key start
LH: loop header
LB: loop body
LE: loop exit
PB: predicated region body
PF: predicated region fallthrough
CT: control target
= control target key end

     0   :  { %v4946_v60 = vmov 1983009808   ;;  %v5863_v62 = vlaneseq  ;;  %vm4950_vm0 = vmmov 0   ;;  %vm21_vm1 = vcmask 7168   ;;  %s5859_s1 = inlined_call_operand.vmem [shape: f32[8,2,128], index: 1, kind: input, shape index: {}]   ;;  %s5860_s0 = inlined_call_operand.vmem [shape: f32[8,2,128], index: 0, kind: input, shape index: {}]   ;;  %s5861_s2 = inlined_call_operand.vmem [shape: f32[8,2,128], index: 2, kind: input, shape index: {}]   ;;  %s5862_s3 = inlined_call_operand.vmem [shape: f32[2,8,128], index: 3, kind: output, shape index: {}]  }
   0x1   :  { %v51_v0 = vld [vmem:[%s5859_s1 + $0x4] sm:$0x3]  ;;  %v49_v1 = vld [vmem:[%s5859_s1] sm:$0x3]  ;;  %v52_v4 = vld [vmem:[%s5859_s1 + $0x6] sm:$0x3]  ;;  %v67_v61 = vunpack.c.l.s4 %v4946_v60 }
   0x2   :  { %v59_v2 = vpack.c.bf16 %v51_v0, %v51_v0  ;;  %v57_v3 = vpack.c.bf16 %v49_v1, %v49_v1  ;;  %v50_v5 = vld [vmem:[%s5859_s1 + $0x2] sm:$0x3]  ;;  %v60_v6 = vpack.c.bf16 %v52_v4, %v52_v4  ;;  %v54_v8 = vld [vmem:[%s5859_s1 + $0xa] sm:$0x3]  ;;  %v53_v9 = vld [vmem:[%s5859_s1 + $0x8] sm:$0x3] }
   0x3   :  { %v58_v7 = vpack.c.bf16 %v50_v5, %v50_v5  ;;  %v62_v10 = vpack.c.bf16 %v54_v8, %v54_v8  ;;  %v61_v11 = vpack.c.bf16 %v53_v9, %v53_v9  ;;  %v56_v12 = vld [vmem:[%s5859_s1 + $0xe] sm:$0x3]  ;;  %v55_v13 = vld [vmem:[%s5859_s1 + $0xc] sm:$0x3]  ;;  %v68_v1 = vunpack.c.0.s8 %v67_v61 }
   0x4   :  { %153 = vxpose.xlu1.c.b16.start.end [1/1] (short) %v59_v2, 128  ;;  %121 = vxpose.xlu0.c.b16.start.end [1/1] (short) %v57_v3, 128  ;;  %v64_v14 = vpack.c.bf16 %v56_v12, %v56_v12  ;;  %v63_v15 = vpack.c.bf16 %v55_v13, %v55_v13  ;;  %v5081_v2 = vshrl.u32 %v5863_v62, 7  ;;  %vm4584_vm3 = vcmask 64512  }
   0x5   :  { %vm4705_vm4 = vcmask 1043456  }
   0x6   :  { %v5089_v12 = vsub.s32 %v68_v1, %v5081_v2 }
  0x21   :  { %169 = vxpose.xlu1.c.b16.start.end [1/1] (short) %v60_v6, 128  ;;  %137 = vxpose.xlu0.c.b16.start.end [1/1] (short) %v58_v7, 128  ;;  %v4947_v7 = vmov 1934713408  }
  0x22   :  { %v83_v8 = vunpack.c.l.s4 %v4947_v7 }
  0x24   :  { %v84_v62 = vunpack.c.0.s8 %v83_v8 }
  0x3e   :  { %201 = vxpose.xlu1.c.b16.start.end [1/1] (short) %v62_v10, 128  ;;  %185 = vxpose.xlu0.c.b16.start.end [1/1] (short) %v61_v11, 128 }
  0x5b   :  { %233 = vxpose.xlu1.c.b16.start.end [1/1] (short) %v64_v14, 128  ;;  %217 = vxpose.xlu0.c.b16.start.end [1/1] (short) %v63_v15, 128 }
  0x6a   :  { %v4996_v16 = vpop.trf.xlu1  ;;  %v4998_v17 = vpop.trf.xlu0 }
  0x6b   :  { %v253_v13 = vshrl.u32 %v4998_v17, 16 }
  0x6e   :  { %v5000_v18 = vpop.trf.xlu1  ;;  %v5002_v19 = vpop.trf.xlu0 }
  0x72   :  { %v5004_v20 = vpop.trf.xlu1  ;;  %v5006_v21 = vpop.trf.xlu0 }
  0x76   :  { %v5008_v22 = vpop.trf.xlu1  ;;  %v5010_v23 = vpop.trf.xlu0 }
  0x7a   :  { %v5012_v24 = vpop.trf.xlu1  ;;  %v5014_v25 = vpop.trf.xlu0 }
  0x7e   :  { %v5016_v26 = vpop.trf.xlu1  ;;  %v5018_v27 = vpop.trf.xlu0 }
  0x82   :  { %v5020_v28 = vpop.trf.xlu1  ;;  %v5022_v29 = vpop.trf.xlu0 }
  0x86   :  { %v5024_v30 = vpop.trf.xlu1  ;;  %v5026_v31 = vpop.trf.xlu0 }
  0x87   :  { %5871 = vst [vmem:[#allocation5_spill] sm:$0xff] %v5024_v30  ;;  %5872 = vst [vmem:[#allocation6_spill] sm:$0xff] %v5026_v31 }
  0x8a   :  { %v177_v32 = vpop.trf.xlu1  ;;  %v145_v33 = vpop.trf.xlu0 }
  0x8b   :  { %v254_v10 = vshrl.u32 %v145_v33, 16  ;;  %v251_v11 = vpack.i.b16 %v145_v33, %v4998_v17  ;;  %v262_v14 = vshrl.u32 %v177_v32, 16  ;;  %v5095_v17 = vsub.s32 %v84_v62, %v5081_v2 }
  0x8e   :  { %v5028_v34 = vpop.trf.xlu1  ;;  %v5030_v35 = vpop.trf.xlu0 }
  0x92   :  { %v5032_v36 = vpop.trf.xlu1  ;;  %v5034_v37 = vpop.trf.xlu0 }
  0x96   :  { %v5036_v38 = vpop.trf.xlu1  ;;  %v5038_v39 = vpop.trf.xlu0 }
  0x9a   :  { %v5040_v40 = vpop.trf.xlu1  ;;  %v5042_v41 = vpop.trf.xlu0 }
  0x9e   :  { %v5044_v42 = vpop.trf.xlu1  ;;  %v5046_v43 = vpop.trf.xlu0 }
  0xa2   :  { %v5048_v44 = vpop.trf.xlu1  ;;  %v5050_v45 = vpop.trf.xlu0 }
  0xa3   :  { %5873 = vst [vmem:[#allocation7_spill] sm:$0xff] %v5050_v45 }
  0xa6   :  { %v5052_v46 = vpop.trf.xlu1  ;;  %v5054_v47 = vpop.trf.xlu0 }
  0xa7   :  { %5874 = vst [vmem:[#allocation8_spill] sm:$0xff] %v5052_v46  ;;  %5875 = vst [vmem:[#allocation9_spill] sm:$0xff] %v5054_v47  ;;  %v259_v47 = vpack.i.b16 %v177_v32, %v4996_v16 }
  0xaa   :  { %v209_v48 = vpop.trf.xlu1  ;;  %v193_v49 = vpop.trf.xlu0 }
  0xab   :  { %v270_v3 = vshrl.u32 %v209_v48, 16  ;;  %v269_v4 = vshrl.u32 %v193_v49, 16  ;;  %v267_v9 = vpack.i.b16 %v209_v48, %v193_v49  ;;  %v261_v48 = vshrl.u32 %v4996_v16, 16 }
  0xac   :  { %v255_v49 = vpack.i.b16 %v254_v10, %v253_v13 }
  0xad   :  { %v271_v15 = vpack.i.b16 %v270_v3, %v269_v4  ;;  %v505_v31 = vcombine.low %v251_v11, %v267_v9  ;;  %v263_v46 = vpack.i.b16 %v262_v14, %v261_v48  ;;  %v4948_v14 = vmov 0  }
  0xae   :  { %v5056_v50 = vpop.trf.xlu1  ;;  %v5058_v51 = vpop.trf.xlu0 }
  0xaf   :  { %v573_v30 = vcombine.low %v255_v49, %v271_v15  ;;  %v513_v3 = vrot.slane %v505_v31, %v5089_v12  ;;  %v506_v31 = vcombine.high %v251_v11, %v267_v9 }
  0xb1   :  { %v581_v45 = vrot.slane %v573_v30, %v5089_v12 }
  0xb2   :  { %v5060_v52 = vpop.trf.xlu1  ;;  %v5062_v53 = vpop.trf.xlu0 }
  0xb6   :  { %v5064_v54 = vpop.trf.xlu1  ;;  %v5066_v55 = vpop.trf.xlu0 }
  0xba   :  { %v5068_v56 = vpop.trf.xlu1  ;;  %v5070_v57 = vpop.trf.xlu0 }
  0xbe   :  { %v5072_v58 = vpop.trf.xlu1  ;;  %v5074_v59 = vpop.trf.xlu0 }
  0xc2   :  { %v5076_v63 = vpop.trf.xlu1  ;;  %v5078_v0 = vpop.trf.xlu0 }
  0xc6   :  { %v5083_v5 = vpop.trf.xlu1  ;;  %v5085_v6 = vpop.trf.xlu0 }
  0xc7   :  { %5876 = vst [vmem:[#allocation10_spill] sm:$0xff] %v5083_v5  ;;  %5877 = vst [vmem:[#allocation11_spill] sm:$0xff] %v5085_v6 }
  0xca   :  { %v241_v60 = vpop.trf.xlu1  ;;  %v225_v61 = vpop.trf.xlu0 }
  0xcb   :  { %v278_v6 = vshrl.u32 %v241_v60, 16  ;;  %v275_v5 = vpack.i.b16 %v241_v60, %v225_v61  ;;  %v277_v7 = vshrl.u32 %v225_v61, 16 }
  0xcd   :  { %v521_v33 = vcombine.low %v259_v47, %v275_v5  ;;  %v279_v1 = vpack.i.b16 %v278_v6, %v277_v7  ;;  %v522_v13 = vcombine.high %v259_v47, %v275_v5  ;;  %v520_v47 = vrot.slane %v506_v31, %v5089_v12 }
  0xce   :  { %v226_v9 = vpop.trf.xlu0  ;;  %v299_v31 = vpack.i.b16 %v5056_v50, %v5058_v51 }
  0xcf   :  { %v529_v4 = vrot.slane %v521_v33, %v5089_v12  ;;  %v589_v8 = vcombine.low %v263_v46, %v279_v1  ;;  %v590_v30 = vcombine.high %v263_v46, %v279_v1  ;;  %v309_v1 = vshrl.u32 %v226_v9, 16 }
  0xd1   :  { %v537_v32 = vcombine.low %v513_v3, %v529_v4  ;;  %v597_v60 = vrot.slane %v589_v8, %v5089_v12  ;;  %v538_v61 = vcombine.high %v513_v3, %v529_v4  ;;  %v536_v8 = vrot.slane %v522_v13, %v5089_v12  ;;  %v242_v4 = vpop.trf.xlu1 }
  0xd2   :  { %v604_v3 = vrot.slane %v590_v30, %v5089_v12  ;;  %v310_v46 = vshrl.u32 %v242_v4, 16  ;;  %v302_v13 = vshrl.u32 %v5056_v50, 16 }
  0xd3   :  { %v545_v16 = vrot.slane %v537_v32, %v5095_v17  ;;  %v605_v10 = vcombine.low %v581_v45, %v597_v60  ;;  %v606_v7 = vcombine.high %v581_v45, %v597_v60  ;;  %v552_v33 = vrot.slane %v538_v61, %v5095_v17 }
  0xd4   :  { %v574_v32 = vcombine.high %v255_v49, %v271_v15  ;;  %v307_v60 = vpack.i.b16 %v242_v4, %v226_v9  ;;  %v291_v61 = vpack.i.b16 %v5028_v34, %v5000_v18  ;;  %v311_v30 = vpack.i.b16 %v310_v46, %v309_v1 }
  0xd5   :  { %1593 = vxpose.xlu0.c.b16.start.end [1/1] (short) (narrow) %v545_v16, 16  ;;  %v613_v6 = vrot.slane %v605_v10, %v5095_v17  ;;  %v569_v62 = vcombine.high %v545_v16, %v4948_v14  ;;  %v620_v5 = vrot.slane %v606_v7, %v5095_v17  ;;  %v570_v11 = vcombine.high %v552_v33, %v4948_v14 }
  0xd6   :  { %v553_v16 = vcombine.low %v520_v47, %v536_v8  ;;  %v588_v45 = vrot.slane %v574_v32, %v5089_v12  ;;  %v286_v7 = vshrl.u32 %v5030_v35, 16  ;;  %v283_v32 = vpack.i.b16 %v5030_v35, %v5002_v19 }
  0xd7   :  { %1609 = vxpose.xlu1.c.b16.start.end [1/1] (short) (narrow) %v613_v6, 16  ;;  %v637_v48 = vcombine.high %v613_v6, %v4948_v14  ;;  %v638_v15 = vcombine.high %v620_v5, %v4948_v14  ;;  %v294_v6 = vshrl.u32 %v5028_v34, 16  ;;  %v554_v9 = vcombine.high %v520_v47, %v536_v8 }
  0xd8   :  { %v621_v49 = vcombine.low %v588_v45, %v604_v3  ;;  %v561_v10 = vrot.slane %v553_v16, %v5095_v17  ;;  %v285_v34 = vshrl.u32 %v5002_v19, 16  ;;  %v641_v50 = vcombine.low %v283_v32, %v299_v31 }
  0xd9   :  { %1625 = vxpose.xlu0.c.b16.start.end [1/1] (short) (narrow) %v569_v62, 16  ;;  %v301_v62 = vshrl.u32 %v5058_v51, 16  ;;  %v622_v46 = vcombine.high %v588_v45, %v604_v3 }
  0xda   :  { %v571_v4 = vcombine.high %v561_v10, %v4948_v14  ;;  %v649_v8 = vrot.slane %v641_v50, %v5089_v12 }
  0xdb   :  { %1641 = vxpose.xlu1.c.b16.start.end [1/1] (short) (narrow) %v637_v48, 16  ;;  %v293_v48 = vshrl.u32 %v5000_v18, 16  ;;  %v303_v16 = vpack.i.b16 %v302_v13, %v301_v62  ;;  %v287_v18 = vpack.i.b16 %v286_v7, %v285_v34  ;;  %v636_v19 = vrot.slane %v622_v46, %v5095_v17 }
  0xdc   :  { %v658_v7 = vcombine.high %v291_v61, %v307_v60 }
  0xdd   :  { %1657 = vxpose.xlu0.c.b16.start.end [1/1] (short) (narrow) %v552_v33, 16  ;;  %v629_v33 = vrot.slane %v621_v49, %v5095_v17  ;;  %v709_v49 = vcombine.low %v287_v18, %v303_v16  ;;  %v640_v45 = vcombine.high %v636_v19, %v4948_v14 }
  0xde   :  { %v672_v46 = vrot.slane %v658_v7, %v5089_v12  ;;  %v318_v7 = vshrl.u32 %v5034_v37, 16 }
  0xdf   :  { %1673 = vxpose.xlu1.c.b16.start.end [1/1] (short) (narrow) %v620_v5, 16  ;;  %v657_v5 = vcombine.low %v291_v61, %v307_v60  ;;  %v639_v51 = vcombine.high %v629_v33, %v4948_v14  ;;  %v717_v3 = vrot.slane %v709_v49, %v5089_v12  ;;  %v4949_v60 = vmov 0.0  }
  0xe0   :  { %4874 = vmatprep.subr.bf16.mxu0 %v4949_v60  ;;  %4894 = vmatprep.subr.bf16.mxu1 %v4949_v60  ;;  %24 = vst.msk [vmem:[#allocation3] sm:$0xff] %vm21_vm1, %v4949_v60  ;;  %25 = vst.msk [vmem:[#allocation3 + $0x8] sm:$0xff] %vm21_vm1, %v4949_v60 }
  0xe1   :  { %1689 = vxpose.xlu0.c.b16.start.end [1/1] (short) (narrow) %v570_v11, 16  ;;  %v295_v11 = vpack.i.b16 %v294_v6, %v293_v48  ;;  %v665_v35 = vrot.slane %v657_v5, %v5089_v12  ;;  %4890 = vmatprep.mubr.msk.bf16.mxu0 %vm4950_vm0, %v4949_v60 }
  0xe2   :  { %4910 = vmatprep.mubr.msk.bf16.mxu1 %vm4950_vm0, %v4949_v60 }
  0xe3   :  { %1705 = vxpose.xlu1.c.b16.start.end [1/1] (short) (narrow) %v638_v15, 16  ;;  %v725_v1 = vcombine.low %v295_v11, %v311_v30  ;;  %v568_v15 = vrot.slane %v554_v9, %v5095_v17  ;;  %v673_v6 = vcombine.low %v649_v8, %v665_v35  ;;  %v674_v5 = vcombine.high %v649_v8, %v665_v35 }
  0xe4   :  { %v726_v50 = vcombine.high %v295_v11, %v311_v30  ;;  %v227_v30 = vpop.trf.xlu0 }
  0xe5   :  { %1721 = vxpose.xlu0.c.b16.start.end [1/1] (short) (narrow) %v561_v10, 16  ;;  %v733_v47 = vrot.slane %v725_v1, %v5089_v12  ;;  %v572_v10 = vcombine.high %v568_v15, %v4948_v14  ;;  %v681_v62 = vrot.slane %v673_v6, %v5095_v17  ;;  %v710_v1 = vcombine.high %v287_v18, %v303_v16 }
  0xe6   :  { %v341_v49 = vshrl.u32 %v227_v30, 16  ;;  %v326_v6 = vshrl.u32 %v5032_v36, 16 }
  0xe7   :  { %1737 = vxpose.xlu1.c.b16.start.end [1/1] (short) (narrow) %v629_v33, 16  ;;  %v741_v13 = vcombine.low %v717_v3, %v733_v47  ;;  %v705_v33 = vcombine.high %v681_v62, %v4948_v14  ;;  %v742_v34 = vcombine.high %v717_v3, %v733_v47  ;;  %v724_v16 = vrot.slane %v710_v1, %v5089_v12 }
  0xe8   :  { %v334_v3 = vshrl.u32 %v5060_v52, 16 }
  0xe9   :  { %1753 = vxpose.xlu0.c.b16.start.end [1/1] (short) (narrow) %v571_v4, 16  ;;  %v749_v48 = vrot.slane %v741_v13, %v5095_v17  ;;  %v642_v4 = vcombine.high %v283_v32, %v299_v31  ;;  %v756_v61 = vrot.slane %v742_v34, %v5095_v17  ;;  %v740_v31 = vrot.slane %v726_v50, %v5089_v12  ;;  %v243_v32 = vpop.trf.xlu1 }
  0xea   :  { %v342_v18 = vshrl.u32 %v243_v32, 16  ;;  %v339_v47 = vpack.i.b16 %v243_v32, %v227_v30  ;;  %v323_v13 = vpack.i.b16 %v5032_v36, %v5004_v20  ;;  %v317_v36 = vshrl.u32 %v5006_v21, 16 }
  0xeb   :  { %1769 = vxpose.xlu1.c.b16.start.end [1/1] (short) (narrow) %v639_v51, 16  ;;  %v773_v9 = vcombine.high %v749_v48, %v4948_v14  ;;  %v688_v51 = vrot.slane %v674_v5, %v5095_v17  ;;  %v774_v8 = vcombine.high %v756_v61, %v4948_v14 }
  0xed   :  { %1785 = vxpose.xlu0.c.b16.start.end [1/1] (short) (narrow) %v568_v15, 16  ;;  %v656_v15 = vrot.slane %v642_v4, %v5089_v12  ;;  %v706_v11 = vcombine.high %v688_v51, %v4948_v14  ;;  %v315_v4 = vpack.i.b16 %v5034_v37, %v5006_v21 }
  0xef   :  { %1801 = vxpose.xlu1.c.b16.start.end [1/1] (short) (narrow) %v636_v19, 16  ;;  %v689_v35 = vcombine.low %v656_v15, %v672_v46  ;;  %v757_v19 = vcombine.low %v724_v16, %v740_v31  ;;  %v690_v50 = vcombine.high %v656_v15, %v672_v46 }
  0xf1   :  { %1817 = vxpose.xlu0.c.b16.start.end [1/1] (short) (narrow) %v572_v10, 16  ;;  %v697_v10 = vrot.slane %v689_v35, %v5095_v17  ;;  %v765_v5 = vrot.slane %v757_v19, %v5095_v17  ;;  %v704_v30 = vrot.slane %v690_v50, %v5095_v17 }
  0xf3   :  { %1833 = vxpose.xlu1.c.b16.start.end [1/1] (short) (narrow) %v640_v45, 16  ;;  %v333_v45 = vshrl.u32 %v5062_v53, 16  ;;  %v707_v34 = vcombine.high %v697_v10, %v4948_v14  ;;  %v708_v35 = vcombine.high %v704_v30, %v4948_v14 }
  0xf5   :  { %1849 = vxpose.xlu0.c.b16.start.end [1/1] (short) (narrow) %v681_v62, 16  ;;  %v331_v62 = vpack.i.b16 %v5060_v52, %v5062_v53  ;;  %v335_v1 = vpack.i.b16 %v334_v3, %v333_v45  ;;  %v775_v53 = vcombine.high %v765_v5, %v4948_v14 }
  0xf7   :  { %1865 = vxpose.xlu1.c.b16.start.end [1/1] (short) (narrow) %v749_v48, 16  ;;  %v325_v48 = vshrl.u32 %v5004_v20, 16  ;;  %v777_v52 = vcombine.low %v315_v4, %v331_v62  ;;  %v319_v20 = vpack.i.b16 %v318_v7, %v317_v36  ;;  %v778_v45 = vcombine.high %v315_v4, %v331_v62  ;;  %v228_v62 = vpop.trf.xlu0 }
  0xf9   :  { %1881 = vxpose.xlu0.c.b16.start.end [1/1] (short) (narrow) %v705_v33, 16  ;;  %v343_v33 = vpack.i.b16 %v342_v18, %v341_v49  ;;  %v785_v46 = vrot.slane %v777_v52, %v5089_v12  ;;  %v846_v50 = vcombine.high %v319_v20, %v335_v1  ;;  %v792_v36 = vrot.slane %v778_v45, %v5089_v12  ;;  %v244_v52 = vpop.trf.xlu1 }
  0xfb   :  { %1897 = vxpose.xlu1.c.b16.start.end [1/1] (short) (narrow) %v773_v9, 16  ;;  %v793_v9 = vcombine.low %v323_v13, %v339_v47 }
  0xfd   :  { %1913 = vxpose.xlu0.c.b16.start.end [1/1] (short) (narrow) %v688_v51, 16  ;;  %v327_v51 = vpack.i.b16 %v326_v6, %v325_v48  ;;  %v801_v37 = vrot.slane %v793_v9, %v5089_v12 }
  0xff   :  { %1929 = vxpose.xlu1.c.b16.start.end [1/1] (short) (narrow) %v756_v61, 16  ;;  %v758_v61 = vcombine.high %v724_v16, %v740_v31  ;;  %v861_v32 = vcombine.low %v327_v51, %v343_v33  ;;  %v809_v18 = vcombine.low %v785_v46, %v801_v37  ;;  %v810_v3 = vcombine.high %v785_v46, %v801_v37 }
 0x100   :  { %v862_v48 = vcombine.high %v327_v51, %v343_v33  ;;  %v860_v51 = vrot.slane %v846_v50, %v5089_v12  ;;  %v358_v37 = vshrl.u32 %v5036_v38, 16  ;;  %v365_v46 = vshrl.u32 %v5066_v55, 16 }
 0x101   :  { %1945 = vxpose.xlu0.c.b16.start.end [1/1] (short) (narrow) %v706_v11, 16  ;;  %v845_v11 = vcombine.low %v319_v20, %v335_v1  ;;  %v772_v21 = vrot.slane %v758_v61, %v5095_v17  ;;  %v869_v15 = vrot.slane %v861_v32, %v5089_v12  ;;  %v373_v61 = vshrl.u32 %v228_v62, 16 }
 0x102   :  { %v5187_v32 = vpack.i.b16 %v244_v52, %v228_v62 }
 0x103   :  { %1961 = vxpose.xlu1.c.b16.start.end [1/1] (short) (narrow) %v774_v8, 16  ;;  %v853_v31 = vrot.slane %v845_v11, %v5089_v12  ;;  %v776_v16 = vcombine.high %v772_v21, %v4948_v14  ;;  %v817_v8 = vrot.slane %v809_v18, %v5095_v17  ;;  %v366_v11 = vshrl.u32 %v5064_v54, 16 }
 0x104   :  { %v357_v18 = vshrl.u32 %v5008_v22, 16 }
 0x105   :  { %1977 = vxpose.xlu0.c.b16.start.end [1/1] (short) (narrow) %v697_v10, 16  ;;  %v877_v49 = vcombine.low %v853_v31, %v869_v15  ;;  %v794_v10 = vcombine.high %v323_v13, %v339_v47  ;;  %v841_v6 = vcombine.high %v817_v8, %v4948_v14  ;;  %v876_v13 = vrot.slane %v862_v48, %v5089_v12 }
 0x107   :  { %1993 = vxpose.xlu1.c.b16.start.end [1/1] (short) (narrow) %v765_v5, 16  ;;  %v885_v19 = vrot.slane %v877_v49, %v5095_v17  ;;  %v878_v5 = vcombine.high %v853_v31, %v869_v15  ;;  %v808_v9 = vrot.slane %v794_v10, %v5089_v12  ;;  %v893_v20 = vcombine.low %v860_v51, %v876_v13 }
 0x108   :  { %v363_v15 = vpack.i.b16 %v5064_v54, %v5066_v55  ;;  %v350_v31 = vshrl.u32 %v5038_v39, 16  ;;  %v349_v54 = vshrl.u32 %v5010_v23, 16  ;;  %v359_v55 = vpack.i.b16 %v358_v37, %v357_v18 }
 0x109   :  { %2009 = vxpose.xlu0.c.b16.start.end [1/1] (short) (narrow) %v707_v34, 16  ;;  %v909_v7 = vcombine.high %v885_v19, %v4948_v14  ;;  %v824_v34 = vrot.slane %v810_v3, %v5095_v17  ;;  %v892_v47 = vrot.slane %v878_v5, %v5095_v17  ;;  %v825_v4 = vcombine.low %v792_v36, %v808_v9  ;;  %v5207_v3 = vpop.trf.xlu1 }
 0x10a   :  { %v901_v49 = vrot.slane %v893_v20, %v5095_v17  ;;  %v826_v10 = vcombine.high %v792_v36, %v808_v9  ;;  %v351_v45 = vpack.i.b16 %v350_v31, %v349_v54  ;;  %v894_v5 = vcombine.high %v860_v51, %v876_v13 }
 0x10b   :  { %2025 = vxpose.xlu1.c.b16.start.end [1/1] (short) (narrow) %v775_v53, 16  ;;  %v842_v33 = vcombine.high %v824_v34, %v4948_v14  ;;  %v374_v53 = vshrl.u32 %v244_v52, 16  ;;  %v910_v1 = vcombine.high %v892_v47, %v4948_v14 }
 0x10c   :  { %v840_v9 = vrot.slane %v826_v10, %v5095_v17 }
 0x10d   :  { %2041 = vxpose.xlu0.c.b16.start.end [1/1] (short) (narrow) %v704_v30, 16  ;;  %v833_v30 = vrot.slane %v825_v4, %v5095_v17  ;;  %v5215_v36 = vpop.trf.xlu1 }
 0x10e   :  { %v844_v62 = vcombine.high %v840_v9, %v4948_v14 }
 0x10f   :  { %2057 = vxpose.xlu1.c.b16.start.end [1/1] (short) (narrow) %v772_v21, 16  ;;  %v355_v21 = vpack.i.b16 %v5036_v38, %v5008_v22  ;;  %v843_v38 = vcombine.high %v833_v30, %v4948_v14 }
 0x111   :  { %2073 = vxpose.xlu0.c.b16.start.end [1/1] (short) (narrow) %v708_v35, 16  ;;  %v5197_v35 = vpop.trf.xlu0 }
 0x113   :  { %2089 = vxpose.xlu1.c.b16.start.end [1/1] (short) (narrow) %v776_v16, 16  ;;  %v375_v16 = vpack.i.b16 %v374_v53, %v373_v61 }
 0x115   :  { %2105 = vxpose.xlu0.c.b16.start.end [1/1] (short) (narrow) %v817_v8, 16  ;;  %v347_v8 = vpack.i.b16 %v5038_v39, %v5010_v23  ;;  %v997_v48 = vcombine.low %v359_v55, %v375_v16  ;;  %v998_v31 = vcombine.high %v359_v55, %v375_v16 }
 0x117   :  { %2121 = vxpose.xlu1.c.b16.start.end [1/1] (short) (narrow) %v885_v19, 16  ;;  %v929_v19 = vcombine.low %v355_v21, %v5187_v32  ;;  %v913_v22 = vcombine.low %v347_v8, %v363_v15  ;;  %v1005_v52 = vrot.slane %v997_v48, %v5089_v12  ;;  %v914_v18 = vcombine.high %v347_v8, %v363_v15 }
 0x118   :  { %v1012_v16 = vrot.slane %v998_v31, %v5089_v12 }
 0x119   :  { %2137 = vxpose.xlu0.c.b16.start.end [1/1] (short) (narrow) %v841_v6, 16  ;;  %v367_v6 = vpack.i.b16 %v366_v11, %v365_v46  ;;  %v937_v39 = vrot.slane %v929_v19, %v5089_v12  ;;  %v921_v23 = vrot.slane %v913_v22, %v5089_v12  ;;  %v928_v22 = vrot.slane %v914_v18, %v5089_v12 }
 0x11b   :  { %2153 = vxpose.xlu1.c.b16.start.end [1/1] (short) (narrow) %v909_v7, 16  ;;  %v911_v7 = vcombine.high %v901_v49, %v4948_v14  ;;  %v981_v50 = vcombine.low %v351_v45, %v367_v6  ;;  %v945_v13 = vcombine.low %v921_v23, %v937_v39  ;;  %v946_v46 = vcombine.high %v921_v23, %v937_v39 }
 0x11c   :  { %v5255_v23 = vpack.i.b16 %v5207_v3, %v5197_v35 }
 0x11d   :  { %2169 = vxpose.xlu0.c.b16.start.end [1/1] (short) (narrow) %v824_v34, 16  ;;  %v5211_v34 = vpop.trf.xlu0  ;;  %v953_v61 = vrot.slane %v945_v13, %v5095_v17  ;;  %v398_v13 = vshrl.u32 %v5068_v56, 16 }
 0x11f   :  { %2185 = vxpose.xlu1.c.b16.start.end [1/1] (short) (narrow) %v892_v47, 16  ;;  %v908_v47 = vrot.slane %v894_v5, %v5095_v17  ;;  %v977_v11 = vcombine.high %v953_v61, %v4948_v14 }
 0x121   :  { %2201 = vxpose.xlu0.c.b16.start.end [1/1] (short) (narrow) %v842_v33, 16  ;;  %v989_v33 = vrot.slane %v981_v50, %v5089_v12  ;;  %v5221_v4 = vpop.trf.xlu0  ;;  %v912_v51 = vcombine.high %v908_v47, %v4948_v14 }
 0x123   :  { %2217 = vxpose.xlu1.c.b16.start.end [1/1] (short) (narrow) %v910_v1, 16  ;;  %v1013_v53 = vcombine.low %v989_v33, %v1005_v52  ;;  %v5225_v1 = vpop.trf.xlu1 }
 0x125   :  { %2233 = vxpose.xlu0.c.b16.start.end [1/1] (short) (narrow) %v833_v30, 16  ;;  %v1021_v20 = vrot.slane %v1013_v53, %v5095_v17  ;;  %v930_v30 = vcombine.high %v355_v21, %v5187_v32  ;;  %v5229_v37 = vpop.trf.xlu0  ;;  %v960_v32 = vrot.slane %v946_v46, %v5095_v17  ;;  %v982_v21 = vcombine.high %v351_v45, %v367_v6 }
 0x126   :  { %v406_v6 = vshrl.u32 %v5207_v3, 16  ;;  %v405_v45 = vshrl.u32 %v5197_v35, 16  ;;  %v5267_v53 = vpack.i.b16 %v5068_v56, %v5070_v57  ;;  %v389_v35 = vshrl.u32 %v5012_v24, 16 }
 0x127   :  { %2249 = vxpose.xlu1.c.b16.start.end [1/1] (short) (narrow) %v901_v49, 16  ;;  %v5232_v49 = vpop.trf.xlu1  ;;  %v1045_v19 = vcombine.high %v1021_v20, %v4948_v14  ;;  %v944_v10 = vrot.slane %v930_v30, %v5089_v12  ;;  %v978_v55 = vcombine.high %v960_v32, %v4948_v14  ;;  %v996_v5 = vrot.slane %v982_v21, %v5089_v12 }
 0x128   :  { %v382_v3 = vshrl.u32 %v5042_v41, 16 }
 0x129   :  { %2265 = vxpose.xlu0.c.b16.start.end [1/1] (short) (narrow) %v843_v38, 16  ;;  %v1014_v38 = vcombine.high %v989_v33, %v1005_v52  ;;  %v1029_v50 = vcombine.low %v996_v5, %v1012_v16  ;;  %v397_v33 = vshrl.u32 %v5070_v57, 16  ;;  %v962_v57 = vcombine.high %v928_v22, %v944_v10 }
 0x12b   :  { %2281 = vxpose.xlu1.c.b16.start.end [1/1] (short) (narrow) %v911_v7, 16  ;;  %v1028_v15 = vrot.slane %v1014_v38, %v5095_v17  ;;  %v961_v7 = vcombine.low %v928_v22, %v944_v10  ;;  %v1037_v30 = vrot.slane %v1029_v50, %v5095_v17  ;;  %v5285_v31 = vpack.i.b16 %v398_v13, %v397_v33 }
 0x12c   :  { %v1030_v10 = vcombine.high %v996_v5, %v1012_v16 }
 0x12d   :  { %2297 = vxpose.xlu0.c.b16.start.end [1/1] (short) (narrow) %v840_v9, 16  ;;  %v1046_v9 = vcombine.high %v1028_v15, %v4948_v14  ;;  %v969_v52 = vrot.slane %v961_v7, %v5095_v17  ;;  %v1047_v21 = vcombine.high %v1037_v30, %v4948_v14 }
 0x12f   :  { %2313 = vxpose.xlu1.c.b16.start.end [1/1] (short) (narrow) %v908_v47, 16  ;;  %v979_v56 = vcombine.high %v969_v52, %v4948_v14 }
 0x131   :  { %2329 = vxpose.xlu0.c.b16.start.end [1/1] (short) (narrow) %v844_v62, 16  ;;  %v390_v62 = vshrl.u32 %v5040_v40, 16 }
 0x133   :  { %2345 = vxpose.xlu1.c.b16.start.end [1/1] (short) (narrow) %v912_v51, 16  ;;  %v387_v51 = vpack.i.b16 %v5040_v40, %v5012_v24  ;;  %v381_v24 = vshrl.u32 %v5014_v25, 16  ;;  %v5283_v18 = vpack.i.b16 %v390_v62, %v389_v35 }
 0x135   :  { %2361 = vxpose.xlu0.c.b16.start.end [1/1] (short) (narrow) %v953_v61, 16  ;;  %v5271_v61 = vpack.i.b16 %v406_v6, %v405_v45  ;;  %v1065_v40 = vcombine.low %v387_v51, %v5255_v23  ;;  %v5289_v38 = vpack.i.b16 %v382_v3, %v381_v24  ;;  %v1044_v45 = vrot.slane %v1030_v10, %v5095_v17 }
 0x137   :  { %2377 = vxpose.xlu1.c.b16.start.end [1/1] (short) (narrow) %v1021_v20, 16  ;;  %v1048_v13 = vcombine.high %v1044_v45, %v4948_v14 }
 0x139   :  { %2393 = vxpose.xlu0.c.b16.start.end [1/1] (short) (narrow) %v977_v11, 16  ;;  %v5278_v11 = vpack.i.b16 %v5042_v41, %v5014_v25  ;;  %v1133_v41 = vcombine.low %v5283_v18, %v5271_v61  ;;  %v1073_v25 = vrot.slane %v1065_v40, %v5089_v12  ;;  %v1066_v40 = vcombine.high %v387_v51, %v5255_v23 }
 0x13b   :  { %v5236_v54 = vpop.trf.xlu0  ;;  %2409 = vxpose.xlu1.c.b16.start.end [1/1] (short) (narrow) %v1045_v19, 16  ;;  %v1049_v19 = vcombine.low %v5278_v11, %v5267_v53  ;;  %v1050_v51 = vcombine.high %v5278_v11, %v5267_v53 }
 0x13d   :  { %2425 = vxpose.xlu0.c.b16.start.end [1/1] (short) (narrow) %v960_v32, 16  ;;  %v5240_v48 = vpop.trf.xlu1  ;;  %v1057_v7 = vrot.slane %v1049_v19, %v5089_v12 }
 0x13f   :  { %v5244_v8 = vpop.trf.xlu0  ;;  %2441 = vxpose.xlu1.c.b16.start.end [1/1] (short) (narrow) %v1028_v15, 16  ;;  %v976_v15 = vrot.slane %v962_v57, %v5095_v17  ;;  %v1081_v5 = vcombine.low %v1057_v7, %v1073_v25  ;;  %v1082_v23 = vcombine.high %v1057_v7, %v1073_v25 }
 0x141   :  { %2457 = vxpose.xlu0.c.b16.start.end [1/1] (short) (narrow) %v978_v55, 16  ;;  %v5250_v39 = vpop.trf.xlu1  ;;  %v1117_v55 = vcombine.low %v5289_v38, %v5285_v31  ;;  %v980_v16 = vcombine.high %v976_v15, %v4948_v14 }
 0x143   :  { %v5257_v47 = vpop.trf.xlu0  ;;  %2473 = vxpose.xlu1.c.b16.start.end [1/1] (short) (narrow) %v1046_v9, 16  ;;  %v1141_v9 = vrot.slane %v1133_v41, %v5089_v12 }
 0x145   :  { %2489 = vxpose.xlu0.c.b16.start.end [1/1] (short) (narrow) %v969_v52, 16  ;;  %v5273_v20 = vpop.trf.xlu1  ;;  %v1125_v52 = vrot.slane %v1117_v55, %v5089_v12 }
 0x147   :  { %v1697_v46 = vpop.trf.xlu0  ;;  %2505 = vxpose.xlu1.c.b16.start.end [1/1] (short) (narrow) %v1037_v30, 16  ;;  %v1149_v33 = vcombine.low %v1125_v52, %v1141_v9  ;;  %v1089_v30 = vrot.slane %v1081_v5, %v5095_v17  ;;  %v1150_v11 = vcombine.high %v1125_v52, %v1141_v9 }
 0x148   :  { %v3649_v35 = vcombine.low %v5244_v8, %v1697_v46 }
 0x149   :  { %2521 = vxpose.xlu0.c.b16.start.end [1/1] (short) (narrow) %v979_v56, 16  ;;  %v1713_v32 = vpop.trf.xlu1  ;;  %v3641_v56 = vcombine.low %v5236_v54, %v5257_v47  ;;  %v1157_v41 = vrot.slane %v1149_v33, %v5095_v17  ;;  %v1113_v10 = vcombine.high %v1089_v30, %v4948_v14  ;;  %v5318_v54 = vrot.slane %v1066_v40, %v5089_v12 }
 0x14a   :  { %v3698_v57 = vcombine.low %v5250_v39, %v1713_v32  ;;  %v3656_v8 = vrot.slane %v3649_v35, %v5089_v12  ;;  %v1134_v47 = vcombine.high %v5283_v18, %v5271_v61  ;;  %v1096_v61 = vrot.slane %v1082_v23, %v5095_v17 }
 0x14b   :  { %v1729_v22 = vpop.trf.xlu0  ;;  %2537 = vxpose.xlu1.c.b16.start.end [1/1] (short) (narrow) %v1047_v21, 16  ;;  %v3690_v21 = vcombine.low %v5240_v48, %v5273_v20  ;;  %v3648_v32 = vrot.slane %v3641_v56, %v5089_v12  ;;  %v1181_v53 = vcombine.high %v1157_v41, %v4948_v14  ;;  %v1118_v18 = vcombine.high %v5289_v38, %v5285_v31 }
 0x14c   :  { %v3705_v48 = vrot.slane %v3698_v57, %v5089_v12  ;;  %v5343_v35 = vrot.slane %v1134_v47, %v5089_v12  ;;  %v421_v23 = vshrl.u32 %v5016_v26, 16 }
 0x14d   :  { %2553 = vxpose.xlu0.c.b16.start.end [1/1] (short) (narrow) %v976_v15, 16  ;;  %v1745_v6 = vpop.trf.xlu1  ;;  %v3697_v55 = vrot.slane %v3690_v21, %v5089_v12  ;;  %v3673_v7 = vcombine.low %v3648_v32, %v3656_v8  ;;  %v1132_v56 = vrot.slane %v1118_v18, %v5089_v12  ;;  %v437_v21 = vshrl.u32 %v5211_v34, 16 }
 0x14f   :  { %v1761_v50 = vpop.trf.xlu0  ;;  %2569 = vxpose.xlu1.c.b16.start.end [1/1] (short) (narrow) %v1044_v45, 16  ;;  %v3722_v5 = vcombine.low %v3697_v55, %v3705_v48  ;;  %v3680_v40 = vrot.slane %v3673_v7, %v5095_v17  ;;  %v5370_v48 = vpack.i.b16 %v5044_v42, %v5016_v26  ;;  %v414_v26 = vshrl.u32 %v5046_v43, 16 }
 0x151   :  { %2585 = vxpose.xlu0.c.b16.start.end [1/1] (short) (narrow) %v980_v16, 16  ;;  %v1777_v62 = vpop.trf.xlu1  ;;  %v5334_v16 = vrot.slane %v1050_v51, %v5089_v12  ;;  %v5363_v51 = vpack.i.b16 %v5215_v36, %v5211_v34  ;;  %v5377_v34 = vpack.i.b16 %v5072_v58, %v5074_v59 }
 0x153   :  { %v1793_v3 = vpop.trf.xlu0  ;;  %2601 = vxpose.xlu1.c.b16.start.end [1/1] (short) (narrow) %v1048_v13, 16  ;;  %v1098_v18 = vcombine.high %v5334_v16, %v5318_v54 }
 0x154   :  { %v3657_v24 = vcombine.low %v1729_v22, %v1793_v3  ;;  %v1114_v3 = vcombine.high %v1096_v61, %v4948_v14 }
 0x155   :  { %2617 = vxpose.xlu0.c.b16.start.end [1/1] (short) (narrow) %v1089_v30, 16  ;;  %v1809_v19 = vpop.trf.xlu1  ;;  %v1097_v30 = vcombine.low %v5334_v16, %v5318_v54  ;;  %v1166_v16 = vcombine.high %v1132_v56, %v5343_v35 }
 0x156   :  { %v3706_v20 = vcombine.low %v1745_v6, %v1809_v19  ;;  %v3664_v22 = vrot.slane %v3657_v24, %v5089_v12  ;;  %v3729_v24 = vrot.slane %v3722_v5, %v5095_v17 }
 0x157   :  { %v1825_v46 = vpop.trf.xlu0  ;;  %2633 = vxpose.xlu1.c.b16.start.end [1/1] (short) (narrow) %v1157_v41, 16  ;;  %v438_v41 = vshrl.u32 %v5215_v36, 16  ;;  %v1105_v47 = vrot.slane %v1097_v30, %v5095_v17 }
 0x158   :  { %v3665_v39 = vcombine.low %v1761_v50, %v1825_v46  ;;  %v3713_v13 = vrot.slane %v3706_v20, %v5089_v12  ;;  %v422_v20 = vshrl.u32 %v5044_v42, 16 }
 0x159   :  { %2649 = vxpose.xlu0.c.b16.start.end [1/1] (short) (narrow) %v1113_v10, 16  ;;  %v1841_v15 = vpop.trf.xlu1  ;;  %v1165_v10 = vcombine.low %v1132_v56, %v5343_v35  ;;  %v5384_v42 = vpack.i.b16 %v438_v41, %v437_v21 }
 0x15a   :  { %v3672_v25 = vrot.slane %v3665_v39, %v5089_v12  ;;  %v3714_v45 = vcombine.low %v1777_v62, %v1841_v15  ;;  %v1164_v62 = vrot.slane %v1150_v11, %v5095_v17  ;;  %v5381_v11 = vpack.i.b16 %v5046_v43, %v5018_v27 }
 0x15b   :  { %v5328_v50 = vpop.trf.xlu0  ;;  %2665 = vxpose.xlu1.c.b16.start.end [1/1] (short) (narrow) %v1181_v53, 16  ;;  %v1173_v7 = vrot.slane %v1165_v10, %v5095_v17  ;;  %v5395_v43 = vpack.i.b16 %v422_v20, %v421_v23 }
 0x15c   :  { %v3681_v6 = vcombine.low %v3664_v22, %v3672_v25  ;;  %v3721_v9 = vrot.slane %v3714_v45, %v5089_v12  ;;  %v1182_v46 = vcombine.high %v1164_v62, %v4948_v14  ;;  %v430_v22 = vshrl.u32 %v5072_v58, 16 }
 0x15d   :  { %2681 = vxpose.xlu0.c.b16.start.end [1/1] (short) (narrow) %v1096_v61, 16  ;;  %v5338_v52 = vpop.trf.xlu1  ;;  %v429_v25 = vshrl.u32 %v5074_v59, 16  ;;  %v1201_v58 = vcombine.low %v5370_v48, %v5363_v51  ;;  %v1115_v61 = vcombine.high %v1105_v47, %v4948_v14 }
 0x15e   :  { %v3688_v33 = vrot.slane %v3681_v6, %v5095_v17  ;;  %v3730_v31 = vcombine.low %v3713_v13, %v3721_v9  ;;  %v413_v6 = vshrl.u32 %v5018_v27, 16  ;;  %v1185_v13 = vcombine.low %v5381_v11, %v5377_v34 }
 0x15f   :  { %v5345_v38 = vpop.trf.xlu0  ;;  %2697 = vxpose.xlu1.c.b16.start.end [1/1] (short) (narrow) %v1164_v62, 16  ;;  %v5397_v5 = vpack.i.b16 %v430_v22, %v429_v25  ;;  %v1269_v62 = vcombine.low %v5395_v43, %v5384_v42  ;;  %v1183_v27 = vcombine.high %v1173_v7, %v4948_v14  ;;  %v1202_v22 = vcombine.high %v5370_v48, %v5363_v51 }
 0x160   :  { %v3689_v57 = vcombine.low %v3680_v40, %v3688_v33  ;;  %v3737_v19 = vrot.slane %v3730_v31, %v5095_v17  ;;  %v5402_v9 = vpack.i.b16 %v414_v26, %v413_v6  ;;  %v1209_v33 = vrot.slane %v1201_v58, %v5089_v12 }
 0x161   :  { %2713 = vxpose.xlu0.c.b16.start.end [1/1] (short) (narrow) %v1114_v3, 16  ;;  %v5356_v8 = vpop.trf.xlu1  ;;  %v1112_v3 = vrot.slane %v1098_v18, %v5095_v17  ;;  %v1193_v40 = vrot.slane %v1185_v13, %v5089_v12  ;;  %v1186_v48 = vcombine.high %v5381_v11, %v5377_v34 }
 0x162   :  { %v3738_v32 = vcombine.low %v3729_v24, %v3737_v19  ;;  %v4429_v15 = vshrl.u32 %v3689_v57, 16  ;;  %v1253_v30 = vcombine.low %v5402_v9, %v5397_v5  ;;  %v1180_v24 = vrot.slane %v1166_v16, %v5095_v17 }
 0x163   :  { %v5365_v39 = vpop.trf.xlu0  ;;  %2729 = vxpose.xlu1.c.b16.start.end [1/1] (short) (narrow) %v1182_v46, 16  ;;  %v1277_v19 = vrot.slane %v1269_v62, %v5089_v12  ;;  %v1116_v56 = vcombine.high %v1112_v3, %v4948_v14  ;;  %v1217_v41 = vcombine.low %v1193_v40, %v1209_v33  ;;  %v1218_v51 = vcombine.high %v1193_v40, %v1209_v33 }
 0x164   :  { %v4427_v36 = vpack.i.b16 %v3738_v32, %v3689_v57  ;;  %v4430_v53 = vshrl.u32 %v3738_v32, 16  ;;  %v1261_v21 = vrot.slane %v1253_v30, %v5089_v12  ;;  %v1184_v10 = vcombine.high %v1180_v24, %v4948_v14 }
 0x165   :  { %2745 = vxpose.xlu0.c.b16.start.end [1/1] (short) (narrow) %v1105_v47, 16  ;;  %v5386_v55 = vpop.trf.xlu1  ;;  %v1225_v20 = vrot.slane %v1217_v41, %v5095_v17  ;;  %v3739_v25 = vcombine.low %v5328_v50, %v5365_v39  ;;  %v5434_v50 = vrot.slane %v1202_v22, %v5089_v12  ;;  %v1270_v39 = vcombine.high %v5395_v43, %v5384_v42 }
 0x166   :  { %4875 = vmatpush3.bf16.msra.mxu0 %v4427_v36  ;;  %v4431_v45 = vpack.i.b16 %v4430_v53, %v4429_v15  ;;  %v1285_v23 = vcombine.low %v1261_v21, %v1277_v19  ;;  %v1286_v11 = vcombine.high %v1261_v21, %v1277_v19  ;;  %v1232_v42 = vrot.slane %v1218_v51, %v5095_v17 }
 0x167   :  { %v1953_v59 = vpop.trf.xlu0  ;;  %2761 = vxpose.xlu1.c.b16.start.end [1/1] (short) (narrow) %v1173_v7, 16  ;;  %4876 = vmatprep.subr.bf16.mxu0 %v4949_v60  ;;  %v1254_v43 = vcombine.high %v5402_v9, %v5397_v5  ;;  %v5450_v33 = vrot.slane %v1186_v48, %v5089_v12  ;;  %v5459_v19 = vrot.slane %v1270_v39, %v5089_v12  ;;  %v461_v51 = vshrl.u32 %v5078_v0, 16  ;;  %v5878_v39 = vld [vmem:[#allocation7_spill] sm:$0xff] }
 0x168   :  { %4895 = vmatpush3.bf16.msra.mxu1 %v4431_v45  ;;  %v3747_v47 = vcombine.low %v5345_v38, %v1953_v59  ;;  %v1293_v26 = vrot.slane %v1285_v23, %v5095_v17  ;;  %v3788_v38 = vcombine.low %v5338_v52, %v5386_v55  ;;  %v1249_v59 = vcombine.high %v1225_v20, %v4948_v14 }
 0x169   :  { %2777 = vxpose.xlu0.c.b16.start.end [1/1] (short) (narrow) %v1115_v61, 16  ;;  %v1969_v54 = vpop.trf.xlu1  ;;  %4896 = vmatprep.subr.bf16.mxu1 %v4949_v60  ;;  %v3746_v45 = vrot.slane %v3739_v25, %v5089_v12  ;;  %v1233_v41 = vcombine.low %v5450_v33, %v5434_v50  ;;  %v1268_v21 = vrot.slane %v1254_v43, %v5089_v12 }
 0x16a   :  { %v3796_v36 = vcombine.low %v5356_v8, %v1969_v54  ;;  %v3754_v7 = vrot.slane %v3747_v47, %v5089_v12  ;;  %v1317_v34 = vcombine.high %v1293_v26, %v4948_v14  ;;  %v3795_v13 = vrot.slane %v3788_v38, %v5089_v12 }
 0x16b   :  { %v1985_v31 = vpop.trf.xlu0  ;;  %2793 = vxpose.xlu1.c.b16.start.end [1/1] (short) (narrow) %v1183_v27, 16  ;;  %v470_v47 = vshrl.u32 %v5225_v1, 16  ;;  %v1301_v25 = vcombine.low %v1268_v21, %v5459_v19  ;;  %v1302_v43 = vcombine.high %v1268_v21, %v5459_v19 }
 0x16c   :  { %v3803_v52 = vrot.slane %v3796_v36, %v5089_v12  ;;  %v3771_v62 = vcombine.low %v3746_v45, %v3754_v7  ;;  %v453_v36 = vshrl.u32 %v5020_v28, 16  ;;  %v5486_v7 = vpack.i.b16 %v5048_v44, %v5020_v28 }
 0x16d   :  { %2809 = vxpose.xlu0.c.b16.start.end [1/1] (short) (narrow) %v1112_v3, 16  ;;  %v2001_v57 = vpop.trf.xlu1  ;;  %v5497_v45 = vpack.i.b16 %v5878_v39, %v5022_v29  ;;  %v446_v28 = vshrl.u32 %v5878_v39, 16 }
 0x16e   :  { %v3778_v5 = vrot.slane %v3771_v62, %v5095_v17 }
 0x16f   :  { %v2017_v35 = vpop.trf.xlu0  ;;  %2825 = vxpose.xlu1.c.b16.start.end [1/1] (short) (narrow) %v1180_v24, 16  ;;  %v1300_v24 = vrot.slane %v1286_v11, %v5095_v17 }
 0x171   :  { %2841 = vxpose.xlu0.c.b16.start.end [1/1] (short) (narrow) %v1116_v56, 16  ;;  %v2033_v46 = vpop.trf.xlu1  ;;  %v1250_v56 = vcombine.high %v1232_v42, %v4948_v14  ;;  %v1318_v22 = vcombine.high %v1300_v24, %v4948_v14 }
 0x173   :  { %v2049_v32 = vpop.trf.xlu0  ;;  %2857 = vxpose.xlu1.c.b16.start.end [1/1] (short) (narrow) %v1184_v10, 16 }
 0x174   :  { %v3755_v15 = vcombine.low %v1985_v31, %v2049_v32  ;;  %v3820_v31 = vcombine.low %v3795_v13, %v3803_v52  ;;  %v469_v32 = vshrl.u32 %v5221_v4, 16 }
 0x175   :  { %2873 = vxpose.xlu0.c.b16.start.end [1/1] (short) (narrow) %v1225_v20, 16  ;;  %v2065_v53 = vpop.trf.xlu1 }
 0x176   :  { %v3804_v55 = vcombine.low %v2001_v57, %v2065_v53  ;;  %v3762_v61 = vrot.slane %v3755_v15, %v5089_v12  ;;  %v5479_v15 = vpack.i.b16 %v5225_v1, %v5221_v4  ;;  %v5493_v4 = vpack.i.b16 %v5076_v63, %v5078_v0 }
 0x177   :  { %v2081_v58 = vpop.trf.xlu0  ;;  %2889 = vxpose.xlu1.c.b16.start.end [1/1] (short) (narrow) %v1293_v26, 16  ;;  %v1241_v26 = vrot.slane %v1233_v41, %v5095_v17 }
 0x178   :  { %v3763_v8 = vcombine.low %v2017_v35, %v2081_v58  ;;  %v3811_v3 = vrot.slane %v3804_v55, %v5089_v12  ;;  %v454_v58 = vshrl.u32 %v5048_v44, 16  ;;  %v5500_v44 = vpack.i.b16 %v470_v47, %v469_v32 }
 0x179   :  { %2905 = vxpose.xlu0.c.b16.start.end [1/1] (short) (narrow) %v1249_v59, 16  ;;  %v2097_v6 = vpop.trf.xlu1  ;;  %v462_v59 = vshrl.u32 %v5076_v63, 16  ;;  %v1309_v55 = vrot.slane %v1301_v25, %v5095_v17  ;;  %v1337_v63 = vcombine.low %v5486_v7, %v5479_v15  ;;  %v1321_v62 = vcombine.low %v5497_v45, %v5493_v4 }
 0x17a   :  { %v3770_v18 = vrot.slane %v3763_v8, %v5089_v12  ;;  %v3812_v54 = vcombine.low %v2033_v46, %v2097_v6  ;;  %v3827_v46 = vrot.slane %v3820_v31, %v5095_v17  ;;  %v1234_v6 = vcombine.high %v5450_v33, %v5434_v50 }
 0x17b   :  { %v5444_v27 = vpop.trf.xlu0  ;;  %2921 = vxpose.xlu1.c.b16.start.end [1/1] (short) (narrow) %v1317_v34, 16  ;;  %v445_v34 = vshrl.u32 %v5022_v29, 16  ;;  %v5511_v11 = vpack.i.b16 %v454_v58, %v453_v36  ;;  %v5513_v13 = vpack.i.b16 %v462_v59, %v461_v51  ;;  %v1319_v29 = vcombine.high %v1309_v55, %v4948_v14 }
 0x17c   :  { %v3779_v16 = vcombine.low %v3762_v61, %v3770_v18  ;;  %v3819_v30 = vrot.slane %v3812_v54, %v5089_v12  ;;  %v1251_v18 = vcombine.high %v1241_v26, %v4948_v14  ;;  %v1248_v31 = vrot.slane %v1234_v6, %v5095_v17 }
 0x17d   :  { %2937 = vxpose.xlu0.c.b16.start.end [1/1] (short) (narrow) %v1232_v42, 16  ;;  %v5455_v57 = vpop.trf.xlu1  ;;  %v5518_v54 = vpack.i.b16 %v446_v28, %v445_v34  ;;  %v1405_v42 = vcombine.low %v5511_v11, %v5500_v44 }
 0x17e   :  { %v3786_v40 = vrot.slane %v3779_v16, %v5095_v17  ;;  %v3828_v9 = vcombine.low %v3811_v3, %v3819_v30  ;;  %v1345_v16 = vrot.slane %v1337_v63, %v5089_v12  ;;  %v1329_v30 = vrot.slane %v1321_v62, %v5089_v12 }
 0x17f   :  { %v5462_v35 = vpop.trf.xlu0  ;;  %2953 = vxpose.xlu1.c.b16.start.end [1/1] (short) (narrow) %v1300_v24, 16  ;;  %v1389_v3 = vcombine.low %v5518_v54, %v5513_v13  ;;  %v1316_v24 = vrot.slane %v1302_v43, %v5095_v17 }
 0x180   :  { %v3835_v10 = vrot.slane %v3828_v9, %v5095_v17  ;;  %v3787_v23 = vcombine.low %v3778_v5, %v3786_v40  ;;  %v1413_v5 = vrot.slane %v1405_v42, %v5089_v12  ;;  %v1252_v9 = vcombine.high %v1248_v31, %v4948_v14 }
 0x181   :  { %2969 = vxpose.xlu0.c.b16.start.end [1/1] (short) (narrow) %v1250_v56, 16  ;;  %v5472_v20 = vpop.trf.xlu1  ;;  %v1353_v56 = vcombine.low %v1329_v30, %v1345_v16  ;;  %v1397_v41 = vrot.slane %v1389_v3, %v5089_v12 }
 0x182   :  { %v3836_v38 = vcombine.low %v3827_v46, %v3835_v10  ;;  %v4437_v48 = vshrl.u32 %v3787_v23, 16  ;;  %v1320_v46 = vcombine.high %v1316_v24, %v4948_v14 }
 0x183   :  { %v5481_v53 = vpop.trf.xlu0  ;;  %2985 = vxpose.xlu1.c.b16.start.end [1/1] (short) (narrow) %v1318_v22, 16  ;;  %v1421_v10 = vcombine.low %v1397_v41, %v1413_v5  ;;  %v1361_v32 = vrot.slane %v1353_v56, %v5095_v17  ;;  %v1338_v22 = vcombine.high %v5486_v7, %v5479_v15  ;;  %v1354_v15 = vcombine.high %v1329_v30, %v1345_v16 }
 0x184   :  { %v4435_v1 = vpack.i.b16 %v3836_v38, %v3787_v23  ;;  %v4438_v8 = vshrl.u32 %v3836_v38, 16  ;;  %v3837_v25 = vcombine.low %v5444_v27, %v5481_v53  ;;  %v1322_v7 = vcombine.high %v5497_v45, %v5493_v4 }
 0x185   :  { %3001 = vxpose.xlu0.c.b16.start.end [1/1] (short) (narrow) %v1241_v26, 16  ;;  %v5502_v52 = vpop.trf.xlu1  ;;  %v1429_v58 = vrot.slane %v1421_v10, %v5095_v17  ;;  %v5550_v27 = vrot.slane %v1338_v22, %v5089_v12  ;;  %v1406_v53 = vcombine.high %v5511_v11, %v5500_v44  ;;  %v1422_v45 = vcombine.high %v1397_v41, %v1413_v5 }
 0x186   :  { %4877 = vmatpush3.bf16.msra.mxu0 %v4435_v1  ;;  %v4439_v61 = vpack.i.b16 %v4438_v8, %v4437_v48  ;;  %v1385_v1 = vcombine.high %v1361_v32, %v4948_v14  ;;  %v3844_v48 = vrot.slane %v3837_v25, %v5089_v12  ;;  %v1368_v44 = vrot.slane %v1354_v15, %v5095_v17  ;;  %v5880_v25 = vld [vmem:[#allocation8_spill] sm:$0xff]  ;;  %v5883_v15 = vld [vmem:[#allocation6_spill] sm:$0xff] }
 0x187   :  { %v2209_v0 = vpop.trf.xlu0  ;;  %3017 = vxpose.xlu1.c.b16.start.end [1/1] (short) (narrow) %v1309_v55, 16  ;;  %4878 = vmatprep.subr.bf16.mxu0 %v4949_v60  ;;  %v1453_v4 = vcombine.high %v1429_v58, %v4948_v14  ;;  %v5566_v34 = vrot.slane %v1322_v7, %v5089_v12  ;;  %v1436_v43 = vrot.slane %v1422_v45, %v5095_v17  ;;  %v5884_v7 = vld [vmem:[#allocation9_spill] sm:$0xff] }
 0x188   :  { %4897 = vmatpush3.bf16.msra.mxu1 %v4439_v61  ;;  %v3845_v23 = vcombine.low %v5462_v35, %v2209_v0  ;;  %v3886_v35 = vcombine.low %v5455_v57, %v5502_v52  ;;  %v5575_v16 = vrot.slane %v1406_v53, %v5089_v12  ;;  %v478_v53 = vshrl.u32 %v5884_v7, 16 }
 0x189   :  { %3033 = vxpose.xlu0.c.b16.start.end [1/1] (short) (narrow) %v1251_v18, 16  ;;  %v2225_v50 = vpop.trf.xlu1  ;;  %4898 = vmatprep.subr.bf16.mxu1 %v4949_v60  ;;  %v1390_v18 = vcombine.high %v5518_v54, %v5513_v13  ;;  %v1369_v3 = vcombine.low %v5566_v34, %v5550_v27  ;;  %v1454_v41 = vcombine.high %v1436_v43, %v4948_v14 }
 0x18a   :  { %v3894_v36 = vcombine.low %v5472_v20, %v2225_v50  ;;  %v3852_v59 = vrot.slane %v3845_v23, %v5089_v12  ;;  %v3893_v55 = vrot.slane %v3886_v35, %v5089_v12  ;;  %v5595_v23 = vpack.i.b16 %v5232_v49, %v5229_v37  ;;  %v5882_v35 = vld [vmem:[#allocation11_spill] sm:$0xff] }
 0x18b   :  { %v2241_v33 = vpop.trf.xlu0  ;;  %3049 = vxpose.xlu1.c.b16.start.end [1/1] (short) (narrow) %v1319_v29, 16  ;;  %v1404_v30 = vrot.slane %v1390_v18, %v5089_v12  ;;  %v1370_v45 = vcombine.high %v5566_v34, %v5550_v27 }
 0x18c   :  { %v3901_v57 = vrot.slane %v3894_v36, %v5089_v12  ;;  %v3869_v63 = vcombine.low %v3844_v48, %v3852_v59  ;;  %v493_v59 = vshrl.u32 %v5882_v35, 16 }
 0x18d   :  { %3065 = vxpose.xlu0.c.b16.start.end [1/1] (short) (narrow) %v1248_v31, 16  ;;  %v2257_v40 = vpop.trf.xlu1  ;;  %v1386_v31 = vcombine.high %v1368_v44, %v4948_v14 }
 0x18e   :  { %v3918_v11 = vcombine.low %v3893_v55, %v3901_v57  ;;  %v3876_v13 = vrot.slane %v3869_v63, %v5095_v17  ;;  %v477_v55 = vshrl.u32 %v5883_v15, 16 }
 0x18f   :  { %v2273_v19 = vpop.trf.xlu0  ;;  %3081 = vxpose.xlu1.c.b16.start.end [1/1] (short) (narrow) %v1316_v24, 16 }
 0x190   :  { %v5634_v18 = vpack.i.b16 %v478_v53, %v477_v55 }
 0x191   :  { %3097 = vxpose.xlu0.c.b16.start.end [1/1] (short) (narrow) %v1252_v9, 16  ;;  %v2289_v21 = vpop.trf.xlu1  ;;  %v501_v9 = vshrl.u32 %v5229_v37, 16 }
 0x193   :  { %v2305_v47 = vpop.trf.xlu0  ;;  %3113 = vxpose.xlu1.c.b16.start.end [1/1] (short) (narrow) %v1320_v46, 16  ;;  %v5879_v46 = vld [vmem:[#allocation5_spill] sm:$0xff] }
 0x194   :  { %v3853_v26 = vcombine.low %v2241_v33, %v2305_v47  ;;  %v485_v10 = vshrl.u32 %v5879_v46, 16  ;;  %v5602_v36 = vpack.i.b16 %v5880_v25, %v5879_v46 }
 0x195   :  { %3129 = vxpose.xlu0.c.b16.start.end [1/1] (short) (narrow) %v1361_v32, 16  ;;  %v2321_v38 = vpop.trf.xlu1  ;;  %v1377_v32 = vrot.slane %v1369_v3, %v5095_v17 }
 0x196   :  { %v3902_v8 = vcombine.low %v2257_v40, %v2321_v38  ;;  %v3860_v39 = vrot.slane %v3853_v26, %v5089_v12  ;;  %v3925_v40 = vrot.slane %v3918_v11, %v5095_v17  ;;  %v486_v26 = vshrl.u32 %v5880_v25, 16  ;;  %v5881_v38 = vld [vmem:[#allocation10_spill] sm:$0xff] }
 0x197   :  { %v2337_v51 = vpop.trf.xlu0  ;;  %3145 = vxpose.xlu1.c.b16.start.end [1/1] (short) (narrow) %v1429_v58, 16  ;;  %v494_v58 = vshrl.u32 %v5881_v38, 16  ;;  %v5609_v37 = vpack.i.b16 %v5881_v38, %v5882_v35  ;;  %v1438_v11 = vcombine.high %v1404_v30, %v5575_v16 }
 0x198   :  { %v3861_v20 = vcombine.low %v2273_v19, %v2337_v51  ;;  %v3909_v62 = vrot.slane %v3902_v8, %v5089_v12  ;;  %v502_v19 = vshrl.u32 %v5232_v49, 16  ;;  %v5627_v63 = vpack.i.b16 %v486_v26, %v485_v10 }
 0x199   :  { %3161 = vxpose.xlu0.c.b16.start.end [1/1] (short) (narrow) %v1385_v1, 16  ;;  %v2353_v52 = vpop.trf.xlu1  ;;  %v1474_v10 = vcombine.high %v5602_v36, %v5595_v23 }
 0x19a   :  { %v3868_v28 = vrot.slane %v3861_v20, %v5089_v12  ;;  %v3910_v0 = vcombine.low %v2289_v21, %v2353_v52  ;;  %v1437_v21 = vcombine.low %v1404_v30, %v5575_v16  ;;  %v5613_v20 = vpack.i.b16 %v5884_v7, %v5883_v15 }
 0x19b   :  { %v5560_v61 = vpop.trf.xlu0  ;;  %3177 = vxpose.xlu1.c.b16.start.end [1/1] (short) (narrow) %v1453_v4, 16  ;;  %v5616_v48 = vpack.i.b16 %v502_v19, %v501_v9  ;;  %v1387_v4 = vcombine.high %v1377_v32, %v4948_v14 }
 0x19c   :  { %v3877_v6 = vcombine.low %v3860_v39, %v3868_v28  ;;  %v3917_v42 = vrot.slane %v3910_v0, %v5089_v12  ;;  %v1445_v8 = vrot.slane %v1437_v21, %v5095_v17  ;;  %v1473_v39 = vcombine.low %v5602_v36, %v5595_v23 }
 0x19d   :  { %3193 = vxpose.xlu0.c.b16.start.end [1/1] (short) (narrow) %v1368_v44, 16  ;;  %v5571_v29 = vpop.trf.xlu1  ;;  %v5629_v0 = vpack.i.b16 %v494_v58, %v493_v59  ;;  %v1457_v44 = vcombine.low %v5613_v20, %v5609_v37  ;;  %v1458_v36 = vcombine.high %v5613_v20, %v5609_v37 }
 0x19e   :  { %v3884_v50 = vrot.slane %v3877_v6, %v5095_v17  ;;  %v3926_v54 = vcombine.low %v3909_v62, %v3917_v42  ;;  %v1541_v6 = vcombine.low %v5627_v63, %v5616_v48  ;;  %v1455_v34 = vcombine.high %v1445_v8, %v4948_v14 }
 0x19f   :  { %v5578_v33 = vpop.trf.xlu0  ;;  %3209 = vxpose.xlu1.c.b16.start.end [1/1] (short) (narrow) %v1436_v43, 16  ;;  %v1481_v62 = vrot.slane %v1473_v39, %v5089_v12  ;;  %v1525_v43 = vcombine.low %v5634_v18, %v5629_v0 }
 0x1a0   :  { %v3933_v24 = vrot.slane %v3926_v54, %v5095_v17  ;;  %v3885_v5 = vcombine.low %v3876_v13, %v3884_v50  ;;  %v1384_v50 = vrot.slane %v1370_v45, %v5095_v17  ;;  %v1465_v13 = vrot.slane %v1457_v44, %v5089_v12 }
 0x1a1   :  { %3225 = vxpose.xlu0.c.b16.start.end [1/1] (short) (narrow) %v1386_v31, 16  ;;  %v5588_v56 = vpop.trf.xlu1  ;;  %v1452_v31 = vrot.slane %v1438_v11, %v5095_v17  ;;  %v1549_v3 = vrot.slane %v1541_v6, %v5089_v12 }
 0x1a2   :  { %v3934_v22 = vcombine.low %v3925_v40, %v3933_v24  ;;  %v4445_v51 = vshrl.u32 %v3885_v5, 16  ;;  %v1388_v30 = vcombine.high %v1384_v50, %v4948_v14  ;;  %v1489_v40 = vcombine.low %v1465_v13, %v1481_v62 }
 0x1a3   :  { %v5597_v47 = vpop.trf.xlu0  ;;  %3241 = vxpose.xlu1.c.b16.start.end [1/1] (short) (narrow) %v1454_v41, 16  ;;  %v1533_v24 = vrot.slane %v1525_v43, %v5089_v12  ;;  %v1456_v19 = vcombine.high %v1452_v31, %v4948_v14  ;;  %v1490_v23 = vcombine.high %v1465_v13, %v1481_v62 }
 0x1a4   :  { %v4443_v49 = vpack.i.b16 %v3934_v22, %v3885_v5  ;;  %v4446_v1 = vshrl.u32 %v3934_v22, 16  ;;  %v1497_v46 = vrot.slane %v1489_v40, %v5095_v17 }
 0x1a5   :  { %3257 = vxpose.xlu0.c.b16.start.end [1/1] (short) (narrow) %v1377_v32, 16  ;;  %v5618_v57 = vpop.trf.xlu1  ;;  %v1557_v9 = vcombine.low %v1533_v24, %v1549_v3  ;;  %v3935_v32 = vcombine.low %v5560_v61, %v5597_v47  ;;  %v5666_v61 = vrot.slane %v1474_v10, %v5089_v12  ;;  %v1542_v47 = vcombine.high %v5627_v63, %v5616_v48 }
 0x1a6   :  { %4879 = vmatpush3.bf16.msra.mxu0 %v4443_v49  ;;  %v4447_v52 = vpack.i.b16 %v4446_v1, %v4445_v51  ;;  %v1521_v59 = vcombine.high %v1497_v46, %v4948_v14  ;;  %v1558_v20 = vcombine.high %v1533_v24, %v1549_v3  ;;  %v1504_v48 = vrot.slane %v1490_v23, %v5095_v17 }
 0x1a7   :  { %v2465_v28 = vpop.trf.xlu0  ;;  %3273 = vxpose.xlu1.c.b16.start.end [1/1] (short) (narrow) %v1445_v8, 16  ;;  %4880 = vmatprep.subr.bf16.mxu0 %v4949_v60  ;;  %v1565_v38 = vrot.slane %v1557_v9, %v5095_v17  ;;  %v3942_v49 = vrot.slane %v3935_v32, %v5089_v12 }
 0x1a8   :  { %4899 = vmatpush3.bf16.msra.mxu1 %v4447_v52  ;;  %v3943_v41 = vcombine.low %v5578_v33, %v2465_v28  ;;  %v3984_v33 = vcombine.low %v5571_v29, %v5618_v57  ;;  %v1526_v28 = vcombine.high %v5634_v18, %v5629_v0  ;;  %v1522_v62 = vcombine.high %v1504_v48, %v4948_v14 }
 0x1a9   :  { %3289 = vxpose.xlu0.c.b16.start.end [1/1] (short) (narrow) %v1387_v4, 16  ;;  %v2481_v27 = vpop.trf.xlu1  ;;  %4900 = vmatprep.subr.bf16.mxu1 %v4949_v60  ;;  %v1589_v37 = vcombine.high %v1565_v38, %v4948_v14  ;;  %v1472_v4 = vrot.slane %v1458_v36, %v5089_v12 }
 0x1aa   :  { %v3992_v22 = vcombine.low %v5588_v56, %v2481_v27  ;;  %v3950_v58 = vrot.slane %v3943_v41, %v5089_v12  ;;  %v3991_v53 = vrot.slane %v3984_v33, %v5089_v12  ;;  %v1572_v27 = vrot.slane %v1558_v20, %v5095_v17 }
 0x1ab   :  { %v2497_v42 = vpop.trf.xlu0  ;;  %3305 = vxpose.xlu1.c.b16.start.end [1/1] (short) (narrow) %v1455_v34, 16  ;;  %v1556_v34 = vrot.slane %v1542_v47, %v5089_v12 }
 0x1ac   :  { %v3999_v29 = vrot.slane %v3992_v22, %v5089_v12  ;;  %v3967_v57 = vcombine.low %v3942_v49, %v3950_v58  ;;  %v1590_v3 = vcombine.high %v1572_v27, %v4948_v14  ;;  %v1506_v22 = vcombine.high %v1472_v4, %v5666_v61 }
 0x1ad   :  { %3321 = vxpose.xlu0.c.b16.start.end [1/1] (short) (narrow) %v1384_v50, 16  ;;  %v2513_v54 = vpop.trf.xlu1  ;;  %v1540_v50 = vrot.slane %v1526_v28, %v5089_v12 }
 0x1ae   :  { %v4016_v45 = vcombine.low %v3991_v53, %v3999_v29  ;;  %v3974_v0 = vrot.slane %v3967_v57, %v5095_v17  ;;  %v1520_v58 = vrot.slane %v1506_v22, %v5095_v17 }
 0x1af   :  { %v2529_v16 = vpop.trf.xlu0  ;;  %3337 = vxpose.xlu1.c.b16.start.end [1/1] (short) (narrow) %v1452_v31, 16 }
 0x1b0   :  { %v4023_v43 = vrot.slane %v4016_v45, %v5095_v17  ;;  %v1524_v36 = vcombine.high %v1520_v58, %v4948_v14 }
 0x1b1   :  { %3353 = vxpose.xlu0.c.b16.start.end [1/1] (short) (narrow) %v1388_v30, 16  ;;  %v2545_v5 = vpop.trf.xlu1 }
 0x1b3   :  { %v2561_v21 = vpop.trf.xlu0  ;;  %3369 = vxpose.xlu1.c.b16.start.end [1/1] (short) (narrow) %v1456_v19, 16 }
 0x1b4   :  { %v3951_v25 = vcombine.low %v2497_v42, %v2561_v21  ;;  %v1505_v42 = vcombine.low %v1472_v4, %v5666_v61 }
 0x1b5   :  { %3385 = vxpose.xlu0.c.b16.start.end [1/1] (short) (narrow) %v1497_v46, 16  ;;  %v2577_v26 = vpop.trf.xlu1 }
 0x1b6   :  { %v4000_v51 = vcombine.low %v2513_v54, %v2577_v26  ;;  %v3958_v1 = vrot.slane %v3951_v25, %v5089_v12  ;;  %v1513_v40 = vrot.slane %v1505_v42, %v5095_v17 }
 0x1b7   :  { %v2593_v35 = vpop.trf.xlu0  ;;  %3401 = vxpose.xlu1.c.b16.start.end [1/1] (short) (narrow) %v1565_v38, 16  ;;  %v1574_v38 = vcombine.high %v1540_v50, %v1556_v34 }
 0x1b8   :  { %v3959_v56 = vcombine.low %v2529_v16, %v2593_v35  ;;  %v4007_v55 = vrot.slane %v4000_v51, %v5089_v12  ;;  %v1573_v16 = vcombine.low %v1540_v50, %v1556_v34  ;;  %v1523_v32 = vcombine.high %v1513_v40, %v4948_v14 }
 0x1b9   :  { %3417 = vxpose.xlu0.c.b16.start.end [1/1] (short) (narrow) %v1521_v59, 16  ;;  %v2609_v7 = vpop.trf.xlu1  ;;  %v1588_v59 = vrot.slane %v1574_v38, %v5095_v17 }
 0x1ba   :  { %v3966_v15 = vrot.slane %v3959_v56, %v5089_v12  ;;  %v4008_v8 = vcombine.low %v2545_v5, %v2609_v7  ;;  %v1581_v21 = vrot.slane %v1573_v16, %v5095_v17 }
 0x1bb   :  { %v5676_v39 = vpop.trf.xlu0  ;;  %3433 = vxpose.xlu1.c.b16.start.end [1/1] (short) (narrow) %v1589_v37, 16  ;;  %v1592_v56 = vcombine.high %v1588_v59, %v4948_v14 }
 0x1bc   :  { %v3975_v52 = vcombine.low %v3958_v1, %v3966_v15  ;;  %v4015_v63 = vrot.slane %v4008_v8, %v5089_v12  ;;  %v1591_v26 = vcombine.high %v1581_v21, %v4948_v14 }
 0x1bd   :  { %3449 = vxpose.xlu0.c.b16.start.end [1/1] (short) (narrow) %v1504_v48, 16  ;;  %v5685_v6 = vpop.trf.xlu1 }
 0x1be   :  { %v3982_v44 = vrot.slane %v3975_v52, %v5095_v17  ;;  %v4024_v18 = vcombine.low %v4007_v55, %v4015_v63 }
 0x1bf   :  { %v2657_v11 = vpop.trf.xlu0  ;;  %3465 = vxpose.xlu1.c.b16.start.end [1/1] (short) (narrow) %v1572_v27, 16 }
 0x1c0   :  { %v4031_v13 = vrot.slane %v4024_v18, %v5095_v17  ;;  %v3983_v54 = vcombine.low %v3974_v0, %v3982_v44 }
 0x1c1   :  { %3481 = vxpose.xlu0.c.b16.start.end [1/1] (short) (narrow) %v1522_v62, 16  ;;  %v2673_v31 = vpop.trf.xlu1 }
 0x1c2   :  { %v4032_v24 = vcombine.low %v4023_v43, %v4031_v13  ;;  %v4453_v19 = vshrl.u32 %v3983_v54, 16 }
 0x1c3   :  { %v2689_v30 = vpop.trf.xlu0  ;;  %3497 = vxpose.xlu1.c.b16.start.end [1/1] (short) (narrow) %v1590_v3, 16 }
 0x1c4   :  { %v4451_v5 = vpack.i.b16 %v4032_v24, %v3983_v54  ;;  %v4454_v9 = vshrl.u32 %v4032_v24, 16  ;;  %v4033_v29 = vcombine.low %v5676_v39, %v2689_v30 }
 0x1c5   :  { %3513 = vxpose.xlu0.c.b16.start.end [1/1] (short) (narrow) %v1513_v40, 16  ;;  %v2705_v41 = vpop.trf.xlu1 }
 0x1c6   :  { %4881 = vmatpush3.bf16.msra.mxu0 %v4451_v5  ;;  %v4455_v10 = vpack.i.b16 %v4454_v9, %v4453_v19  ;;  %v4082_v7 = vcombine.low %v5685_v6, %v2705_v41  ;;  %v4040_v57 = vrot.slane %v4033_v29, %v5089_v12 }
 0x1c7   :  { %v2721_v46 = vpop.trf.xlu0  ;;  %3529 = vxpose.xlu1.c.b16.start.end [1/1] (short) (narrow) %v1581_v21, 16  ;;  %4882 = vmatprep.subr.bf16.mxu0 %v4949_v60 }
 0x1c8   :  { %4901 = vmatpush3.bf16.msra.mxu1 %v4455_v10  ;;  %v4041_v47 = vcombine.low %v2657_v11, %v2721_v46  ;;  %v4089_v4 = vrot.slane %v4082_v7, %v5089_v12 }
 0x1c9   :  { %3545 = vxpose.xlu0.c.b16.start.end [1/1] (short) (narrow) %v1523_v32, 16  ;;  %v2737_v25 = vpop.trf.xlu1  ;;  %4902 = vmatprep.subr.bf16.mxu1 %v4949_v60 }
 0x1ca   :  { %v4090_v51 = vcombine.low %v2673_v31, %v2737_v25  ;;  %v4048_v37 = vrot.slane %v4041_v47, %v5089_v12 }
 0x1cb   :  { %v2753_v33 = vpop.trf.xlu0  ;;  %3561 = vxpose.xlu1.c.b16.start.end [1/1] (short) (narrow) %v1591_v26, 16 }
 0x1cc   :  { %v4097_v8 = vrot.slane %v4090_v51, %v5089_v12  ;;  %v4065_v45 = vcombine.low %v4040_v57, %v4048_v37 }
 0x1cd   :  { %3577 = vxpose.xlu0.c.b16.start.end [1/1] (short) (narrow) %v1520_v58, 16  ;;  %v2769_v35 = vpop.trf.xlu1 }
 0x1ce   :  { %v4114_v6 = vcombine.low %v4089_v4, %v4097_v8  ;;  %v4072_v11 = vrot.slane %v4065_v45, %v5095_v17 }
 0x1cf   :  { %v2785_v23 = vpop.trf.xlu0  ;;  %3593 = vxpose.xlu1.c.b16.start.end [1/1] (short) (narrow) %v1588_v59, 16 }
 0x1d1   :  { %3609 = vxpose.xlu0.c.b16.start.end [1/1] (short) (narrow) %v1524_v36, 16  ;;  %v2801_v61 = vpop.trf.xlu1 }
 0x1d3   :  { %v2817_v49 = vpop.trf.xlu0  ;;  %3625 = vxpose.xlu1.c.b16.start.end [1/1] (short) (narrow) %v1592_v56, 16 }
 0x1d4   :  { %v4049_v1 = vcombine.low %v2753_v33, %v2817_v49 }
 0x1d5   :  { %v2833_v15 = vpop.trf.xlu1 }
 0x1d6   :  { %v4098_v48 = vcombine.low %v2769_v35, %v2833_v15  ;;  %v4056_v28 = vrot.slane %v4049_v1, %v5089_v12 }
 0x1d7   :  { %v2849_v20 = vpop.trf.xlu0  ;;  %4933 = vset.pattern.permute.xlu1 %v4948_v14 }
 0x1d8   :  { %v4057_v53 = vcombine.low %v2785_v23, %v2849_v20  ;;  %v4105_v27 = vrot.slane %v4098_v48, %v5089_v12 }
 0x1d9   :  { %v2865_v52 = vpop.trf.xlu1 }
 0x1da   :  { %v4064_v39 = vrot.slane %v4057_v53, %v5089_v12  ;;  %4932 = vset.pattern.permute.xlu0 %v4948_v14  ;;  %v4106_v55 = vcombine.low %v2801_v61, %v2865_v52  ;;  %v4121_v14 = vrot.slane %v4114_v6, %v5095_v17 }
 0x1db   :  { %v2881_v63 = vpop.trf.xlu0 }
 0x1dc   :  { %v4073_v44 = vcombine.low %v4056_v28, %v4064_v39  ;;  %v4113_v34 = vrot.slane %v4106_v55, %v5089_v12 }
 0x1dd   :  { %v2897_v18 = vpop.trf.xlu1 }
 0x1de   :  { %v4080_v0 = vrot.slane %v4073_v44, %v5095_v17  ;;  %v4122_v62 = vcombine.low %v4105_v27, %v4113_v34 }
 0x1df   :  { %v2913_v42 = vpop.trf.xlu0 }
 0x1e0   :  { %v4129_v50 = vrot.slane %v4122_v62, %v5095_v17  ;;  %v4081_v43 = vcombine.low %v4072_v11, %v4080_v0 }
 0x1e1   :  { %v2929_v13 = vpop.trf.xlu1 }
 0x1e2   :  { %v4130_v31 = vcombine.low %v4121_v14, %v4129_v50  ;;  %v4461_v16 = vshrl.u32 %v4081_v43, 16 }
 0x1e3   :  { %v2945_v54 = vpop.trf.xlu0 }
 0x1e4   :  { %v4459_v3 = vpack.i.b16 %v4130_v31, %v4081_v43  ;;  %v4462_v30 = vshrl.u32 %v4130_v31, 16  ;;  %v4131_v22 = vcombine.low %v2881_v63, %v2945_v54 }
 0x1e5   :  { %v2961_v40 = vpop.trf.xlu1 }
 0x1e6   :  { %4883 = vmatpush3.bf16.msra.mxu0 %v4459_v3  ;;  %v4463_v5 = vpack.i.b16 %v4462_v30, %v4461_v16  ;;  %v4180_v33 = vcombine.low %v2897_v18, %v2961_v40  ;;  %v4138_v23 = vrot.slane %v4131_v22, %v5089_v12 }
 0x1e7   :  { %v2977_v24 = vpop.trf.xlu0  ;;  %4884 = vmatprep.subr.bf16.mxu0 %v4949_v60 }
 0x1e8   :  { %4903 = vmatpush3.bf16.msra.mxu1 %v4463_v5  ;;  %v4139_v10 = vcombine.low %v2913_v42, %v2977_v24  ;;  %v4187_v29 = vrot.slane %v4180_v33, %v5089_v12 }
 0x1e9   :  { %v2993_v19 = vpop.trf.xlu1  ;;  %4904 = vmatprep.subr.bf16.mxu1 %v4949_v60 }
 0x1ea   :  { %v4188_v25 = vcombine.low %v2929_v13, %v2993_v19  ;;  %v4146_v58 = vrot.slane %v4139_v10, %v5089_v12 }
 0x1eb   :  { %v3009_v9 = vpop.trf.xlu0 }
 0x1ec   :  { %v4195_v36 = vrot.slane %v4188_v25, %v5089_v12  ;;  %v4163_v51 = vcombine.low %v4138_v23, %v4146_v58 }
 0x1ed   :  { %v3025_v41 = vpop.trf.xlu1 }
 0x1ee   :  { %v4212_v37 = vcombine.low %v4187_v29, %v4195_v36  ;;  %v4170_v48 = vrot.slane %v4163_v51, %v5095_v17 }
 0x1ef   :  { %v3041_v21 = vpop.trf.xlu0 }
 0x1f0   :  { %v4219_v52 = vrot.slane %v4212_v37, %v5095_v17 }
 0x1f1   :  { %v3057_v46 = vpop.trf.xlu1 }
 0x1f3   :  { %v3073_v32 = vpop.trf.xlu0 }
 0x1f4   :  { %v4147_v26 = vcombine.low %v3009_v9, %v3073_v32 }
 0x1f5   :  { %v3089_v38 = vpop.trf.xlu1 }
 0x1f6   :  { %v4196_v61 = vcombine.low %v3025_v41, %v3089_v38  ;;  %v4154_v56 = vrot.slane %v4147_v26, %v5089_v12 }
 0x1f7   :  { %v3105_v35 = vpop.trf.xlu0 }
 0x1f8   :  { %v4155_v59 = vcombine.low %v3041_v21, %v3105_v35  ;;  %v4203_v20 = vrot.slane %v4196_v61, %v5089_v12 }
 0x1f9   :  { %v3121_v49 = vpop.trf.xlu1 }
 0x1fa   :  { %v4162_v47 = vrot.slane %v4155_v59, %v5089_v12  ;;  %v4204_v1 = vcombine.low %v3057_v46, %v3121_v49 }
 0x1fb   :  { %v3137_v15 = vpop.trf.xlu0 }
 0x1fc   :  { %v4171_v7 = vcombine.low %v4154_v56, %v4162_v47  ;;  %v4211_v53 = vrot.slane %v4204_v1, %v5089_v12 }
 0x1fd   :  { %v3153_v8 = vpop.trf.xlu1 }
 0x1fe   :  { %v4178_v57 = vrot.slane %v4171_v7, %v5095_v17  ;;  %v4220_v28 = vcombine.low %v4203_v20, %v4211_v53 }
 0x1ff   :  { %v3169_v39 = vpop.trf.xlu0 }
 0x200   :  { %v4227_v4 = vrot.slane %v4220_v28, %v5095_v17  ;;  %v4179_v45 = vcombine.low %v4170_v48, %v4178_v57 }
 0x201   :  { %v3185_v55 = vpop.trf.xlu1 }
 0x202   :  { %v4228_v44 = vcombine.low %v4219_v52, %v4227_v4  ;;  %v4469_v27 = vshrl.u32 %v4179_v45, 16 }
 0x203   :  { %v3201_v63 = vpop.trf.xlu0 }
 0x204   :  { %v4467_v6 = vpack.i.b16 %v4228_v44, %v4179_v45  ;;  %v4470_v34 = vshrl.u32 %v4228_v44, 16  ;;  %v4229_v31 = vcombine.low %v3137_v15, %v3201_v63  ;;  %v33_v45 = vld [vmem:[%s5860_s0] sm:$0x3]  ;;  %v35_v63 = vld [vmem:[%s5860_s0 + $0x4] sm:$0x3] }
 0x205   :  { %v3217_v0 = vpop.trf.xlu1  ;;  %v36_v44 = vld [vmem:[%s5860_s0 + $0x6] sm:$0x3] }
 0x206   :  { %4885 = vmatpush3.bf16.msra.mxu0 %v4467_v6  ;;  %v4471_v11 = vpack.i.b16 %v4470_v34, %v4469_v27  ;;  %v4278_v40 = vcombine.low %v3153_v8, %v3217_v0  ;;  %v4236_v9 = vrot.slane %v4229_v31, %v5089_v12  ;;  %v37_v6 = vld [vmem:[%s5860_s0 + $0x8] sm:$0x3]  ;;  %v38_v27 = vld [vmem:[%s5860_s0 + $0xa] sm:$0x3]  ;;  %v39_v34 = vld [vmem:[%s5860_s0 + $0xc] sm:$0x3] }
 0x207   :  { %v3233_v18 = vpop.trf.xlu0  ;;  %4886 = vmatprep.subr.bf16.mxu0 %v4949_v60  ;;  %v40_v0 = vld [vmem:[%s5860_s0 + $0xe] sm:$0x3] }
 0x208   :  { %4905 = vmatpush3.bf16.msra.mxu1 %v4471_v11  ;;  %v4237_v13 = vcombine.low %v3169_v39, %v3233_v18  ;;  %v4285_v22 = vrot.slane %v4278_v40, %v5089_v12 }
 0x209   :  { %v3249_v62 = vpop.trf.xlu1  ;;  %4906 = vmatprep.subr.bf16.mxu1 %v4949_v60 }
 0x20a   :  { %v4286_v3 = vcombine.low %v3185_v55, %v3249_v62  ;;  %v4244_v24 = vrot.slane %v4237_v13, %v5089_v12  ;;  %v34_v55 = vld [vmem:[%s5860_s0 + $0x2] sm:$0x3] }
 0x20b   :  { %v3265_v42 = vpop.trf.xlu0 }
 0x20c   :  { %v4293_v41 = vrot.slane %v4286_v3, %v5089_v12  ;;  %v4261_v25 = vcombine.low %v4236_v9, %v4244_v24 }
 0x20d   :  { %v3281_v14 = vpop.trf.xlu1 }
 0x20e   :  { %v4310_v58 = vcombine.low %v4285_v22, %v4293_v41  ;;  %v4268_v61 = vrot.slane %v4261_v25, %v5095_v17 }
 0x20f   :  { %v3297_v50 = vpop.trf.xlu0 }
 0x210   :  { %v4317_v49 = vrot.slane %v4310_v58, %v5095_v17 }
 0x211   :  { %v3313_v43 = vpop.trf.xlu1 }
 0x213   :  { %v3329_v54 = vpop.trf.xlu0 }
 0x214   :  { %v4245_v16 = vcombine.low %v3265_v42, %v3329_v54  ;;  %v4842_v42 = vpack.c.bf16 %v37_v6, %v33_v45  ;;  %v5885_v45 = vlaneseq }
 0x215   :  { %v3345_v30 = vpop.trf.xlu1 }
 0x216   :  { %v4294_v21 = vcombine.low %v3281_v14, %v3345_v30  ;;  %v4252_v46 = vrot.slane %v4245_v16, %v5089_v12  ;;  %v4843_v14 = vpack.c.bf16 %v39_v34, %v35_v63  ;;  %v72_v24 = vrot.slane %v4842_v42, %v5089_v12 }
 0x217   :  { %v3361_v5 = vpop.trf.xlu0 }
 0x218   :  { %v4253_v19 = vcombine.low %v3297_v50, %v3361_v5  ;;  %v4301_v35 = vrot.slane %v4294_v21, %v5089_v12  ;;  %v4844_v50 = vpack.c.bf16 %v38_v27, %v34_v55  ;;  %v4576_v55 = vand.u32 127, %v5885_v45 }
 0x219   :  { %v3377_v32 = vpop.trf.xlu1 }
 0x21a   :  { %v4260_v10 = vrot.slane %v4253_v19, %v5089_v12  ;;  %v4302_v26 = vcombine.low %v3313_v43, %v3377_v32  ;;  %v4845_v43 = vpack.c.bf16 %v40_v0, %v36_v44  ;;  %v80_v19 = vrot.slane %v4843_v14, %v5089_v12 }
 0x21b   :  { %v3393_v38 = vpop.trf.xlu0  ;;  %v96_v9 = vrot.slane %v4844_v50, %v5089_v12  ;;  %vm4579_vm2 = vcmp.gt.s32.totalorder %v4576_v55, %v5081_v2 }
 0x21c   :  { %v4269_v33 = vcombine.low %v4252_v46, %v4260_v10  ;;  %v4309_v59 = vrot.slane %v4302_v26, %v5089_v12  ;;  %v104_v41 = vrot.slane %v4845_v43, %v5089_v12 }
 0x21d   :  { %v3409_v36 = vpop.trf.xlu1 }
 0x21e   :  { %v4276_v23 = vrot.slane %v4269_v33, %v5095_v17  ;;  %v4318_v56 = vcombine.low %v4301_v35, %v4309_v59  ;;  %v81_v35 = vcombine.low %v72_v24, %v80_v19  ;;  %v105_v59 = vcombine.low %v96_v9, %v104_v41  ;;  %v4632_v24 = vld [vmem:[%s5861_s2] sm:$0x3]  ;;  %v4634_v19 = vld [vmem:[%s5861_s2 + $0x4] sm:$0x3]  ;;  %v4635_v9 = vld [vmem:[%s5861_s2 + $0x6] sm:$0x3] }
 0x21f   :  { %v3425_v47 = vpop.trf.xlu0  ;;  %v4636_v41 = vld [vmem:[%s5861_s2 + $0x8] sm:$0x3] }
 0x220   :  { %v4325_v29 = vrot.slane %v4318_v56, %v5095_v17  ;;  %v4277_v51 = vcombine.low %v4268_v61, %v4276_v23 }
 0x221   :  { %v3441_v1 = vpop.trf.xlu1 }
 0x222   :  { %v4326_v7 = vcombine.low %v4317_v49, %v4325_v29  ;;  %v4477_v20 = vshrl.u32 %v4277_v51, 16  ;;  %v88_v29 = vrot.slane %v81_v35, %v5095_v17 }
 0x223   :  { %v3457_v15 = vpop.trf.xlu0 }
 0x224   :  { %v4475_v37 = vpack.i.b16 %v4326_v7, %v4277_v51  ;;  %v4478_v53 = vshrl.u32 %v4326_v7, 16  ;;  %v4327_v13 = vcombine.low %v3393_v38, %v3457_v15  ;;  %v112_v51 = vrot.slane %v105_v59, %v5095_v17 }
 0x225   :  { %v3473_v57 = vpop.trf.xlu1 }
 0x226   :  { %4887 = vmatpush3.bf16.msra.mxu0 %v4475_v37  ;;  %v4479_v48 = vpack.i.b16 %v4478_v53, %v4477_v20  ;;  %v4376_v16 = vcombine.low %v3409_v36, %v3473_v57  ;;  %v4334_v21 = vrot.slane %v4327_v13, %v5089_v12  ;;  %v117_v20 = vshrl.u32 %v88_v29, 16 }
 0x227   :  { %v3489_v8 = vpop.trf.xlu0  ;;  %4888 = vmatprep.subr.bf16.mxu0 %v4949_v60  ;;  %v118_v53 = vshrl.u32 %v112_v51, 16 }
 0x228   :  { %4907 = vmatpush3.bf16.msra.mxu1 %v4479_v48  ;;  %v4335_v11 = vcombine.low %v3425_v47, %v3489_v8  ;;  %v4383_v26 = vrot.slane %v4376_v16, %v5089_v12 }
 0x229   :  { %v3505_v28 = vpop.trf.xlu1  ;;  %4908 = vmatprep.subr.bf16.mxu1 %v4949_v60 }
 0x22a   :  { %v4384_v54 = vcombine.low %v3441_v1, %v3505_v28  ;;  %v4342_v30 = vrot.slane %v4335_v11, %v5089_v12  ;;  %v115_v28 = vpack.i.b16 %v112_v51, %v88_v29 }
 0x22b   :  { %v3521_v39 = vpop.trf.xlu0 }
 0x22c   :  { %v4391_v46 = vrot.slane %v4384_v54, %v5089_v12  ;;  %v4359_v38 = vcombine.low %v4334_v21, %v4342_v30  ;;  %v4637_v21 = vld [vmem:[%s5861_s2 + $0xa] sm:$0x3] }
 0x22d   :  { %v3537_v52 = vpop.trf.xlu1 }
 0x22e   :  { %v4408_v23 = vcombine.low %v4383_v26, %v4391_v46  ;;  %v4366_v47 = vrot.slane %v4359_v38, %v5095_v17  ;;  %v4638_v46 = vld [vmem:[%s5861_s2 + $0xc] sm:$0x3] }
 0x22f   :  { %v3553_v4 = vpop.trf.xlu0 }
 0x230   :  { %v4415_v1 = vrot.slane %v4408_v23, %v5095_v17 }
 0x231   :  { %v3569_v18 = vpop.trf.xlu1 }
 0x233   :  { %v3585_v62 = vpop.trf.xlu0 }
 0x234   :  { %v4343_v31 = vcombine.low %v3521_v39, %v3585_v62 }
 0x235   :  { %v3601_v3 = vpop.trf.xlu1 }
 0x236   :  { %v4392_v10 = vcombine.low %v3537_v52, %v3601_v3  ;;  %v4350_v32 = vrot.slane %v4343_v31, %v5089_v12  ;;  %v119_v52 = vpack.i.b16 %v118_v53, %v117_v20 }
 0x237   :  { %v3617_v40 = vpop.trf.xlu0 }
 0x238   :  { %v4351_v5 = vcombine.low %v3553_v4, %v3617_v40  ;;  %v4399_v36 = vrot.slane %v4392_v10, %v5089_v12  ;;  %v4951_v4 = vmov -inf   ;;  %v4639_v10 = vld [vmem:[%s5861_s2 + $0xe] sm:$0x3] }
 0x239   :  { %v3633_v25 = vpop.trf.xlu1  ;;  %22 = vst.msk [vmem:[#allocation2] sm:$0xff] %vm21_vm1, %v4951_v4  ;;  %23 = vst.msk [vmem:[#allocation2 + $0x8] sm:$0xff] %vm21_vm1, %v4951_v4  ;;  %v4849_v26 = vpack.c.bf16 %v4639_v10, %v4635_v9 }
 0x23a   :  { %v4358_v22 = vrot.slane %v4351_v5, %v5089_v12  ;;  %v4400_v33 = vcombine.low %v3569_v18, %v3633_v25  ;;  %v4633_v5 = vld [vmem:[%s5861_s2 + $0x2] sm:$0x3]  ;;  %v4847_v25 = vpack.c.bf16 %v4638_v46, %v4634_v19 }
 0x23b   :  { %v4687_v35 = vrot.slane %v4849_v26, %v5089_v12 }
 0x23c   :  { %v4367_v58 = vcombine.low %v4350_v32, %v4358_v22  ;;  %v4407_v61 = vrot.slane %v4400_v33, %v5089_v12  ;;  %v4846_v32 = vpack.c.bf16 %v4636_v41, %v4632_v24  ;;  %v4848_v22 = vpack.c.bf16 %v4637_v21, %v4633_v5 }
 0x23e   :  { %v4374_v56 = vrot.slane %v4367_v58, %v5095_v17  ;;  %v4416_v49 = vcombine.low %v4399_v36, %v4407_v61  ;;  %v4655_v38 = vrot.slane %v4846_v32, %v5089_v12  ;;  %v4679_v33 = vrot.slane %v4848_v22, %v5089_v12 }
 0x23f   :  { %v4663_v58 = vrot.slane %v4847_v25, %v5089_v12 }
 0x240   :  { %v4423_v15 = vrot.slane %v4416_v49, %v5095_v17  ;;  %v4375_v7 = vcombine.low %v4366_v47, %v4374_v56  ;;  %v4582_v13 = vld [vmem:[#allocation2] sm:$0xff]  ;;  %v4583_v54 = vld [vmem:[#allocation2 + $0x8] sm:$0xff]  ;;  %v4688_v23 = vcombine.low %v4679_v33, %v4687_v35 }
 0x241   :  { %v4664_v59 = vcombine.low %v4655_v38, %v4663_v58 }
 0x242   :  { %v4424_v37 = vcombine.low %v4415_v1, %v4423_v15  ;;  %v4485_v8 = vshrl.u32 %v4375_v7, 16  ;;  %v4695_v61 = vrot.slane %v4688_v23, %v5095_v17 }
 0x243   :  { %v4671_v36 = vrot.slane %v4664_v59, %v5095_v17 }
 0x244   :  { %v4483_v57 = vpack.i.b16 %v4424_v37, %v4375_v7  ;;  %v4486_v48 = vshrl.u32 %v4424_v37, 16  ;;  %v4700_v49 = vshrl.u32 %v4695_v61, 16 }
 0x245   :  { %v4698_v56 = vpack.i.b16 %v4695_v61, %v4671_v36  ;;  %v4699_v47 = vshrl.u32 %v4671_v36, 16 }
 0x246   :  { %4889 = vmatpush3.bf16.msra.mxu0 %v4483_v57  ;;  %v4487_v39 = vpack.i.b16 %v4486_v48, %v4485_v8 }
 0x247   :  { %4914 = vmatprep.subr.bf16.mxu0 %v4949_v60  ;;  %v4707_v29 = vsel %vm4705_vm4, %v4698_v56, 0  ;;  %v4701_v51 = vpack.i.b16 %v4700_v49, %v4699_v47 }
 0x248   :  { %4909 = vmatpush3.bf16.msra.mxu1 %v4487_v39 }
 0x249   :  { %4891 = vmatmul.mubr.bf16.vlgmr.msra.gmra.mrb[0].mxu0 %v115_v28  ;;  %4920 = vmatprep.subr.bf16.mxu1 %v4949_v60  ;;  %v4753_v1 = vsel %vm4705_vm4, %v4701_v51, 0 }
 0x24a   :  { %4916 = vmatprep.mubr.msk.bf16.mxu0 %vm4950_vm0, %v4949_v60  ;;  %4915 = vmatpush3.bf16.msra.mxu0 %v4707_v29 }
 0x24b   :  { %4911 = vmatmul.mubr.bf16.vlgmr.msra.gmra.mrb[0].mxu1 %v119_v52 }
 0x24c   :  { %4922 = vmatprep.mubr.msk.bf16.mxu1 %vm4950_vm0, %v4949_v60  ;;  %4921 = vmatpush3.bf16.msra.mxu1 %v4753_v1 }
 0x31c   :  { %v4523_v63 = vpop.f32.mrb[0].mxu0 }
 0x31d   :  { %v4569_v44 = vmul.f32 0.022097087, %v4523_v63  ;;  %v4892_v6 = vpop.f32.mrb[1].mxu0  ;;  %v4615_v63 = vld [vmem:[#allocation3] sm:$0xff] }
 0x31e   :  { %v4526_v27 = vpop.f32.mrb[2].mxu0  ;;  %v4563_v34 = vpop.f32.mrb[0].mxu1 }
 0x31f   :  { %v4580_v0 = vsel %vm4579_vm2, -1e+30, %v4569_v44  ;;  %v4570_v18 = vmul.f32 0.022097087, %v4563_v34  ;;  %v4893_v11 = vpop.f32.mrb[3].mxu0  ;;  %v4912_v62 = vpop.f32.mrb[1].mxu1 }
 0x320   :  { %v4566_v42 = vpop.f32.mrb[2].mxu1  ;;  %v4585_v14 = vsel %vm4584_vm3, %v4580_v0, -inf  ;;  %v4616_v44 = vld [vmem:[#allocation3 + $0x8] sm:$0xff] }
 0x321   :  { %v4581_v50 = vsel %vm4579_vm2, -1e+30, %v4570_v18  ;;  %v4913_v43 = vpop.f32.mrb[3].mxu1  ;;  %4586 = vmax.xlane.f32.xlu0 %v4585_v14 }
 0x322   :  { %v4588_v60 = vsel %vm4584_vm3, %v4581_v50, -inf }
 0x323   :  { %4589 = vmax.xlane.f32.xlu1 %v4588_v60 }
 0x3ae   :  { %v4587_v2 = vpop.xlane.xlu0 %4586 }
 0x3af   :  { %v4591_v31 = vmax.f32 %v4582_v13, %v4587_v2 }
 0x3b0   :  { %v4590_v3 = vpop.xlane.xlu1 %4589 }
 0x3b1   :  { %v4593_v16 = vsub.f32 %v4582_v13, %v4591_v31  ;;  %4813 = vst.msk [vmem:[#allocation2] sm:$0xff] %vm21_vm1, %v4591_v31  ;;  %v4592_v30 = vmax.f32 %v4583_v54, %v4590_v3  ;;  %4601 = vperm.xlu0 %4932, %v4591_v31  }
 0x3b3   :  { %v4594_v40 = vsub.f32 %v4583_v54, %v4592_v30  ;;  %4814 = vst.msk [vmem:[#allocation2 + $0x8] sm:$0xff] %vm21_vm1, %v4592_v30  ;;  %4606 = vperm.xlu1 %4933, %v4592_v30   ;;  %v4595_v52 = vmul.f32 1.442695, %v4593_v16 }
 0x3b5   :  { %v4597_v4 = vmul.f32 1.442695, %v4594_v40 }
 0x430   :  { %v4602_v15 = vpop.permute.xlu0 %4601 }
 0x431   :  { %v4609_v7 = vsub.f32 %v4580_v0, %v4602_v15 }
 0x432   :  { %v4607_v37 = vpop.permute.xlu1 %4606 }
 0x433   :  { %v4611_v20 = vmul.f32 1.442695, %v4609_v7  ;;  %v4610_v12 = vsub.f32 %v4581_v50, %v4607_v37 }
 0x435   :  { %4934 = vpow2.f32 %v4611_v20  ;;  %v4613_v53 = vmul.f32 1.442695, %v4610_v12 }
 0x437   :  { %4936 = vpow2.f32 %v4613_v53 }
 0x438   :  { %4938 = vpow2.f32 %v4595_v52 }
 0x439   :  { %4940 = vpow2.f32 %v4597_v4 }
 0x43f   :  { %v4935_v57 = vpop.eup %4934 }
 0x440   :  { %v4619_v17 = vsel %vm4584_vm3, %v4935_v57, 0.0  ;;  %v4630_v8 = vpack.c.bf16 %v4935_v57, %v4935_v57 }
 0x441   :  { %v4937_v48 = vpop.eup %4936  ;;  %4620 = vadd.xlane.f32.xlu1 %v4619_v17 }
 0x442   :  { %4917 = vmatmul.mubr.msk.bf16.vlgmr.msra.gmra.mrb[4].mxu0 %vm4584_vm3, %v4630_v8  ;;  %v4622_v28 = vsel %vm4584_vm3, %v4937_v48, 0.0  ;;  %v4631_v39 = vpack.c.bf16 %v4937_v48, %v4937_v48  ;;  %v4939_v45 = vpop.eup %4938 }
 0x443   :  { %4623 = vadd.xlane.f32.xlu0 %v4622_v28  ;;  %v4941_v55 = vpop.eup %4940  ;;  %v4617_v6 = vmul.f32 %v4939_v45, %v4615_v63 }
 0x444   :  { %4923 = vmatmul.mubr.msk.bf16.vlgmr.msra.gmra.mrb[4].mxu1 %vm4584_vm3, %v4631_v39  ;;  %v4618_v0 = vmul.f32 %v4941_v55, %v4616_v44 }
 0x452   :  { %4799 = vperm.xlu1 %4933, %v4939_v45  }
 0x456   :  { %4804 = vperm.xlu1 %4933, %v4941_v55  }
 0x4ce   :  { %v4621_v27 = vpop.xlane.xlu1 %4620 }
 0x4cf   :  { %v4625_v34 = vadd.f32 %v4621_v27, %v4617_v6 }
 0x4d0   :  { %v4624_v18 = vpop.xlane.xlu0 %4623 }
 0x4d1   :  { %4628 = vst.msk [vmem:[#allocation3] sm:$0xff] %vm21_vm1, %v4625_v34  ;;  %v4626_v11 = vadd.f32 %v4624_v18, %v4618_v0 }
 0x4d2   :  { %v4800_v30 = vpop.permute.xlu1 %4799 }
 0x4d3   :  { %4629 = vst.msk [vmem:[#allocation3 + $0x8] sm:$0xff] %vm21_vm1, %v4626_v11  ;;  %v4807_v24 = vmul.f32 0.0, %v4800_v30 }
 0x4d6   :  { %v4805_v40 = vpop.permute.xlu1 %4804 }
 0x4d7   :  { %v4808_v5 = vmul.f32 0.0, %v4805_v40 }
 0x4d8   :  { %v4820_v62 = vld [vmem:[#allocation3] sm:$0xff] }
 0x4d9   :  { %4942 = vrcp.f32 %v4820_v62 }
 0x4da   :  { %v4821_v42 = vld [vmem:[#allocation3 + $0x8] sm:$0xff] }
 0x4db   :  { %4944 = vrcp.f32 %v4821_v42 }
 0x4e3   :  { %v4943_v14 = vpop.eup %4942 }
 0x4e4   :  { %4826 = vperm.xlu1 %4933, %v4943_v14  }
 0x4e5   :  { %v4945_v50 = vpop.eup %4944 }
 0x4e6   :  { %4831 = vperm.xlu0 %4932, %v4945_v50  }
 0x515   :  { %v4743_v43 = vpop.f32.mrb[4].mxu0 }
 0x516   :  { %v4918_v60 = vpop.f32.mrb[5].mxu0  ;;  %v4809_v19 = vadd.f32 %v4807_v24, %v4743_v43 }
 0x517   :  { %v4746_v13 = vpop.f32.mrb[6].mxu0  ;;  %v4789_v2 = vpop.f32.mrb[4].mxu1 }
 0x518   :  { %v4919_v54 = vpop.f32.mrb[7].mxu0  ;;  %v4924_v31 = vpop.f32.mrb[5].mxu1  ;;  %v4810_v41 = vadd.f32 %v4808_v5, %v4789_v2 }
 0x519   :  { %v4792_v3 = vpop.f32.mrb[6].mxu1 }
 0x51a   :  { %v4925_v16 = vpop.f32.mrb[7].mxu1 }
 0x563   :  { %v4827_v9 = vpop.permute.xlu1 %4826 }
 0x564   :  { %v4834_v21 = vmul.f32 %v4827_v9, %v4809_v19 }
 0x565   :  { %v4832_v46 = vpop.permute.xlu0 %4831 }
 0x566   :  { %4836 = vst [vmem:[%s5862_s3] sm:$0xff] %v4834_v21  ;;  %v4835_v10 = vmul.f32 %v4832_v46, %v4810_v41 }
 0x568   :  { %4837 = vst [vmem:[%s5862_s3 + $0x8] sm:$0xff] %v4835_v10 }

// kernel: sharnn_forward.12
= control target key start
LH: loop header
LB: loop body
LE: loop exit
PB: predicated region body
PF: predicated region fallthrough
CT: control target
= control target key end

     0   :  { %v351_v21 = vmov 0   ;;  %v107_v44 = vlaneseq  ;;  %s467_s0 = inlined_call_operand.vmem [shape: f32[16,128], index: 0, kind: input, shape index: {}]   ;;  %s468_s5 = inlined_call_operand.vmem [shape: bf16[128,256], index: 5, kind: input, shape index: {}]   ;;  %s469_s3 = inlined_call_operand.vmem [shape: f32[1,128], index: 3, kind: input, shape index: {}]   ;;  %s470_s4 = inlined_call_operand.vmem [shape: f32[1,128], index: 4, kind: input, shape index: {}]   ;;  %s471_s6 = inlined_call_operand.vmem [shape: f32[1,256], index: 6, kind: input, shape index: {}]   ;;  %s472_s1 = inlined_call_operand.vmem [shape: f32[1,128], index: 1, kind: input, shape index: {}]   ;;  %s473_s2 = inlined_call_operand.vmem [shape: f32[1,128], index: 2, kind: input, shape index: {}]   ;;  %s474_s7 = inlined_call_operand.vmem [shape: f32[16,128], index: 7, kind: output, shape index: {}]  }
   0x1   :  { %v27_v0 = vld [vmem:[%s467_s0] sm:$0xff]  ;;  %v28_v1 = vld [vmem:[%s467_s0 + $0x8] sm:$0xff]  ;;  %v310_v4 = vld [vmem:[%s468_s5 + $0x14] ss:$8 sps:$4 sm:$0xff]   ;;  %229 = vmatprep.mubr.bf16.mxu0 %v351_v21 }
   0x2   :  { %29 = vadd.xlane.f32.xlu0 %v27_v0  ;;  %v307_v2 = vld [vmem:[%s468_s5 + $0x4] ss:$8 sps:$4 sm:$0xff]   ;;  %v309_v3 = vld [vmem:[%s468_s5] ss:$8 sps:$4 sm:$0xff]   ;;  %v312_v13 = vld [vmem:[%s468_s5 + $0x10] ss:$8 sps:$4 sm:$0xff]  }
   0x3   :  { %197 = vmatprep.subr.bf16.mxu0 %v307_v2  ;;  %v313_v14 = vld [vmem:[%s468_s5 + $0x24] ss:$8 sps:$4 sm:$0xff]   ;;  %v315_v15 = vld [vmem:[%s468_s5 + $0x20] ss:$8 sps:$4 sm:$0xff]   ;;  %v316_v16 = vld [vmem:[%s468_s5 + $0x34] ss:$8 sps:$4 sm:$0xff]  }
   0x4   :  { %198 = vmatpush1.bf16.msra.mxu0 %v309_v3  ;;  %v318_v17 = vld [vmem:[%s468_s5 + $0x30] ss:$8 sps:$4 sm:$0xff]   ;;  %v319_v18 = vld [vmem:[%s468_s5 + $0x44] ss:$8 sps:$4 sm:$0xff]   ;;  %v321_v19 = vld [vmem:[%s468_s5 + $0x40] ss:$8 sps:$4 sm:$0xff]  }
   0x5   :  { %199 = vmatprep.subr.bf16.mxu0 %v310_v4  ;;  %v322_v20 = vld [vmem:[%s468_s5 + $0x54] ss:$8 sps:$4 sm:$0xff]   ;;  %v324_v22 = vld [vmem:[%s468_s5 + $0x50] ss:$8 sps:$4 sm:$0xff]   ;;  %v325_v23 = vld [vmem:[%s468_s5 + $0x64] ss:$8 sps:$4 sm:$0xff]  }
   0x6   :  { %31 = vadd.xlane.f32.xlu0 %v28_v1  ;;  %v327_v24 = vld [vmem:[%s468_s5 + $0x60] ss:$8 sps:$4 sm:$0xff]   ;;  %v328_v25 = vld [vmem:[%s468_s5 + $0x74] ss:$8 sps:$4 sm:$0xff]   ;;  %v330_v26 = vld [vmem:[%s468_s5 + $0x70] ss:$8 sps:$4 sm:$0xff]  }
   0x7   :  { %v284_v35 = vld [vmem:[%s469_s3] ss:$0 sm:$0xff]  ;;  %v108_v45 = vshrl.u32 %v107_v44, 7 }
   0x8   :  { %200 = vmatpush1.bf16.msra.mxu0 %v312_v13  ;;  %v285_v39 = vld [vmem:[%s470_s4] ss:$0 sm:$0xff] }
   0x9   :  { %201 = vmatprep.subr.bf16.mxu0 %v313_v14  ;;  %v109_v46 = vsub.s32 0, %v108_v45  ;;  %v105_v47 = vld [vmem:[%s471_s6] sm:$0x3]  ;;  %v113_v48 = vsub.s32 1, %v108_v45 }
   0xb   :  { %v110_v49 = vrot.slane %v105_v47, %v109_v46  ;;  %v114_v50 = vrot.slane %v105_v47, %v113_v48 }
   0xc   :  { %202 = vmatpush1.bf16.msra.mxu0 %v315_v15 }
   0xd   :  { %203 = vmatprep.subr.bf16.mxu0 %v316_v16  ;;  %v283_v16 = vld [vmem:[%s473_s2] ss:$0 sm:$0xff] }
  0x10   :  { %204 = vmatpush1.bf16.msra.mxu0 %v318_v17 }
  0x11   :  { %205 = vmatprep.subr.bf16.mxu0 %v319_v18 }
  0x14   :  { %206 = vmatpush1.bf16.msra.mxu0 %v321_v19 }
  0x15   :  { %207 = vmatprep.subr.bf16.mxu0 %v322_v20 }
  0x18   :  { %208 = vmatpush1.bf16.msra.mxu0 %v324_v22 }
  0x19   :  { %209 = vmatprep.subr.bf16.mxu0 %v325_v23 }
  0x1c   :  { %210 = vmatpush1.bf16.msra.mxu0 %v327_v24 }
  0x1d   :  { %211 = vmatprep.subr.bf16.mxu0 %v328_v25 }
  0x20   :  { %212 = vmatpush1.bf16.msra.mxu0 %v330_v26 }
  0x8f   :  { %v30_v5 = vpop.xlane.xlu0 %29 }
  0x90   :  { %v34_v6 = vmul.f32 0.0078125, %v30_v5 }
  0x92   :  { %v36_v7 = vsub.f32 %v27_v0, %v34_v6 }
  0x93   :  { %v32_v8 = vpop.xlane.xlu0 %31 }
  0x94   :  { %v35_v9 = vmul.f32 0.0078125, %v32_v8  ;;  %v38_v10 = vmul.f32 %v36_v7, %v36_v7 }
  0x96   :  { %v37_v11 = vsub.f32 %v28_v1, %v35_v9  ;;  %40 = vadd.xlane.f32.xlu1 %v38_v10 }
  0x98   :  { %v39_v12 = vmul.f32 %v37_v11, %v37_v11 }
  0x9a   :  { %42 = vadd.xlane.f32.xlu1 %v39_v12 }
 0x123   :  { %v41_v27 = vpop.xlane.xlu1 %40 }
 0x124   :  { %v44_v28 = vmul.f32 0.0078125, %v41_v27 }
 0x126   :  { %v46_v29 = vadd.f32 1e-12, %v44_v28 }
 0x127   :  { %v43_v30 = vpop.xlane.xlu1 %42 }
 0x128   :  { %331 = vrsqrt.f32 %v46_v29  ;;  %v45_v31 = vmul.f32 0.0078125, %v43_v30 }
 0x12a   :  { %v47_v32 = vadd.f32 1e-12, %v45_v31 }
 0x12c   :  { %333 = vrsqrt.f32 %v47_v32 }
 0x132   :  { %v332_v33 = vpop.eup %331 }
 0x133   :  { %v50_v34 = vmul.f32 %v332_v33, %v36_v7 }
 0x135   :  { %v77_v38 = vmul.f32 %v284_v35, %v50_v34 }
 0x136   :  { %v334_v36 = vpop.eup %333 }
 0x137   :  { %v51_v37 = vmul.f32 %v334_v36, %v37_v11  ;;  %v86_v41 = vadd.f32 %v285_v39, %v77_v38  ;;  %v282_v11 = vld [vmem:[%s472_s1] ss:$0 sm:$0xff] }
 0x138   :  { %v59_v13 = vmul.f32 %v282_v11, %v50_v34 }
 0x139   :  { %v78_v40 = vmul.f32 %v284_v35, %v51_v37  ;;  %v60_v19 = vmul.f32 %v282_v11, %v51_v37 }
 0x13a   :  { %v68_v22 = vadd.f32 %v283_v16, %v59_v13 }
 0x13b   :  { %v87_v42 = vadd.f32 %v285_v39, %v78_v40  ;;  %v69_v26 = vadd.f32 %v283_v16, %v60_v19 }
 0x13d   :  { %v88_v43 = vpack.c.bf16 %v87_v42, %v86_v41 }
 0x13f   :  { %230 = vmatmul.mubr.bf16.vlgmr.msra.gmra.mrb[0].mxu0 %v88_v43 }
 0x212   :  { %v231_v51 = vpop.f32.mrb[0].mxu0 }
 0x213   :  { %v232_v52 = vadd.f32 %v231_v51, %v110_v49  ;;  %v233_v53 = vpop.f32.mrb[1].mxu0 }
 0x214   :  { %v234_v54 = vadd.f32 %v233_v53, %v114_v50  ;;  %v235_v55 = vpop.f32.mrb[2].mxu0 }
 0x215   :  { %v302_v56 = vmul.f32 -1.702, %v232_v52  ;;  %v236_v57 = vadd.f32 %v235_v55, %v110_v49  ;;  %v237_v58 = vpop.f32.mrb[3].mxu0 }
 0x216   :  { %v303_v59 = vmul.f32 -1.702, %v234_v54  ;;  %v238_v60 = vadd.f32 %v237_v58, %v114_v50 }
 0x217   :  { %v248_v61 = vmul.f32 1.442695, %v302_v56  ;;  %v304_v62 = vmul.f32 -1.702, %v236_v57 }
 0x218   :  { %v250_v63 = vmul.f32 1.442695, %v303_v59  ;;  %v305_v0 = vmul.f32 -1.702, %v238_v60 }
 0x219   :  { %335 = vpow2.f32 %v248_v61  ;;  %v252_v1 = vmul.f32 1.442695, %v304_v62 }
 0x21a   :  { %337 = vpow2.f32 %v250_v63  ;;  %v254_v2 = vmul.f32 1.442695, %v305_v0 }
 0x21b   :  { %339 = vpow2.f32 %v252_v1 }
 0x21c   :  { %341 = vpow2.f32 %v254_v2 }
 0x223   :  { %v336_v3 = vpop.eup %335 }
 0x224   :  { %v338_v4 = vpop.eup %337  ;;  %v256_v5 = vadd.f32 1.0, %v336_v3 }
 0x225   :  { %v340_v6 = vpop.eup %339  ;;  %v257_v7 = vadd.f32 1.0, %v338_v4 }
 0x226   :  { %v342_v8 = vpop.eup %341  ;;  %343 = vrcp.f32 %v256_v5  ;;  %v258_v9 = vadd.f32 1.0, %v340_v6 }
 0x227   :  { %345 = vrcp.f32 %v257_v7  ;;  %v259_v10 = vadd.f32 1.0, %v342_v8 }
 0x228   :  { %347 = vrcp.f32 %v258_v9 }
 0x229   :  { %349 = vrcp.f32 %v259_v10 }
 0x230   :  { %v344_v12 = vpop.eup %343 }
 0x231   :  { %v346_v14 = vpop.eup %345  ;;  %v268_v15 = vmul.f32 %v344_v12, %v232_v52 }
 0x232   :  { %v348_v17 = vpop.eup %347  ;;  %v269_v18 = vmul.f32 %v346_v14, %v234_v54 }
 0x233   :  { %v350_v20 = vpop.eup %349  ;;  %v270_v21 = vmul.f32 %v348_v17, %v236_v57 }
 0x234   :  { %v272_v23 = vadd.f32 %v269_v18, %v268_v15  ;;  %v271_v24 = vmul.f32 %v350_v20, %v238_v60 }
 0x236   :  { %v274_v25 = vadd.f32 %v272_v23, %v68_v22  ;;  %v273_v27 = vadd.f32 %v271_v24, %v270_v21 }
 0x238   :  { %276 = vst [vmem:[%s474_s7] sm:$0xff] %v274_v25  ;;  %v275_v28 = vadd.f32 %v273_v27, %v69_v26 }
 0x23a   :  { %277 = vst [vmem:[%s474_s7 + $0x8] sm:$0xff] %v275_v28 }

</bundles_post_ra>
